<compile_context>
chip_gen: v7x
topology: tpu7x:2x2x1
jax: 0.10.0
libtpu: 0.0.40
codegen_flags: <defaults>
</compile_context>

<pallas_src>
import functools
import math

import numpy as np
import jax
import jax.numpy as jnp
from jax.experimental import pallas as pl
from jax.experimental.pallas import tpu as pltpu

_HIGH = jax.lax.Precision.HIGHEST


def _mm(a, b):
    return jnp.dot(a, b, precision=_HIGH, preferred_element_type=jnp.float32)


def _phi_chain(u, v, g1, g2):
    """Direct port of activation_func_phi (sequential masked overwrites)."""
    vpos = v >= 0.0
    vneg = v < 0.0
    c1 = (vpos & (v + g1 + g2 <= u)) | (vneg & (u >= g1 + g2))
    c2 = (vpos & (v + g1 - g2 <= u) & (u < v + g1 + g2)) | \
         (vneg & (v - g1 + g2 > u) & (u >= v - g1 - g2))
    c3 = (vpos & (g1 - g2 <= u) & (v + g1 - g2 > u)) | (vneg & (u < v - g1 - g2))
    c4 = (vpos & (u >= -g1 - g2) & (u < g1 - g2)) | \
         (vneg & (u >= -g1 + g2) & (u < g1 + g2))
    c5 = vpos & (u < -g1 - g2)
    c6 = vneg & (u < v - g1 - g2)
    r = jnp.zeros_like(u)
    r = jnp.where(c1, u - g1 - g2, r)
    r = jnp.where(c2, v, r)
    r = jnp.where(c3, u - g1 + g2, r)
    r = jnp.where(c4, jnp.zeros_like(u), r)
    r = jnp.where(c5, u + g1 + g2, r)
    r = jnp.where(c6, u - g1 + g2, r)
    return r


def _phi_fast(u, v, g1, g2):
    """Branchless form of _phi_chain (same piecewise regions, g1 >= g2 >= 0).

    v >= 0:  u >= g1-g2 -> max(min(u-g1+g2, v), u-g1-g2) ; else min(u+g1+g2, 0)
    v <  0:  u >= v-g1+g2 -> max(u-g1-g2, 0)
             else (u >= v-g1-g2 -> v, else u-g1+g2)
    """
    zero = jnp.zeros_like(u)
    pos = jnp.where(u >= g1 - g2,
                    jnp.maximum(jnp.minimum(u - g1 + g2, v), u - g1 - g2),
                    jnp.minimum(u + g1 + g2, zero))
    neg = jnp.where(u >= v - g1 + g2,
                    jnp.maximum(u - g1 - g2, zero),
                    jnp.where(u >= v - g1 - g2, v, u - g1 + g2))
    return jnp.where(v >= 0.0, pos, neg)


def _sista_kernel(scal_ref, bias_ref, h0w_ref, h0_ref, S_ref, G_ref,
                  h_out_ref, *, K):
    """Whole time recurrence for one batch chunk in a single invocation."""
    T = bias_ref.shape[0]
    g1 = scal_ref[0]
    g2 = scal_ref[1]
    h0w = h0w_ref[...]          # (bc, H)  time-invariant h0 @ W (precomputed)
    S = S_ref[...]              # (H, H)
    G = G_ref[...]              # (H, H)

    def step(t, h_prev):
        bias = bias_ref[t]                      # (bc, H) precomputed compressed@U^T
        v = _mm(h_prev, G)                      # (bc, H)
        h_k = _phi_fast(h0w + bias, v, g1, g2)  # layer 0 uses the initial state
        for _ in range(1, K):                   # layers 1..K-1, static unroll
            h_k = _phi_fast(_mm(h_k, S) + bias, v, g1, g2)
        h_out_ref[t] = h_k                      # lane-dense (bc, 256) store
        return h_k                              # carry h_{t} to next step

    jax.lax.fori_loop(0, T, step, h0_ref[...])


def l1_l1_forward(data, A, D, h0, G, l1, l2, a, K, *, batch_chunk=8):
    T, B, P = data.shape
    C = A.shape[0]
    H = D.shape[1]

    # ---- one-time setup (plain JAX, outside the recurrent hot loop) ----
    U = (1.0 / a) * _mm(D.T, A.T)                       # (H, C)
    AD = _mm(A, D)                                      # (C, H)
    W = G - _mm(U, _mm(AD, G))                          # (H, H)
    S = jnp.eye(H, dtype=jnp.float32) - _mm(U, AD)      # (H, H)

    comp = _mm(data.reshape(T * B, P), A.T)             # (T*B, C)
    bias = _mm(comp, U.T).reshape(T, B, H)              # (T, B, H) hoisted bias

    # pad batch to a multiple of 8 sublanes / batch_chunk (padded rows stay 0)
    Bp = max(batch_chunk, ((B + 7) // 8) * 8)
    Bp = ((Bp + batch_chunk - 1) // batch_chunk) * batch_chunk
    pad = Bp - B
    bias_p = jnp.pad(bias, ((0, 0), (0, pad), (0, 0)))
    h0_p = jnp.pad(h0, ((0, pad), (0, 0)))
    h0W = _mm(h0_p, W)                                  # (Bp, H) hoisted, drops W

    scal = jnp.array([l1 / a, l2 / a], dtype=jnp.float32)   # g1, g2 on host
    nb = Bp // batch_chunk

    h_all = pl.pallas_call(
        functools.partial(_sista_kernel, K=K),
        out_shape=jax.ShapeDtypeStruct((T, Bp, H), jnp.float32),
        grid=(nb,),
        in_specs=[
            pl.BlockSpec(memory_space=pltpu.MemorySpace.SMEM),        # [g1, g2]
            pl.BlockSpec((T, batch_chunk, H), lambda b: (0, b, 0)),   # bias_all
            pl.BlockSpec((batch_chunk, H), lambda b: (b, 0)),         # h0 @ W
            pl.BlockSpec((batch_chunk, H), lambda b: (b, 0)),         # h0
            pl.BlockSpec((H, H), lambda b: (0, 0)),                   # S
            pl.BlockSpec((H, H), lambda b: (0, 0)),                   # G
        ],
        out_specs=pl.BlockSpec((T, batch_chunk, H), lambda b: (0, b, 0)),
        compiler_params=pltpu.CompilerParams(
            dimension_semantics=("parallel",),        # batch chunks independent
            vmem_limit_bytes=64 * 1024 * 1024),
    )(scal, bias_p, h0W, h0_p, S, G)

    # ---- decode epilogue: one batched lane-friendly matmul ----
    out = _mm(h_all[:, :B].reshape(T * B, H), D.T).reshape(T, B, P)
    return out


def l1_l1_reference(data, A, D, h0, G, l1, l2, a, K):
    """Pure-JAX port of the torch forward, for correctness checking."""
    T, B, P = data.shape
    H = D.shape[1]
    U = (1.0 / a) * _mm(D.T, A.T)
    AD = _mm(A, D)
    W = G - _mm(U, _mm(AD, G))
    S = jnp.eye(H, dtype=jnp.float32) - _mm(U, AD)
    comp = _mm(data.reshape(-1, P), A.T).reshape(T, B, -1)
    g1, g2 = l1 / a, l2 / a
    h_prev = h0
    outs = []
    for t in range(T):
        v = _mm(h_prev, G)
        bias = _mm(comp[t], U.T)
        h_k = None
        for i in range(K):
            if i == 0:
                u = _mm(h0, W) + bias
            else:
                u = _mm(h_k, S) + bias
            h_k = _phi_chain(u, v, g1, g2)
        outs.append(_mm(h_k, D.T))
        h_prev = h_k
    return jnp.stack(outs)


def build_dct_dictionary(n, m):
    """Overcomplete 2-D DCT dictionary (n^2, m^2) — stand-in for DCTDictionary."""
    d1 = np.zeros((n, m), dtype=np.float64)
    for k in range(m):
        v = np.cos(np.arange(n) * k * np.pi / m)
        if k > 0:
            v = v - v.mean()
        d1[:, k] = v / np.linalg.norm(v)
    return np.kron(d1, d1).astype(np.float32)


if __name__ == "__main__":
    # Small shapes consistent with the module (original uses hidden = 101*101;
    # scaled down here to a perfect square that tiles nicely on TPU lanes).
    input_dim = 16          # 4x4 patches  -> sqrt(input) = 4
    hidden = 256            # 16x16 DCT atoms -> sqrt(hidden) = 16
    compression_rate = 0.5
    divider_for_A = 64.0
    K = 3                   # hidden_layers
    batch = 4
    T = 6                   # time steps
    compressed = int(input_dim * compression_rate)

    # deterministic parameter init (the module uses an unseeded RandomState)
    prng = np.random.RandomState(0)
    A = jnp.asarray(
        prng.uniform(size=(compressed, input_dim)).astype(np.float32) / divider_for_A)
    D = jnp.asarray(
        build_dct_dictionary(int(math.sqrt(input_dim)), int(math.sqrt(hidden))))
    h0 = jnp.zeros((batch, hidden), dtype=jnp.float32)
    G = jnp.eye(hidden, dtype=jnp.float32)
    l1, l2, a = 1.0, 0.01, 1.0

    # deterministic example input (scaled so the soft-threshold actually fires
    # and the recurrence produces non-trivial hidden states)
    key = jax.random.PRNGKey(0)
    data = 100.0 * jax.random.uniform(key, (T, batch, input_dim), dtype=jnp.float32)

    out = l1_l1_forward(data, A, D, h0, G, l1, l2, a, K)
    out = jax.block_until_ready(out)

    ref = jax.block_until_ready(l1_l1_reference(data, A, D, h0, G, l1, l2, a, K))
    np.testing.assert_allclose(np.asarray(out), np.asarray(ref),
                               rtol=2e-3, atol=2e-3)
    assert out.shape == (T, batch, input_dim)
    print("KERNEL_OK")
</pallas_src>

<mosaic_0001>
module attributes {stable_mosaic.version = 11 : i64} {
  func.func @_sista_kernel(%arg0: i32, %arg1: memref<2xf32, #tpu.memory_space<smem>>, %arg2: memref<6x8x256xf32, #tpu.memory_space<vmem>>, %arg3: memref<8x256xf32, #tpu.memory_space<vmem>>, %arg4: memref<8x256xf32, #tpu.memory_space<vmem>>, %arg5: memref<256x256xf32, #tpu.memory_space<vmem>>, %arg6: memref<256x256xf32, #tpu.memory_space<vmem>>, %arg7: memref<6x8x256xf32, #tpu.memory_space<vmem>>) attributes {dimension_semantics = [#tpu.dimension_semantics<parallel>], iteration_bounds = array<i64: 1>, scalar_prefetch = 0 : i64, scratch_operands = 0 : i64, tpu.core_type = #tpu.core_type<tc>, window_params = [{transform_indices = @transform_0, window_bounds = array<i64: 2>}, {transform_indices = @transform_1, window_bounds = array<i64: 6, 8, 256>}, {transform_indices = @transform_2, window_bounds = array<i64: 8, 256>}, {transform_indices = @transform_3, window_bounds = array<i64: 8, 256>}, {pipeline_mode = #tpu.pipeline_mode<synchronous>, transform_indices = @transform_4, window_bounds = array<i64: 256, 256>}, {pipeline_mode = #tpu.pipeline_mode<synchronous>, transform_indices = @transform_5, window_bounds = array<i64: 256, 256>}, {transform_indices = @transform_6, window_bounds = array<i64: 6, 8, 256>}]} {
    %c0 = arith.constant 0 : index
    %0 = memref.load %arg1[%c0] : memref<2xf32, #tpu.memory_space<smem>>
    %c1 = arith.constant 1 : index
    %1 = memref.load %arg1[%c1] : memref<2xf32, #tpu.memory_space<smem>>
    %c0_0 = arith.constant 0 : index
    %c0_1 = arith.constant 0 : index
    %2 = vector.load %arg3[%c0_0, %c0_1] : memref<8x256xf32, #tpu.memory_space<vmem>>, vector<8x256xf32>
    %c0_2 = arith.constant 0 : index
    %c0_3 = arith.constant 0 : index
    %3 = vector.load %arg5[%c0_2, %c0_3] : memref<256x256xf32, #tpu.memory_space<vmem>>, vector<256x256xf32>
    %c0_4 = arith.constant 0 : index
    %c0_5 = arith.constant 0 : index
    %4 = vector.load %arg6[%c0_4, %c0_5] : memref<256x256xf32, #tpu.memory_space<vmem>>, vector<256x256xf32>
    %c0_6 = arith.constant 0 : index
    %c0_7 = arith.constant 0 : index
    %5 = vector.load %arg4[%c0_6, %c0_7] : memref<8x256xf32, #tpu.memory_space<vmem>>, vector<8x256xf32>
    %c0_i32 = arith.constant 0 : i32
    %c6_i32 = arith.constant 6 : i32
    %6 = arith.addi %c0_i32, %c6_i32 : i32
    %c1_i32 = arith.constant 1 : i32
    %7 = scf.for %arg8 = %c0_i32 to %6 step %c1_i32 iter_args(%arg9 = %5) -> (vector<8x256xf32>)  : i32 {
      %8 = arith.index_cast %arg8 : i32 to index
      %c0_9 = arith.constant 0 : index
      %c0_10 = arith.constant 0 : index
      %9 = vector.load %arg2[%8, %c0_9, %c0_10] : memref<6x8x256xf32, #tpu.memory_space<vmem>>, vector<1x8x256xf32>
      %10 = vector.shape_cast %9 : vector<1x8x256xf32> to vector<8x256xf32>
      %cst = arith.constant dense<0.000000e+00> : vector<8x256xf32>
      %11 = tpu.matmul %arg9, %4, %cst {dimension_numbers = #tpu.dot_dimension_numbers<[1], [0], [0], [1], [0, 0, 1, 1], [], []>, precision = #tpu.contract_precision<fp32>} : vector<8x256xf32>, vector<256x256xf32>, vector<8x256xf32> -> vector<8x256xf32>
      %12 = arith.addf %2, %10 : vector<8x256xf32>
      %cst_11 = arith.constant 0.000000e+00 : f32
      %13 = vector.broadcast %cst_11 : f32 to vector<8x256xf32>
      %14 = arith.subf %0, %1 : f32
      %15 = vector.broadcast %14 : f32 to vector<8x256xf32>
      %16 = arith.cmpf oge, %12, %15 : vector<8x256xf32>
      %17 = vector.broadcast %0 : f32 to vector<8x256xf32>
      %18 = arith.subf %12, %17 : vector<8x256xf32>
      %19 = vector.broadcast %1 : f32 to vector<8x256xf32>
      %20 = arith.addf %18, %19 : vector<8x256xf32>
      %21 = arith.minimumf %20, %11 : vector<8x256xf32>
      %22 = vector.broadcast %0 : f32 to vector<8x256xf32>
      %23 = arith.subf %12, %22 : vector<8x256xf32>
      %24 = vector.broadcast %1 : f32 to vector<8x256xf32>
      %25 = arith.subf %23, %24 : vector<8x256xf32>
      %26 = arith.maximumf %21, %25 : vector<8x256xf32>
      %27 = vector.broadcast %0 : f32 to vector<8x256xf32>
      %28 = arith.addf %12, %27 : vector<8x256xf32>
      %29 = vector.broadcast %1 : f32 to vector<8x256xf32>
      %30 = arith.addf %28, %29 : vector<8x256xf32>
      %31 = arith.minimumf %30, %13 : vector<8x256xf32>
      %32 = arith.select %16, %26, %31 : vector<8x256xi1>, vector<8x256xf32>
      %33 = vector.broadcast %0 : f32 to vector<8x256xf32>
      %34 = arith.subf %11, %33 : vector<8x256xf32>
      %35 = vector.broadcast %1 : f32 to vector<8x256xf32>
      %36 = arith.addf %34, %35 : vector<8x256xf32>
      %37 = arith.cmpf oge, %12, %36 : vector<8x256xf32>
      %38 = vector.broadcast %0 : f32 to vector<8x256xf32>
      %39 = arith.subf %12, %38 : vector<8x256xf32>
      %40 = vector.broadcast %1 : f32 to vector<8x256xf32>
      %41 = arith.subf %39, %40 : vector<8x256xf32>
      %42 = arith.maximumf %41, %13 : vector<8x256xf32>
      %43 = vector.broadcast %0 : f32 to vector<8x256xf32>
      %44 = arith.subf %11, %43 : vector<8x256xf32>
      %45 = vector.broadcast %1 : f32 to vector<8x256xf32>
      %46 = arith.subf %44, %45 : vector<8x256xf32>
      %47 = arith.cmpf oge, %12, %46 : vector<8x256xf32>
      %48 = vector.broadcast %0 : f32 to vector<8x256xf32>
      %49 = arith.subf %12, %48 : vector<8x256xf32>
      %50 = vector.broadcast %1 : f32 to vector<8x256xf32>
      %51 = arith.addf %49, %50 : vector<8x256xf32>
      %52 = arith.select %47, %11, %51 : vector<8x256xi1>, vector<8x256xf32>
      %53 = arith.select %37, %42, %52 : vector<8x256xi1>, vector<8x256xf32>
      %cst_12 = arith.constant 0.000000e+00 : f32
      %54 = vector.broadcast %cst_12 : f32 to vector<8x256xf32>
      %55 = arith.cmpf oge, %11, %54 : vector<8x256xf32>
      %56 = arith.select %55, %32, %53 : vector<8x256xi1>, vector<8x256xf32>
      %cst_13 = arith.constant dense<0.000000e+00> : vector<8x256xf32>
      %57 = tpu.matmul %56, %3, %cst_13 {dimension_numbers = #tpu.dot_dimension_numbers<[1], [0], [0], [1], [0, 0, 1, 1], [], []>, precision = #tpu.contract_precision<fp32>} : vector<8x256xf32>, vector<256x256xf32>, vector<8x256xf32> -> vector<8x256xf32>
      %58 = arith.addf %57, %10 : vector<8x256xf32>
      %cst_14 = arith.constant 0.000000e+00 : f32
      %59 = vector.broadcast %cst_14 : f32 to vector<8x256xf32>
      %60 = arith.subf %0, %1 : f32
      %61 = vector.broadcast %60 : f32 to vector<8x256xf32>
      %62 = arith.cmpf oge, %58, %61 : vector<8x256xf32>
      %63 = vector.broadcast %0 : f32 to vector<8x256xf32>
      %64 = arith.subf %58, %63 : vector<8x256xf32>
      %65 = vector.broadcast %1 : f32 to vector<8x256xf32>
      %66 = arith.addf %64, %65 : vector<8x256xf32>
      %67 = arith.minimumf %66, %11 : vector<8x256xf32>
      %68 = vector.broadcast %0 : f32 to vector<8x256xf32>
      %69 = arith.subf %58, %68 : vector<8x256xf32>
      %70 = vector.broadcast %1 : f32 to vector<8x256xf32>
      %71 = arith.subf %69, %70 : vector<8x256xf32>
      %72 = arith.maximumf %67, %71 : vector<8x256xf32>
      %73 = vector.broadcast %0 : f32 to vector<8x256xf32>
      %74 = arith.addf %58, %73 : vector<8x256xf32>
      %75 = vector.broadcast %1 : f32 to vector<8x256xf32>
      %76 = arith.addf %74, %75 : vector<8x256xf32>
      %77 = arith.minimumf %76, %59 : vector<8x256xf32>
      %78 = arith.select %62, %72, %77 : vector<8x256xi1>, vector<8x256xf32>
      %79 = vector.broadcast %0 : f32 to vector<8x256xf32>
      %80 = arith.subf %11, %79 : vector<8x256xf32>
      %81 = vector.broadcast %1 : f32 to vector<8x256xf32>
      %82 = arith.addf %80, %81 : vector<8x256xf32>
      %83 = arith.cmpf oge, %58, %82 : vector<8x256xf32>
      %84 = vector.broadcast %0 : f32 to vector<8x256xf32>
      %85 = arith.subf %58, %84 : vector<8x256xf32>
      %86 = vector.broadcast %1 : f32 to vector<8x256xf32>
      %87 = arith.subf %85, %86 : vector<8x256xf32>
      %88 = arith.maximumf %87, %59 : vector<8x256xf32>
      %89 = vector.broadcast %0 : f32 to vector<8x256xf32>
      %90 = arith.subf %11, %89 : vector<8x256xf32>
      %91 = vector.broadcast %1 : f32 to vector<8x256xf32>
      %92 = arith.subf %90, %91 : vector<8x256xf32>
      %93 = arith.cmpf oge, %58, %92 : vector<8x256xf32>
      %94 = vector.broadcast %0 : f32 to vector<8x256xf32>
      %95 = arith.subf %58, %94 : vector<8x256xf32>
      %96 = vector.broadcast %1 : f32 to vector<8x256xf32>
      %97 = arith.addf %95, %96 : vector<8x256xf32>
      %98 = arith.select %93, %11, %97 : vector<8x256xi1>, vector<8x256xf32>
      %99 = arith.select %83, %88, %98 : vector<8x256xi1>, vector<8x256xf32>
      %cst_15 = arith.constant 0.000000e+00 : f32
      %100 = vector.broadcast %cst_15 : f32 to vector<8x256xf32>
      %101 = arith.cmpf oge, %11, %100 : vector<8x256xf32>
      %102 = arith.select %101, %78, %99 : vector<8x256xi1>, vector<8x256xf32>
      %cst_16 = arith.constant dense<0.000000e+00> : vector<8x256xf32>
      %103 = tpu.matmul %102, %3, %cst_16 {dimension_numbers = #tpu.dot_dimension_numbers<[1], [0], [0], [1], [0, 0, 1, 1], [], []>, precision = #tpu.contract_precision<fp32>} : vector<8x256xf32>, vector<256x256xf32>, vector<8x256xf32> -> vector<8x256xf32>
      %104 = arith.addf %103, %10 : vector<8x256xf32>
      %cst_17 = arith.constant 0.000000e+00 : f32
      %105 = vector.broadcast %cst_17 : f32 to vector<8x256xf32>
      %106 = arith.subf %0, %1 : f32
      %107 = vector.broadcast %106 : f32 to vector<8x256xf32>
      %108 = arith.cmpf oge, %104, %107 : vector<8x256xf32>
      %109 = vector.broadcast %0 : f32 to vector<8x256xf32>
      %110 = arith.subf %104, %109 : vector<8x256xf32>
      %111 = vector.broadcast %1 : f32 to vector<8x256xf32>
      %112 = arith.addf %110, %111 : vector<8x256xf32>
      %113 = arith.minimumf %112, %11 : vector<8x256xf32>
      %114 = vector.broadcast %0 : f32 to vector<8x256xf32>
      %115 = arith.subf %104, %114 : vector<8x256xf32>
      %116 = vector.broadcast %1 : f32 to vector<8x256xf32>
      %117 = arith.subf %115, %116 : vector<8x256xf32>
      %118 = arith.maximumf %113, %117 : vector<8x256xf32>
      %119 = vector.broadcast %0 : f32 to vector<8x256xf32>
      %120 = arith.addf %104, %119 : vector<8x256xf32>
      %121 = vector.broadcast %1 : f32 to vector<8x256xf32>
      %122 = arith.addf %120, %121 : vector<8x256xf32>
      %123 = arith.minimumf %122, %105 : vector<8x256xf32>
      %124 = arith.select %108, %118, %123 : vector<8x256xi1>, vector<8x256xf32>
      %125 = vector.broadcast %0 : f32 to vector<8x256xf32>
      %126 = arith.subf %11, %125 : vector<8x256xf32>
      %127 = vector.broadcast %1 : f32 to vector<8x256xf32>
      %128 = arith.addf %126, %127 : vector<8x256xf32>
      %129 = arith.cmpf oge, %104, %128 : vector<8x256xf32>
      %130 = vector.broadcast %0 : f32 to vector<8x256xf32>
      %131 = arith.subf %104, %130 : vector<8x256xf32>
      %132 = vector.broadcast %1 : f32 to vector<8x256xf32>
      %133 = arith.subf %131, %132 : vector<8x256xf32>
      %134 = arith.maximumf %133, %105 : vector<8x256xf32>
      %135 = vector.broadcast %0 : f32 to vector<8x256xf32>
      %136 = arith.subf %11, %135 : vector<8x256xf32>
      %137 = vector.broadcast %1 : f32 to vector<8x256xf32>
      %138 = arith.subf %136, %137 : vector<8x256xf32>
      %139 = arith.cmpf oge, %104, %138 : vector<8x256xf32>
      %140 = vector.broadcast %0 : f32 to vector<8x256xf32>
      %141 = arith.subf %104, %140 : vector<8x256xf32>
      %142 = vector.broadcast %1 : f32 to vector<8x256xf32>
      %143 = arith.addf %141, %142 : vector<8x256xf32>
      %144 = arith.select %139, %11, %143 : vector<8x256xi1>, vector<8x256xf32>
      %145 = arith.select %129, %134, %144 : vector<8x256xi1>, vector<8x256xf32>
      %cst_18 = arith.constant 0.000000e+00 : f32
      %146 = vector.broadcast %cst_18 : f32 to vector<8x256xf32>
      %147 = arith.cmpf oge, %11, %146 : vector<8x256xf32>
      %148 = arith.select %147, %124, %145 : vector<8x256xi1>, vector<8x256xf32>
      %149 = arith.index_cast %arg8 : i32 to index
      %c0_19 = arith.constant 0 : index
      %c0_20 = arith.constant 0 : index
      %150 = vector.load %arg7[%149, %c0_19, %c0_20] : memref<6x8x256xf32, #tpu.memory_space<vmem>>, vector<1x8x256xf32>
      %151 = vector.shape_cast %150 : vector<1x8x256xf32> to vector<8x256xf32>
      %152 = vector.shape_cast %148 : vector<8x256xf32> to vector<1x8x256xf32>
      tpu.vector_store %arg7[%149, %c0_19, %c0_20], %152 {strides = array<i32>} : memref<6x8x256xf32, #tpu.memory_space<vmem>>, vector<1x8x256xf32>,
      scf.yield %148 : vector<8x256xf32>
    }
    %c6_i32_8 = arith.constant 6 : i32
    return
  }
  func.func @transform_0(%arg0: i32) -> i32 {
    %c0_i32 = arith.constant 0 : i32
    %c0_i32_0 = arith.constant 0 : i32
    return %c0_i32 : i32
  }
  func.func @transform_1(%arg0: i32) -> (i32, i32, i32) {
    %c0_i32 = arith.constant 0 : i32
    %c0_i32_0 = arith.constant 0 : i32
    %c0_i32_1 = arith.constant 0 : i32
    return %c0_i32, %arg0, %c0_i32_0 : i32, i32, i32
  }
  func.func @transform_2(%arg0: i32) -> (i32, i32) {
    %c0_i32 = arith.constant 0 : i32
    %c0_i32_0 = arith.constant 0 : i32
    return %arg0, %c0_i32 : i32, i32
  }
  func.func @transform_3(%arg0: i32) -> (i32, i32) {
    %c0_i32 = arith.constant 0 : i32
    %c0_i32_0 = arith.constant 0 : i32
    return %arg0, %c0_i32 : i32, i32
  }
  func.func @transform_4(%arg0: i32) -> (i32, i32) {
    %c0_i32 = arith.constant 0 : i32
    %c0_i32_0 = arith.constant 0 : i32
    %c0_i32_1 = arith.constant 0 : i32
    return %c0_i32, %c0_i32_0 : i32, i32
  }
  func.func @transform_5(%arg0: i32) -> (i32, i32) {
    %c0_i32 = arith.constant 0 : i32
    %c0_i32_0 = arith.constant 0 : i32
    %c0_i32_1 = arith.constant 0 : i32
    return %c0_i32, %c0_i32_0 : i32, i32
  }
  func.func @transform_6(%arg0: i32) -> (i32, i32, i32) {
    %c0_i32 = arith.constant 0 : i32
    %c0_i32_0 = arith.constant 0 : i32
    %c0_i32_1 = arith.constant 0 : i32
    return %c0_i32, %arg0, %c0_i32_0 : i32, i32, i32
  }
}

</mosaic_0001>

<bundles_post_ra>
// kernel: tpu_custom_call.1
= control target key start
LH: loop header
LB: loop body
LE: loop exit
PB: predicated region body
PF: predicated region fallthrough
CT: control target
= control target key end

     0   :  { %11 = vsyncpa [#allocation5], 0  ;;  %s8728_s0 = inlined_call_operand.hbm [shape: f32[2], index: 0, kind: input, shape index: {}]   ;;  %s8729_s1 = inlined_call_operand.hbm [shape: f32[6,8,256], index: 1, kind: input, shape index: {}]   ;;  %s8730_s2 = inlined_call_operand.hbm [shape: f32[8,256], index: 2, kind: input, shape index: {}]   ;;  %s8731_s3 = inlined_call_operand.hbm [shape: f32[8,256], index: 3, kind: input, shape index: {}]   ;;  %s8732_s4 = inlined_call_operand.hbm [shape: f32[256,256], index: 4, kind: input, shape index: {}]   ;;  %s8733_s5 = inlined_call_operand.hbm [shape: f32[256,256], index: 5, kind: input, shape index: {}]   ;;  %s8734_s6 = inlined_call_operand.hbm [shape: f32[6,8,256], index: 6, kind: output, shape index: {}]  }
   0x1   :  { %12 = vsyncpa [#allocation3], 0 }
   0x2   :  { %13 = vsyncpa [#allocation8], 0 }
   0x3   :  { %14 = vsyncpa [#allocation11], 0 }
   0x4   :  { %15 = vsyncpa [#allocation4], 0  ;;  %s5650_s21 = smov [#allocation7]   ;;  %s5474_s25 = scalar_lea.hbm %s8730_s2, 256 }
   0x5   :  { %s42_s22 = sshll.u32 %s5650_s21, 4  ;;  %p5475_p0 = scmp.ne.s32.totalorder %s8730_s2, %s5474_s25  ;;  %s43_s22 = int_to_ptr.vmem [resolvable:$true] %s42_s22 }
   0x6   :  { %p5478_p1 = scmp.lt.u32.totalorder %s5474_s25, %s8730_s2 }
   0x8   :  { %p5480_p2 = pnand %p5478_p1, %p5475_p0 }
   0xa   :  { %5483 = shalt.err (!%p5480_p2)
}
   0xb   :  { %s5484_s30 = scalar_lea.vmem %s43_s22, 256  ;;  %p5489_p4 = scmp.lt.s32.totalorder %s43_s22, %s43_s22 }
   0xc   :  { %p5485_p3 = scmp.ne.s32.totalorder %s43_s22, %s5484_s30  ;;  %p5490_p5 = scmp.lt.s32.totalorder %s5484_s30, %s5484_s30 }
   0xe   :  { %p5491_p6 = por %p5490_p5, %p5489_p4 }
  0x10   :  { %p5492_p7 = pnand %p5491_p6, %p5485_p3 }
  0x12   :  { %5495 = shalt.err (!%p5492_p7)
}
  0x13   :  { %45 = dma.hbm_to_vmem [thread:$0]  %s8730_s2, 256, %s43_s22, [#allocation8]  }
  0x14   :  { %s5651_s9 = smov [#allocation10]   ;;  %s5496_s13 = scalar_lea.hbm %s8732_s4, 8192 }
  0x15   :  { %s61_s10 = sshll.u32 %s5651_s9, 4  ;;  %p5497_p8 = scmp.ne.s32.totalorder %s8732_s4, %s5496_s13  ;;  %s62_s10 = int_to_ptr.vmem [resolvable:$true] %s61_s10 }
  0x16   :  { %p5500_p9 = scmp.lt.u32.totalorder %s5496_s13, %s8732_s4 }
  0x18   :  { %p5502_p10 = pnand %p5500_p9, %p5497_p8 }
  0x1a   :  { %5505 = shalt.err (!%p5502_p10)
}
  0x1b   :  { %s5506_s18 = scalar_lea.vmem %s62_s10, 8192  ;;  %p5511_p12 = scmp.lt.s32.totalorder %s62_s10, %s62_s10 }
  0x1c   :  { %p5507_p11 = scmp.ne.s32.totalorder %s62_s10, %s5506_s18  ;;  %p5512_p13 = scmp.lt.s32.totalorder %s5506_s18, %s5506_s18 }
  0x1e   :  { %p5513_p0 = por %p5512_p13, %p5511_p12 }
  0x20   :  { %p5514_p1 = pnand %p5513_p0, %p5507_p11 }
  0x22   :  { %5517 = shalt.err (!%p5514_p1)
}
  0x23   :  { %s5652_s2 = smov 256   ;;  %s5653_s19 = smov 16  }
  0x24   :  { %67 = dma.hbm_to_vmem [thread:$0]  %s8732_s4, 8192, %s62_s10, [#allocation11], %s5652_s2, %s5652_s2, %s5653_s19  }
  0x25   :  { %s5518_s24 = scalar_lea.hbm %s8728_s0, 16 }
  0x26   :  { %p5519_p2 = scmp.ne.s32.totalorder %s8728_s0, %s5518_s24  ;;  %p5522_p3 = scmp.lt.u32.totalorder %s5518_s24, %s8728_s0 }
  0x28   :  { %p5524_p4 = pnand %p5522_p3, %p5519_p2 }
  0x2a   :  { %5527 = shalt.err (!%p5524_p4)
}
  0x2b   :  { %s5654_s29 = smov [#allocation2]   ;;  %s5655_s4 = smov [#allocation6]  }
  0x2c   :  { %23 = dma.hbm_to_smem %s8728_s0, 16, %s5654_s29, [#allocation5]  }
  0x2d   :  { %s29_s8 = sshll.u32 %s5655_s4, 4  ;;  %s5656_s9 = smov [#allocation9]   ;;  %s30_s8 = int_to_ptr.vmem [resolvable:$true] %s29_s8 }
  0x2e   :  { %s52_s10 = sshll.u32 %s5656_s9, 4  ;;  %s5528_s13 = scalar_lea.hbm %s8729_s1, 1536  ;;  %s53_s10 = int_to_ptr.vmem [resolvable:$true] %s52_s10 }
  0x2f   :  { %p5529_p5 = scmp.ne.s32.totalorder %s8729_s1, %s5528_s13  ;;  %p5532_p6 = scmp.lt.u32.totalorder %s5528_s13, %s8729_s1 }
  0x31   :  { %p5534_p7 = pnand %p5532_p6, %p5529_p5 }
  0x33   :  { %5537 = shalt.err (!%p5534_p7)
}
  0x34   :  { %s5538_s0 = scalar_lea.vmem %s30_s8, 1536  ;;  %p5543_p9 = scmp.lt.s32.totalorder %s30_s8, %s30_s8 }
  0x35   :  { %p5539_p8 = scmp.ne.s32.totalorder %s30_s8, %s5538_s0  ;;  %p5544_p10 = scmp.lt.s32.totalorder %s5538_s0, %s5538_s0 }
  0x37   :  { %p5545_p11 = por %p5544_p10, %p5543_p9 }
  0x39   :  { %p5546_p12 = pnand %p5545_p11, %p5539_p8 }
  0x3b   :  { %5549 = shalt.err (!%p5546_p12)
}
  0x3c   :  { %35 = dma.hbm_to_vmem [thread:$0]  %s8729_s1, 1536, %s30_s8, [#allocation3], %s5652_s2, %s5652_s2, %s5653_s19  }
  0x3d   :  { %s5550_s23 = scalar_lea.hbm %s8731_s3, 256 }
  0x3e   :  { %p5551_p13 = scmp.ne.s32.totalorder %s8731_s3, %s5550_s23  ;;  %p5554_p0 = scmp.lt.u32.totalorder %s5550_s23, %s8731_s3 }
  0x40   :  { %p5556_p1 = pnand %p5554_p0, %p5551_p13 }
  0x42   :  { %5559 = shalt.err (!%p5556_p1)
}
  0x43   :  { %s5560_s28 = scalar_lea.vmem %s53_s10, 256  ;;  %p5565_p3 = scmp.lt.s32.totalorder %s53_s10, %s53_s10 }
  0x44   :  { %p5561_p2 = scmp.ne.s32.totalorder %s53_s10, %s5560_s28  ;;  %p5566_p4 = scmp.lt.s32.totalorder %s5560_s28, %s5560_s28 }
  0x46   :  { %p5567_p5 = por %p5566_p4, %p5565_p3 }
  0x48   :  { %p5568_p6 = pnand %p5567_p5, %p5561_p2 }
  0x4a   :  { %5571 = shalt.err (!%p5568_p6)
}
  0x4b   :  { %55 = dma.hbm_to_vmem [thread:$0]  %s8731_s3, 256, %s53_s10, [#allocation8]  }
  0x4c   :  { %s5657_s30 = smov [#allocation12]   ;;  %s5572_s9 = scalar_lea.hbm %s8733_s5, 8192 }
  0x4d   :  { %s73_s7 = sshll.u32 %s5657_s30, 4  ;;  %p5573_p7 = scmp.ne.s32.totalorder %s8733_s5, %s5572_s9  ;;  %s74_s7 = int_to_ptr.vmem [resolvable:$true] %s73_s7 }
  0x4e   :  { %p5576_p8 = scmp.lt.u32.totalorder %s5572_s9, %s8733_s5 }
  0x50   :  { %p5578_p9 = pnand %p5576_p8, %p5573_p7 }
  0x52   :  { %5581 = shalt.err (!%p5578_p9)
}
  0x53   :  { %s5582_s15 = scalar_lea.vmem %s74_s7, 8192  ;;  %p5587_p11 = scmp.lt.s32.totalorder %s74_s7, %s74_s7 }
  0x54   :  { %p5583_p10 = scmp.ne.s32.totalorder %s74_s7, %s5582_s15  ;;  %p5588_p12 = scmp.lt.s32.totalorder %s5582_s15, %s5582_s15 }
  0x56   :  { %p5589_p13 = por %p5588_p12, %p5587_p11 }
  0x58   :  { %p5590_p0 = pnand %p5589_p13, %p5583_p10 }
  0x5a   :  { %5593 = shalt.err (!%p5590_p0)
}
  0x5b   :  { %79 = dma.hbm_to_vmem [thread:$0]  %s8733_s5, 8192, %s74_s7, [#allocation11], %s5652_s2, %s5652_s2, %s5653_s19  }
  0x5c   :  { %5628 = dma.done.wait [#allocation5], 16  }
  0x5d   :  { %5629 = vsyncadd [#allocation5], 4294967280 }
  0x5e   :  { %5630 = dma.done.wait [#allocation3], 1536  }
  0x5f   :  { %5631 = vsyncadd [#allocation3], 4294965760 }
  0x60   :  { %5632 = dma.done.wait [#allocation8], 512  }
  0x61   :  { %5633 = vsyncadd [#allocation8], 4294966784 }
  0x62   :  { %5634 = dma.done.wait [#allocation11], 16384  }
  0x63   :  { %5635 = vsyncadd [#allocation11], 4294950912 }
  0x64   :  { %98 = sfence }
  0x65   :  { %s5775_s16 = sld [smem:[#allocation2]]  ;;  %s5777_s17 = sld [smem:[#allocation2 + $0x1]]  ;;  %v5779_v0 = vld [vmem:[#allocation7] sm:$0xff]  ;;  %v5781_v1 = vld [vmem:[#allocation7 + $0x8] sm:$0xff]  ;;  %v5787_v4 = vld [vmem:[#allocation10 + $0x10] sm:$0xff] }
  0x66   :  { %9413 = vst [vmem:[#allocation19_spill] sm:$0xff] %v5779_v0  ;;  %9414 = vst [vmem:[#allocation20_spill] sm:$0xff] %v5781_v1  ;;  %v5783_v2 = vld [vmem:[#allocation10] sm:$0xff]  ;;  %v5785_v3 = vld [vmem:[#allocation10 + $0x8] sm:$0xff]  ;;  %s6043_s5 = smov 0  }
  0x67   :  { %9415 = vst [vmem:[#allocation21_spill] sm:$0xff] %v5783_v2  ;;  %9416 = vst [vmem:[#allocation22_spill] sm:$0xff] %v5785_v3  ;;  %v5789_v5 = vld [vmem:[#allocation10 + $0x18] sm:$0xff]  ;;  %v5791_v6 = vld [vmem:[#allocation10 + $0x20] sm:$0xff] }
  0x68   :  { %9417 = vst [vmem:[#allocation23_spill] sm:$0xff] %v5787_v4  ;;  %9418 = vst [vmem:[#allocation24_spill] sm:$0xff] %v5789_v5  ;;  %v5793_v7 = vld [vmem:[#allocation10 + $0x28] sm:$0xff]  ;;  %v5795_v8 = vld [vmem:[#allocation10 + $0x30] sm:$0xff] }
  0x69   :  { %9419 = vst [vmem:[#allocation25_spill] sm:$0xff] %v5791_v6  ;;  %9420 = vst [vmem:[#allocation26_spill] sm:$0xff] %v5793_v7  ;;  %v5797_v9 = vld [vmem:[#allocation10 + $0x38] sm:$0xff]  ;;  %v5799_v10 = vld [vmem:[#allocation10 + $0x40] sm:$0xff] }
  0x6a   :  { %9421 = vst [vmem:[#allocation27_spill] sm:$0xff] %v5795_v8  ;;  %9422 = vst [vmem:[#allocation28_spill] sm:$0xff] %v5797_v9  ;;  %v5801_v11 = vld [vmem:[#allocation10 + $0x48] sm:$0xff]  ;;  %v5803_v12 = vld [vmem:[#allocation10 + $0x50] sm:$0xff] }
  0x6b   :  { %9423 = vst [vmem:[#allocation29_spill] sm:$0xff] %v5799_v10  ;;  %9424 = vst [vmem:[#allocation30_spill] sm:$0xff] %v5801_v11  ;;  %v5805_v13 = vld [vmem:[#allocation10 + $0x58] sm:$0xff]  ;;  %v5807_v14 = vld [vmem:[#allocation10 + $0x60] sm:$0xff] }
  0x6c   :  { %9425 = vst [vmem:[#allocation31_spill] sm:$0xff] %v5803_v12  ;;  %9426 = vst [vmem:[#allocation32_spill] sm:$0xff] %v5805_v13  ;;  %v5809_v15 = vld [vmem:[#allocation10 + $0x68] sm:$0xff]  ;;  %v5811_v16 = vld [vmem:[#allocation10 + $0x70] sm:$0xff] }
  0x6d   :  { %9427 = vst [vmem:[#allocation33_spill] sm:$0xff] %v5807_v14  ;;  %9428 = vst [vmem:[#allocation34_spill] sm:$0xff] %v5809_v15  ;;  %v5813_v17 = vld [vmem:[#allocation10 + $0x78] sm:$0xff]  ;;  %v5815_v18 = vld [vmem:[#allocation10 + $0x80] sm:$0xff] }
  0x6e   :  { %9429 = vst [vmem:[#allocation35_spill] sm:$0xff] %v5811_v16  ;;  %9430 = vst [vmem:[#allocation36_spill] sm:$0xff] %v5813_v17  ;;  %v5817_v19 = vld [vmem:[#allocation10 + $0x88] sm:$0xff]  ;;  %v5819_v20 = vld [vmem:[#allocation10 + $0x90] sm:$0xff] }
  0x6f   :  { %9431 = vst [vmem:[#allocation37_spill] sm:$0xff] %v5815_v18  ;;  %9432 = vst [vmem:[#allocation38_spill] sm:$0xff] %v5817_v19  ;;  %v5821_v21 = vld [vmem:[#allocation10 + $0x98] sm:$0xff]  ;;  %v5823_v22 = vld [vmem:[#allocation10 + $0xa0] sm:$0xff] }
  0x70   :  { %9433 = vst [vmem:[#allocation39_spill] sm:$0xff] %v5819_v20  ;;  %9434 = vst [vmem:[#allocation40_spill] sm:$0xff] %v5821_v21  ;;  %v5825_v23 = vld [vmem:[#allocation10 + $0xa8] sm:$0xff]  ;;  %v5827_v24 = vld [vmem:[#allocation10 + $0xb0] sm:$0xff] }
  0x71   :  { %9435 = vst [vmem:[#allocation41_spill] sm:$0xff] %v5823_v22  ;;  %9436 = vst [vmem:[#allocation42_spill] sm:$0xff] %v5825_v23  ;;  %v5829_v25 = vld [vmem:[#allocation10 + $0xb8] sm:$0xff]  ;;  %v5831_v26 = vld [vmem:[#allocation10 + $0xc0] sm:$0xff] }
  0x72   :  { %9437 = vst [vmem:[#allocation43_spill] sm:$0xff] %v5827_v24  ;;  %9438 = vst [vmem:[#allocation44_spill] sm:$0xff] %v5829_v25  ;;  %v5833_v27 = vld [vmem:[#allocation10 + $0xc8] sm:$0xff]  ;;  %v5835_v28 = vld [vmem:[#allocation10 + $0xd0] sm:$0xff] }
  0x73   :  { %9439 = vst [vmem:[#allocation45_spill] sm:$0xff] %v5831_v26  ;;  %9440 = vst [vmem:[#allocation46_spill] sm:$0xff] %v5833_v27  ;;  %v5837_v29 = vld [vmem:[#allocation10 + $0xd8] sm:$0xff]  ;;  %v5839_v30 = vld [vmem:[#allocation10 + $0xe0] sm:$0xff] }
  0x74   :  { %9441 = vst [vmem:[#allocation47_spill] sm:$0xff] %v5835_v28  ;;  %9442 = vst [vmem:[#allocation48_spill] sm:$0xff] %v5837_v29  ;;  %v5841_v31 = vld [vmem:[#allocation10 + $0xe8] sm:$0xff]  ;;  %v5843_v32 = vld [vmem:[#allocation10 + $0xf0] sm:$0xff] }
  0x75   :  { %9443 = vst [vmem:[#allocation49_spill] sm:$0xff] %v5839_v30  ;;  %9444 = vst [vmem:[#allocation50_spill] sm:$0xff] %v5841_v31  ;;  %v5845_v33 = vld [vmem:[#allocation10 + $0xf8] sm:$0xff]  ;;  %v5847_v34 = vld [vmem:[#allocation10 + $0x100] sm:$0xff] }
  0x76   :  { %9445 = vst [vmem:[#allocation51_spill] sm:$0xff] %v5843_v32  ;;  %9446 = vst [vmem:[#allocation52_spill] sm:$0xff] %v5845_v33  ;;  %v5849_v35 = vld [vmem:[#allocation10 + $0x108] sm:$0xff]  ;;  %v5851_v36 = vld [vmem:[#allocation10 + $0x110] sm:$0xff] }
  0x77   :  { %9447 = vst [vmem:[#allocation53_spill] sm:$0xff] %v5847_v34  ;;  %9448 = vst [vmem:[#allocation54_spill] sm:$0xff] %v5849_v35  ;;  %v5853_v37 = vld [vmem:[#allocation10 + $0x118] sm:$0xff]  ;;  %v5855_v38 = vld [vmem:[#allocation10 + $0x120] sm:$0xff] }
  0x78   :  { %9449 = vst [vmem:[#allocation55_spill] sm:$0xff] %v5851_v36  ;;  %9450 = vst [vmem:[#allocation56_spill] sm:$0xff] %v5853_v37  ;;  %v5857_v39 = vld [vmem:[#allocation10 + $0x128] sm:$0xff]  ;;  %v5859_v40 = vld [vmem:[#allocation10 + $0x130] sm:$0xff] }
  0x79   :  { %9451 = vst [vmem:[#allocation57_spill] sm:$0xff] %v5855_v38  ;;  %9452 = vst [vmem:[#allocation58_spill] sm:$0xff] %v5857_v39  ;;  %v5861_v41 = vld [vmem:[#allocation10 + $0x138] sm:$0xff]  ;;  %v5863_v42 = vld [vmem:[#allocation10 + $0x140] sm:$0xff] }
  0x7a   :  { %9453 = vst [vmem:[#allocation59_spill] sm:$0xff] %v5859_v40  ;;  %9454 = vst [vmem:[#allocation60_spill] sm:$0xff] %v5861_v41  ;;  %v5865_v43 = vld [vmem:[#allocation10 + $0x148] sm:$0xff]  ;;  %v5867_v44 = vld [vmem:[#allocation10 + $0x150] sm:$0xff] }
  0x7b   :  { %9455 = vst [vmem:[#allocation61_spill] sm:$0xff] %v5863_v42  ;;  %9456 = vst [vmem:[#allocation62_spill] sm:$0xff] %v5865_v43  ;;  %v5869_v45 = vld [vmem:[#allocation10 + $0x158] sm:$0xff]  ;;  %v5871_v46 = vld [vmem:[#allocation10 + $0x160] sm:$0xff] }
  0x7c   :  { %9457 = vst [vmem:[#allocation63_spill] sm:$0xff] %v5867_v44  ;;  %9458 = vst [vmem:[#allocation64_spill] sm:$0xff] %v5869_v45  ;;  %v5873_v47 = vld [vmem:[#allocation10 + $0x168] sm:$0xff]  ;;  %v5875_v48 = vld [vmem:[#allocation10 + $0x170] sm:$0xff] }
  0x7d   :  { %9459 = vst [vmem:[#allocation65_spill] sm:$0xff] %v5871_v46  ;;  %9460 = vst [vmem:[#allocation66_spill] sm:$0xff] %v5873_v47  ;;  %v5877_v49 = vld [vmem:[#allocation10 + $0x178] sm:$0xff]  ;;  %v5879_v50 = vld [vmem:[#allocation10 + $0x180] sm:$0xff] }
  0x7e   :  { %9461 = vst [vmem:[#allocation67_spill] sm:$0xff] %v5875_v48  ;;  %9462 = vst [vmem:[#allocation68_spill] sm:$0xff] %v5877_v49  ;;  %v5881_v51 = vld [vmem:[#allocation10 + $0x188] sm:$0xff]  ;;  %v5883_v52 = vld [vmem:[#allocation10 + $0x190] sm:$0xff] }
  0x7f   :  { %9463 = vst [vmem:[#allocation69_spill] sm:$0xff] %v5879_v50  ;;  %9464 = vst [vmem:[#allocation70_spill] sm:$0xff] %v5881_v51  ;;  %v5885_v53 = vld [vmem:[#allocation10 + $0x198] sm:$0xff]  ;;  %v5887_v54 = vld [vmem:[#allocation10 + $0x1a0] sm:$0xff] }
  0x80   :  { %9465 = vst [vmem:[#allocation71_spill] sm:$0xff] %v5883_v52  ;;  %9466 = vst [vmem:[#allocation72_spill] sm:$0xff] %v5885_v53  ;;  %v5889_v55 = vld [vmem:[#allocation10 + $0x1a8] sm:$0xff]  ;;  %v5891_v56 = vld [vmem:[#allocation10 + $0x1b0] sm:$0xff] }
  0x81   :  { %9467 = vst [vmem:[#allocation73_spill] sm:$0xff] %v5887_v54  ;;  %9468 = vst [vmem:[#allocation74_spill] sm:$0xff] %v5889_v55  ;;  %v5893_v57 = vld [vmem:[#allocation10 + $0x1b8] sm:$0xff]  ;;  %v5895_v58 = vld [vmem:[#allocation10 + $0x1c0] sm:$0xff] }
  0x82   :  { %9469 = vst [vmem:[#allocation75_spill] sm:$0xff] %v5891_v56  ;;  %9470 = vst [vmem:[#allocation76_spill] sm:$0xff] %v5893_v57  ;;  %v5897_v59 = vld [vmem:[#allocation10 + $0x1c8] sm:$0xff]  ;;  %v5899_v60 = vld [vmem:[#allocation10 + $0x1d0] sm:$0xff] }
  0x83   :  { %9471 = vst [vmem:[#allocation77_spill] sm:$0xff] %v5895_v58  ;;  %9472 = vst [vmem:[#allocation78_spill] sm:$0xff] %v5897_v59  ;;  %v5901_v61 = vld [vmem:[#allocation10 + $0x1d8] sm:$0xff]  ;;  %v5903_v62 = vld [vmem:[#allocation10 + $0x1e0] sm:$0xff] }
  0x84   :  { %9473 = vst [vmem:[#allocation79_spill] sm:$0xff] %v5899_v60  ;;  %9474 = vst [vmem:[#allocation80_spill] sm:$0xff] %v5901_v61  ;;  %v5905_v63 = vld [vmem:[#allocation10 + $0x1e8] sm:$0xff]  ;;  %v5907_v0 = vld [vmem:[#allocation10 + $0x1f0] sm:$0xff] }
  0x85   :  { %9475 = vst [vmem:[#allocation81_spill] sm:$0xff] %v5903_v62  ;;  %9476 = vst [vmem:[#allocation82_spill] sm:$0xff] %v5905_v63  ;;  %v5909_v1 = vld [vmem:[#allocation10 + $0x1f8] sm:$0xff]  ;;  %v5911_v54 = vld [vmem:[#allocation12] sm:$0xff] }
  0x86   :  { %9477 = vst [vmem:[#allocation83_spill] sm:$0xff] %v5907_v0  ;;  %9478 = vst [vmem:[#allocation84_spill] sm:$0xff] %v5909_v1  ;;  %v5913_v56 = vld [vmem:[#allocation12 + $0x8] sm:$0xff]  ;;  %v5915_v57 = vld [vmem:[#allocation12 + $0x10] sm:$0xff] }
  0x87   :  { %9479 = vst [vmem:[#allocation85_spill] sm:$0xff] %v5911_v54  ;;  %9480 = vst [vmem:[#allocation86_spill] sm:$0xff] %v5913_v56  ;;  %v5917_v58 = vld [vmem:[#allocation12 + $0x18] sm:$0xff]  ;;  %v5919_v59 = vld [vmem:[#allocation12 + $0x20] sm:$0xff] }
  0x88   :  { %9481 = vst [vmem:[#allocation87_spill] sm:$0xff] %v5915_v57  ;;  %9482 = vst [vmem:[#allocation88_spill] sm:$0xff] %v5917_v58  ;;  %v5921_v60 = vld [vmem:[#allocation12 + $0x28] sm:$0xff]  ;;  %v5923_v61 = vld [vmem:[#allocation12 + $0x30] sm:$0xff] }
  0x89   :  { %9483 = vst [vmem:[#allocation89_spill] sm:$0xff] %v5919_v59  ;;  %9484 = vst [vmem:[#allocation90_spill] sm:$0xff] %v5921_v60  ;;  %v5925_v62 = vld [vmem:[#allocation12 + $0x38] sm:$0xff]  ;;  %v5927_v63 = vld [vmem:[#allocation12 + $0x40] sm:$0xff] }
  0x8a   :  { %9485 = vst [vmem:[#allocation91_spill] sm:$0xff] %v5923_v61  ;;  %9486 = vst [vmem:[#allocation92_spill] sm:$0xff] %v5925_v62  ;;  %v5929_v0 = vld [vmem:[#allocation12 + $0x48] sm:$0xff]  ;;  %v5931_v1 = vld [vmem:[#allocation12 + $0x50] sm:$0xff] }
  0x8b   :  { %9487 = vst [vmem:[#allocation93_spill] sm:$0xff] %v5927_v63  ;;  %9488 = vst [vmem:[#allocation94_spill] sm:$0xff] %v5929_v0  ;;  %v5933_v55 = vld [vmem:[#allocation12 + $0x58] sm:$0xff]  ;;  %v5935_v52 = vld [vmem:[#allocation12 + $0x60] sm:$0xff] }
  0x8c   :  { %9489 = vst [vmem:[#allocation95_spill] sm:$0xff] %v5931_v1  ;;  %9490 = vst [vmem:[#allocation96_spill] sm:$0xff] %v5933_v55  ;;  %v5937_v50 = vld [vmem:[#allocation12 + $0x68] sm:$0xff]  ;;  %v5939_v53 = vld [vmem:[#allocation12 + $0x70] sm:$0xff] }
  0x8d   :  { %9491 = vst [vmem:[#allocation97_spill] sm:$0xff] %v5935_v52  ;;  %9492 = vst [vmem:[#allocation98_spill] sm:$0xff] %v5937_v50  ;;  %v5941_v51 = vld [vmem:[#allocation12 + $0x78] sm:$0xff]  ;;  %v5943_v48 = vld [vmem:[#allocation12 + $0x80] sm:$0xff] }
  0x8e   :  { %9493 = vst [vmem:[#allocation99_spill] sm:$0xff] %v5939_v53  ;;  %9494 = vst [vmem:[#allocation100_spill] sm:$0xff] %v5941_v51  ;;  %v5945_v46 = vld [vmem:[#allocation12 + $0x88] sm:$0xff]  ;;  %v5947_v49 = vld [vmem:[#allocation12 + $0x90] sm:$0xff] }
  0x8f   :  { %9495 = vst [vmem:[#allocation101_spill] sm:$0xff] %v5943_v48  ;;  %9496 = vst [vmem:[#allocation102_spill] sm:$0xff] %v5945_v46  ;;  %v5949_v47 = vld [vmem:[#allocation12 + $0x98] sm:$0xff]  ;;  %v5951_v44 = vld [vmem:[#allocation12 + $0xa0] sm:$0xff] }
  0x90   :  { %9497 = vst [vmem:[#allocation103_spill] sm:$0xff] %v5947_v49  ;;  %9498 = vst [vmem:[#allocation104_spill] sm:$0xff] %v5949_v47  ;;  %v5953_v42 = vld [vmem:[#allocation12 + $0xa8] sm:$0xff]  ;;  %v5955_v45 = vld [vmem:[#allocation12 + $0xb0] sm:$0xff] }
  0x91   :  { %9499 = vst [vmem:[#allocation105_spill] sm:$0xff] %v5951_v44  ;;  %9500 = vst [vmem:[#allocation106_spill] sm:$0xff] %v5953_v42  ;;  %v5957_v43 = vld [vmem:[#allocation12 + $0xb8] sm:$0xff]  ;;  %v5959_v40 = vld [vmem:[#allocation12 + $0xc0] sm:$0xff] }
  0x92   :  { %9501 = vst [vmem:[#allocation107_spill] sm:$0xff] %v5955_v45  ;;  %9502 = vst [vmem:[#allocation108_spill] sm:$0xff] %v5957_v43  ;;  %v5961_v38 = vld [vmem:[#allocation12 + $0xc8] sm:$0xff]  ;;  %v5963_v41 = vld [vmem:[#allocation12 + $0xd0] sm:$0xff] }
  0x93   :  { %9503 = vst [vmem:[#allocation109_spill] sm:$0xff] %v5959_v40  ;;  %9504 = vst [vmem:[#allocation110_spill] sm:$0xff] %v5961_v38  ;;  %v5965_v39 = vld [vmem:[#allocation12 + $0xd8] sm:$0xff]  ;;  %v5967_v36 = vld [vmem:[#allocation12 + $0xe0] sm:$0xff] }
  0x94   :  { %9505 = vst [vmem:[#allocation111_spill] sm:$0xff] %v5963_v41  ;;  %9506 = vst [vmem:[#allocation112_spill] sm:$0xff] %v5965_v39  ;;  %v5969_v34 = vld [vmem:[#allocation12 + $0xe8] sm:$0xff]  ;;  %v5971_v37 = vld [vmem:[#allocation12 + $0xf0] sm:$0xff] }
  0x95   :  { %9507 = vst [vmem:[#allocation113_spill] sm:$0xff] %v5967_v36  ;;  %9508 = vst [vmem:[#allocation114_spill] sm:$0xff] %v5969_v34  ;;  %v5973_v35 = vld [vmem:[#allocation12 + $0xf8] sm:$0xff]  ;;  %v5975_v32 = vld [vmem:[#allocation12 + $0x100] sm:$0xff] }
  0x96   :  { %9509 = vst [vmem:[#allocation115_spill] sm:$0xff] %v5971_v37  ;;  %9510 = vst [vmem:[#allocation116_spill] sm:$0xff] %v5973_v35  ;;  %v5977_v30 = vld [vmem:[#allocation12 + $0x108] sm:$0xff]  ;;  %v5979_v33 = vld [vmem:[#allocation12 + $0x110] sm:$0xff] }
  0x97   :  { %9511 = vst [vmem:[#allocation117_spill] sm:$0xff] %v5975_v32  ;;  %9512 = vst [vmem:[#allocation118_spill] sm:$0xff] %v5977_v30  ;;  %v5981_v31 = vld [vmem:[#allocation12 + $0x118] sm:$0xff]  ;;  %v5983_v28 = vld [vmem:[#allocation12 + $0x120] sm:$0xff] }
  0x98   :  { %9513 = vst [vmem:[#allocation119_spill] sm:$0xff] %v5979_v33  ;;  %9514 = vst [vmem:[#allocation120_spill] sm:$0xff] %v5981_v31  ;;  %v5985_v26 = vld [vmem:[#allocation12 + $0x128] sm:$0xff]  ;;  %v5987_v29 = vld [vmem:[#allocation12 + $0x130] sm:$0xff] }
  0x99   :  { %9515 = vst [vmem:[#allocation121_spill] sm:$0xff] %v5983_v28  ;;  %9516 = vst [vmem:[#allocation122_spill] sm:$0xff] %v5985_v26  ;;  %v5989_v27 = vld [vmem:[#allocation12 + $0x138] sm:$0xff]  ;;  %v5991_v24 = vld [vmem:[#allocation12 + $0x140] sm:$0xff] }
  0x9a   :  { %9517 = vst [vmem:[#allocation123_spill] sm:$0xff] %v5987_v29  ;;  %9518 = vst [vmem:[#allocation124_spill] sm:$0xff] %v5989_v27  ;;  %v5993_v22 = vld [vmem:[#allocation12 + $0x148] sm:$0xff]  ;;  %v5995_v25 = vld [vmem:[#allocation12 + $0x150] sm:$0xff] }
  0x9b   :  { %9519 = vst [vmem:[#allocation125_spill] sm:$0xff] %v5991_v24  ;;  %9520 = vst [vmem:[#allocation126_spill] sm:$0xff] %v5993_v22  ;;  %v5997_v23 = vld [vmem:[#allocation12 + $0x158] sm:$0xff]  ;;  %v5999_v20 = vld [vmem:[#allocation12 + $0x160] sm:$0xff] }
  0x9c   :  { %9521 = vst [vmem:[#allocation127_spill] sm:$0xff] %v5995_v25  ;;  %9522 = vst [vmem:[#allocation128_spill] sm:$0xff] %v5997_v23  ;;  %v6001_v18 = vld [vmem:[#allocation12 + $0x168] sm:$0xff]  ;;  %v6003_v21 = vld [vmem:[#allocation12 + $0x170] sm:$0xff] }
  0x9d   :  { %9523 = vst [vmem:[#allocation129_spill] sm:$0xff] %v5999_v20  ;;  %9524 = vst [vmem:[#allocation130_spill] sm:$0xff] %v6001_v18  ;;  %v6005_v19 = vld [vmem:[#allocation12 + $0x178] sm:$0xff]  ;;  %v6007_v16 = vld [vmem:[#allocation12 + $0x180] sm:$0xff] }
  0x9e   :  { %9525 = vst [vmem:[#allocation131_spill] sm:$0xff] %v6003_v21  ;;  %9526 = vst [vmem:[#allocation132_spill] sm:$0xff] %v6005_v19  ;;  %v6009_v14 = vld [vmem:[#allocation12 + $0x188] sm:$0xff]  ;;  %v6011_v17 = vld [vmem:[#allocation12 + $0x190] sm:$0xff] }
  0x9f   :  { %9527 = vst [vmem:[#allocation133_spill] sm:$0xff] %v6007_v16  ;;  %9528 = vst [vmem:[#allocation134_spill] sm:$0xff] %v6009_v14  ;;  %v6013_v15 = vld [vmem:[#allocation12 + $0x198] sm:$0xff]  ;;  %v6015_v12 = vld [vmem:[#allocation12 + $0x1a0] sm:$0xff] }
  0xa0   :  { %9529 = vst [vmem:[#allocation135_spill] sm:$0xff] %v6011_v17  ;;  %9530 = vst [vmem:[#allocation136_spill] sm:$0xff] %v6013_v15  ;;  %v6017_v10 = vld [vmem:[#allocation12 + $0x1a8] sm:$0xff]  ;;  %v6019_v13 = vld [vmem:[#allocation12 + $0x1b0] sm:$0xff] }
  0xa1   :  { %9531 = vst [vmem:[#allocation137_spill] sm:$0xff] %v6015_v12  ;;  %9532 = vst [vmem:[#allocation138_spill] sm:$0xff] %v6017_v10  ;;  %v6021_v11 = vld [vmem:[#allocation12 + $0x1b8] sm:$0xff]  ;;  %v6023_v8 = vld [vmem:[#allocation12 + $0x1c0] sm:$0xff] }
  0xa2   :  { %9533 = vst [vmem:[#allocation139_spill] sm:$0xff] %v6019_v13  ;;  %9534 = vst [vmem:[#allocation140_spill] sm:$0xff] %v6021_v11  ;;  %v6025_v6 = vld [vmem:[#allocation12 + $0x1c8] sm:$0xff]  ;;  %v6027_v9 = vld [vmem:[#allocation12 + $0x1d0] sm:$0xff] }
  0xa3   :  { %9535 = vst [vmem:[#allocation141_spill] sm:$0xff] %v6023_v8  ;;  %9536 = vst [vmem:[#allocation142_spill] sm:$0xff] %v6025_v6  ;;  %v6029_v7 = vld [vmem:[#allocation12 + $0x1d8] sm:$0xff]  ;;  %v6031_v4 = vld [vmem:[#allocation12 + $0x1e0] sm:$0xff] }
  0xa4   :  { %9537 = vst [vmem:[#allocation143_spill] sm:$0xff] %v6027_v9  ;;  %9538 = vst [vmem:[#allocation144_spill] sm:$0xff] %v6029_v7  ;;  %v6033_v2 = vld [vmem:[#allocation12 + $0x1e8] sm:$0xff]  ;;  %v6035_v5 = vld [vmem:[#allocation12 + $0x1f0] sm:$0xff] }
  0xa5   :  { %9539 = vst [vmem:[#allocation145_spill] sm:$0xff] %v6031_v4  ;;  %9540 = vst [vmem:[#allocation146_spill] sm:$0xff] %v6033_v2  ;;  %v6037_v3 = vld [vmem:[#allocation12 + $0x1f8] sm:$0xff]  ;;  %v231_v12 = vld [vmem:[#allocation9] sm:$0xff]  }
  0xa6   :  { %9541 = vst [vmem:[#allocation147_spill] sm:$0xff] %v6035_v5  ;;  %9542 = vst [vmem:[#allocation148_spill] sm:$0xff] %v6037_v3  ;;  %v232_v13 = vld [vmem:[#allocation9 + $0x8] sm:$0xff]  }
  0xa7 LB: > { %v9543_v23 = vld [vmem:[#allocation128_spill] sm:$0xff]  ;;  %v9544_v22 = vld [vmem:[#allocation126_spill] sm:$0xff]  ;;  %v9545_v29 = vld [vmem:[#allocation123_spill] sm:$0xff]  ;;  %9585 = vst [vmem:[#allocation149_spill] sm:$0xff] %v5640_v13  ;;  %s4251_s0 = sshll.u32 %s5648_s5, 4  ;;  %s1532_s20 = ssub.f32 %s5775_s16, %s5777_s17  ;;  %s5648_s5 = sphi %s6043_s5, %s238_s5   ;;  %v5644_v12 = vphi %v231_v12, %v4206_v12   ;;  %v5640_v13 = vphi %v232_v13, %v4207_v13  }
  0xa8   : > { %v9546_v28 = vld [vmem:[#allocation121_spill] sm:$0xff]  ;;  %v9547_v27 = vld [vmem:[#allocation124_spill] sm:$0xff]  ;;  %v9548_v26 = vld [vmem:[#allocation122_spill] sm:$0xff]  ;;  %9586 = vst [vmem:[#allocation150_spill] sm:$0xff] %v5644_v12  ;;  %s7237_s18 = scalar_lea.vmem [#allocation6], %s4251_s0  ;;  %s4209_s21 = scalar_lea.vmem [#allocation13], %s4251_s0 }
  0xa9   : > { %v9549_v33 = vld [vmem:[#allocation119_spill] sm:$0xff]  ;;  %v9550_v32 = vld [vmem:[#allocation117_spill] sm:$0xff]  ;;  %v9551_v31 = vld [vmem:[#allocation120_spill] sm:$0xff]  ;;  %s238_s5 = sadd.s32 1, %s5648_s5  }
  0xaa   : > { %v9552_v30 = vld [vmem:[#allocation118_spill] sm:$0xff]  ;;  %v9553_v37 = vld [vmem:[#allocation115_spill] sm:$0xff]  ;;  %v9555_v36 = vld [vmem:[#allocation113_spill] sm:$0xff]  ;;  %p235_p1 = scmp.ge.s32.totalorder %s238_s5, 6  }
  0xab   : > { %v9554_v41 = vld [vmem:[#allocation111_spill] sm:$0xff]  ;;  %v9556_v35 = vld [vmem:[#allocation116_spill] sm:$0xff]  ;;  %v9557_v34 = vld [vmem:[#allocation114_spill] sm:$0xff]  ;;  %s5658_s22 = smov (%p235_p1), [#allocation13]  }
  0xac   : > { %v9558_v40 = vld [vmem:[#allocation109_spill] sm:$0xff]  ;;  %v9559_v45 = vld [vmem:[#allocation107_spill] sm:$0xff]  ;;  %v9560_v39 = vld [vmem:[#allocation112_spill] sm:$0xff]  ;;  %s4217_s23 = sshll.u32 (%p235_p1), %s5658_s22, 4  ;;  %s4218_s23 = int_to_ptr.vmem [resolvable:$true] %s4217_s23 }
  0xad   : > { %v9561_v44 = vld [vmem:[#allocation105_spill] sm:$0xff]  ;;  %v9562_v38 = vld [vmem:[#allocation110_spill] sm:$0xff]  ;;  %v9563_v43 = vld [vmem:[#allocation108_spill] sm:$0xff]  ;;  %s5594_s24 = scalar_lea.vmem (%p235_p1), %s4218_s23, 1536  ;;  %p5599_p3 = scmp.lt.s32.totalorder (%p235_p1), %s4218_s23, %s4218_s23 }
  0xae   : > { %v9564_v42 = vld [vmem:[#allocation106_spill] sm:$0xff]  ;;  %v9565_v63 = vld [vmem:[#allocation93_spill] sm:$0xff]  ;;  %v9566_v49 = vld [vmem:[#allocation103_spill] sm:$0xff]  ;;  %p5595_p2 = scmp.ne.s32.totalorder (%p235_p1), %s4218_s23, %s5594_s24  ;;  %p5600_p4 = scmp.lt.s32.totalorder (%p235_p1), %s5594_s24, %s5594_s24 }
  0xaf   : > { %v9567_v48 = vld [vmem:[#allocation101_spill] sm:$0xff]  ;;  %v9568_v61 = vld [vmem:[#allocation91_spill] sm:$0xff]  ;;  %v9570_v47 = vld [vmem:[#allocation104_spill] sm:$0xff]  ;;  %v264_v15 = vand.u32 4294901760, %v9565_v63 }
  0xb0   : > { %v9569_v53 = vld [vmem:[#allocation99_spill] sm:$0xff]  ;;  %v9571_v46 = vld [vmem:[#allocation102_spill] sm:$0xff]  ;;  %v9572_v59 = vld [vmem:[#allocation89_spill] sm:$0xff]  ;;  %v260_v13 = vand.u32 4294901760, %v9568_v61  ;;  %p5601_p5 = por (%p235_p1), %p5600_p4, %p5599_p3 }
  0xb1   : > { %v9573_v52 = vld [vmem:[#allocation97_spill] sm:$0xff]  ;;  %v9574_v55 = vld [vmem:[#allocation96_spill] sm:$0xff]  ;;  %v9576_v50 = vld [vmem:[#allocation98_spill] sm:$0xff]  ;;  %v256_v7 = vand.u32 4294901760, %v9572_v59 }
  0xb2   : > { %v9575_v51 = vld [vmem:[#allocation100_spill] sm:$0xff]  ;;  %v9577_v1 = vld [vmem:[#allocation95_spill] sm:$0xff]  ;;  %v9578_v0 = vld [vmem:[#allocation94_spill] sm:$0xff]  ;;  %v266_v16 = vand.u32 4294901760, %v9574_v55  ;;  %p5602_p6 = pnand (%p235_p1), %p5601_p5, %p5595_p2 }
  0xb3   : > { %v9579_v62 = vld [vmem:[#allocation92_spill] sm:$0xff]  ;;  %v9580_v60 = vld [vmem:[#allocation90_spill] sm:$0xff]  ;;  %v9582_v57 = vld [vmem:[#allocation87_spill] sm:$0xff]  ;;  %v262_v10 = vand.u32 4294901760, %v9578_v0  ;;  %v6073_v17 = vpack.c.bf16 %v260_v13, %v256_v7  ;;  %v268_v14 = vand.u32 4294901760, %v9577_v1  ;;  %v274_v21 = vand.u32 4294901760, %v9575_v51 }
  0xb4   : > { %v9581_v58 = vld [vmem:[#allocation88_spill] sm:$0xff]  ;;  %v9583_v54 = vld [vmem:[#allocation85_spill] sm:$0xff]  ;;  %v9584_v56 = vld [vmem:[#allocation86_spill] sm:$0xff]  ;;  %v252_v2 = vand.u32 4294901760, %v9582_v57  ;;  %v254_v9 = vand.u32 4294901760, %v9580_v60  ;;  %v258_v8 = vand.u32 4294901760, %v9579_v62 }
  0xb5   : > { %v246_v5 = vand.u32 4294901760, %v9584_v56  ;;  %v250_v4 = vand.u32 4294901760, %v9581_v58  ;;  %v248_v3 = vand.u32 4294901760, %v9583_v54  ;;  %9590 = vst [vmem:[#allocation154_spill] sm:$0xff] %v6073_v17  ;;  %v6082_v20 = vpack.c.bf16 %v266_v16, %v262_v10 }
  0xb6   : > { %v6066_v11 = vpack.c.bf16 %v258_v8, %v254_v9  ;;  %v6094_v25 = vsub.f32 %v9582_v57, %v252_v2  ;;  %v6101_v24 = vpack.c.bf16 %v268_v14, %v264_v15  ;;  %v6118_v57 = vsub.f32 %v9568_v61, %v260_v13 }
  0xb7   : > { %v6062_v6 = vpack.c.bf16 %v250_v4, %v246_v5  ;;  %v6064_v12 = vpack.c.bf16 %v252_v2, %v248_v3  ;;  %9591 = vst [vmem:[#allocation155_spill] sm:$0xff] %v6082_v20  ;;  %v6088_v19 = vsub.f32 %v9581_v58, %v250_v4  ;;  %v6091_v18 = vsub.f32 %v9583_v54, %v248_v3 }
  0xb8   : > { %9589 = vst [vmem:[#allocation153_spill] sm:$0xff] %v6066_v11  ;;  %9595 = vst [vmem:[#allocation159_spill] sm:$0xff] %v6101_v24  ;;  %v276_v4 = vand.u32 4294901760, %v9569_v53  ;;  %v278_v3 = vand.u32 4294901760, %v9571_v46  ;;  %v6115_v54 = vsub.f32 %v9572_v59, %v256_v7  ;;  %v6121_v58 = vsub.f32 %v9578_v0, %v262_v10 }
  0xb9   : > { %9587 = vst [vmem:[#allocation151_spill] sm:$0xff] %v6062_v6  ;;  %9588 = vst [vmem:[#allocation152_spill] sm:$0xff] %v6064_v12  ;;  %4254 = vmatprep.subr.bf16.mxu1 %v6062_v6  ;;  %4446 = vmatprep.subr.bf16.mxu0 %v6062_v6  ;;  %v270_v6 = vand.u32 4294901760, %v9576_v50  ;;  %v284_v7 = vand.u32 4294901760, %v9566_v49  ;;  %v6140_v13 = vsub.f32 %v9575_v51, %v274_v21  ;;  %v286_v0 = vand.u32 4294901760, %v9564_v42 }
  0xba   : > { %4256 = vmatpush1.bf16.msra.mxu1 %v6064_v12  ;;  %4448 = vmatpush1.bf16.msra.mxu0 %v6064_v12  ;;  %v6085_v12 = vsub.f32 %v9584_v56, %v246_v5  ;;  %9593 = vst [vmem:[#allocation157_spill] sm:$0xff] %v6088_v19  ;;  %v272_v5 = vand.u32 4294901760, %v9573_v52  ;;  %v6106_v56 = vsub.f32 %v9579_v62, %v258_v8  ;;  %v292_v51 = vand.u32 4294901760, %v9559_v45 }
  0xbb   : > { %4258 = vmatprep.subr.bf16.mxu1 %v6066_v11  ;;  %4450 = vmatprep.subr.bf16.mxu0 %v6066_v11  ;;  %v6097_v11 = vsub.f32 %v9580_v60, %v254_v9  ;;  %v6110_v2 = vpack.c.bf16 %v274_v21, %v270_v6  ;;  %v282_v9 = vand.u32 4294901760, %v9570_v47  ;;  %v6124_v8 = vsub.f32 %v9574_v55, %v266_v16 }
  0xbc   : > { %9592 = vst [vmem:[#allocation156_spill] sm:$0xff] %v6085_v12  ;;  %9596 = vst [vmem:[#allocation160_spill] sm:$0xff] %v6106_v56  ;;  %v6127_v60 = vsub.f32 %v9565_v63, %v264_v15  ;;  %v6130_v62 = vsub.f32 %v9577_v1, %v268_v14  ;;  %v6137_v10 = vsub.f32 %v9576_v50, %v270_v6  ;;  %v290_v1 = vand.u32 4294901760, %v9563_v43 }
  0xbd   : > { %9594 = vst [vmem:[#allocation158_spill] sm:$0xff] %v6097_v11  ;;  %9597 = vst [vmem:[#allocation161_spill] sm:$0xff] %v6110_v2  ;;  %v6142_v16 = vpack.c.bf16 %v276_v4, %v272_v5  ;;  %v6147_v14 = vsub.f32 %v9573_v52, %v272_v5  ;;  %v6149_v15 = vpack.c.bf16 %v282_v9, %v278_v3  ;;  %v288_v50 = vand.u32 4294901760, %v9561_v44 }
  0xbe   : > { %4260 = vmatpush1.bf16.msra.mxu1 %v6073_v17  ;;  %4452 = vmatpush1.bf16.msra.mxu0 %v6073_v17  ;;  %9598 = vst [vmem:[#allocation162_spill] sm:$0xff] %v6124_v8  ;;  %9599 = vst [vmem:[#allocation163_spill] sm:$0xff] %v6127_v60  ;;  %v6154_v6 = vsub.f32 %v9569_v53, %v276_v4  ;;  %v6157_v21 = vsub.f32 %v9571_v46, %v278_v3  ;;  %v294_v52 = vand.u32 4294901760, %v9562_v38  ;;  %v9636_v17 = vld [vmem:[#allocation127_spill] sm:$0xff] }
  0xbf   : > { %4262 = vmatprep.subr.bf16.mxu1 %v6082_v20  ;;  %4454 = vmatprep.subr.bf16.mxu0 %v6082_v20  ;;  %9600 = vst [vmem:[#allocation164_spill] sm:$0xff] %v6130_v62  ;;  %v280_v20 = vand.u32 4294901760, %v9567_v48  ;;  %9601 = vst [vmem:[#allocation165_spill] sm:$0xff] %v6137_v10  ;;  %v6162_v55 = vsub.f32 %v9570_v47, %v282_v9  ;;  %v298_v59 = vand.u32 4294901760, %v9560_v39  ;;  %v296_v46 = vand.u32 4294901760, %v9558_v40 }
  0xc0   : > { %9602 = vst [vmem:[#allocation166_spill] sm:$0xff] %v6140_v13  ;;  %9603 = vst [vmem:[#allocation167_spill] sm:$0xff] %v6142_v16  ;;  %v6174_v3 = vsub.f32 %v9566_v49, %v284_v7  ;;  %v300_v9 = vand.u32 4294901760, %v9554_v41  ;;  %v6180_v47 = vpack.c.bf16 %v290_v1, %v286_v0  ;;  %v6183_v53 = vsub.f32 %v9564_v42, %v286_v0 }
  0xc1   : > { %9604 = vst [vmem:[#allocation168_spill] sm:$0xff] %v6147_v14  ;;  %9605 = vst [vmem:[#allocation169_spill] sm:$0xff] %v6149_v15  ;;  %v6164_v5 = vpack.c.bf16 %v284_v7, %v280_v20  ;;  %v6171_v4 = vsub.f32 %v9567_v48, %v280_v20  ;;  %v302_v61 = vand.u32 4294901760, %v9557_v34  ;;  %v306_v20 = vand.u32 4294901760, %v9556_v35 }
  0xc2   : > { %4264 = vmatpush1.bf16.msra.mxu1 %v6101_v24  ;;  %4456 = vmatpush1.bf16.msra.mxu0 %v6101_v24  ;;  %9606 = vst [vmem:[#allocation170_spill] sm:$0xff] %v6154_v6  ;;  %9607 = vst [vmem:[#allocation171_spill] sm:$0xff] %v6157_v21  ;;  %v6188_v7 = vsub.f32 %v9563_v43, %v290_v1  ;;  %v6190_v48 = vpack.c.bf16 %v292_v51, %v288_v50  ;;  %v304_v42 = vand.u32 4294901760, %v9555_v36 }
  0xc3   : > { %4266 = vmatprep.subr.bf16.mxu1 %v6110_v2  ;;  %4458 = vmatprep.subr.bf16.mxu0 %v6110_v2  ;;  %9608 = vst [vmem:[#allocation172_spill] sm:$0xff] %v6162_v55  ;;  %9609 = vst [vmem:[#allocation173_spill] sm:$0xff] %v6164_v5  ;;  %v6193_v49 = vsub.f32 %v9561_v44, %v288_v50  ;;  %v6196_v63 = vsub.f32 %v9559_v45, %v292_v51  ;;  %v310_v51 = vand.u32 4294901760, %v9552_v30 }
  0xc4   : > { %9610 = vst [vmem:[#allocation174_spill] sm:$0xff] %v6171_v4  ;;  %9611 = vst [vmem:[#allocation175_spill] sm:$0xff] %v6174_v3  ;;  %v6201_v0 = vsub.f32 %v9562_v38, %v294_v52  ;;  %v6208_v1 = vsub.f32 %v9560_v39, %v298_v59  ;;  %v6210_v50 = vpack.c.bf16 %v300_v9, %v296_v46  ;;  %v314_v43 = vand.u32 4294901760, %v9551_v31 }
  0xc5   : > { %9612 = vst [vmem:[#allocation176_spill] sm:$0xff] %v6180_v47  ;;  %9613 = vst [vmem:[#allocation177_spill] sm:$0xff] %v6183_v53  ;;  %v6220_v38 = vsub.f32 %v9554_v41, %v300_v9  ;;  %v6222_v44 = vpack.c.bf16 %v306_v20, %v302_v61  ;;  %v6228_v39 = vsub.f32 %v9556_v35, %v306_v20  ;;  %v312_v45 = vand.u32 4294901760, %v9550_v32 }
  0xc6   : > { %4268 = vmatpush1.bf16.msra.mxu1 %v6142_v16  ;;  %4460 = vmatpush1.bf16.msra.mxu0 %v6142_v16  ;;  %9614 = vst [vmem:[#allocation178_spill] sm:$0xff] %v6188_v7  ;;  %9615 = vst [vmem:[#allocation179_spill] sm:$0xff] %v6190_v48  ;;  %v308_v16 = vand.u32 4294901760, %v9553_v37  ;;  %v318_v9 = vand.u32 4294901760, %v9548_v26  ;;  %v6244_v20 = vpack.c.bf16 %v314_v43, %v310_v51  ;;  %v324_v35 = vand.u32 4294901760, %v9545_v29 }
  0xc7   : > { %4270 = vmatprep.subr.bf16.mxu1 %v6149_v15  ;;  %4462 = vmatprep.subr.bf16.mxu0 %v6149_v15  ;;  %9616 = vst [vmem:[#allocation180_spill] sm:$0xff] %v6193_v49  ;;  %9617 = vst [vmem:[#allocation181_spill] sm:$0xff] %v6196_v63  ;;  %v6198_v15 = vpack.c.bf16 %v298_v59, %v294_v52  ;;  %v6217_v52 = vsub.f32 %v9558_v40, %v296_v46  ;;  %v322_v40 = vand.u32 4294901760, %v9547_v27 }
  0xc8   : > { %9619 = vst [vmem:[#allocation183_spill] sm:$0xff] %v6201_v0  ;;  %9620 = vst [vmem:[#allocation184_spill] sm:$0xff] %v6208_v1  ;;  %v6225_v59 = vsub.f32 %v9557_v34, %v302_v61  ;;  %v6232_v2 = vpack.c.bf16 %v308_v16, %v304_v42  ;;  %v6235_v46 = vsub.f32 %v9555_v36, %v304_v42  ;;  %v320_v34 = vand.u32 4294901760, %v9546_v28 }
  0xc9   : > { %9618 = vst [vmem:[#allocation182_spill] sm:$0xff] %v6198_v15  ;;  %9621 = vst [vmem:[#allocation185_spill] sm:$0xff] %v6210_v50  ;;  %v6242_v61 = vsub.f32 %v9553_v37, %v308_v16  ;;  %v6251_v42 = vsub.f32 %v9552_v30, %v310_v51  ;;  %v6254_v36 = vsub.f32 %v9551_v31, %v314_v43  ;;  %v326_v41 = vand.u32 4294901760, %v9544_v22 }
  0xca   : > { %4272 = vmatpush1.bf16.msra.mxu1 %v6164_v5  ;;  %4464 = vmatpush1.bf16.msra.mxu0 %v6164_v5  ;;  %9622 = vst [vmem:[#allocation186_spill] sm:$0xff] %v6217_v52  ;;  %9623 = vst [vmem:[#allocation187_spill] sm:$0xff] %v6220_v38  ;;  %v316_v5 = vand.u32 4294901760, %v9549_v33  ;;  %v330_v16 = vand.u32 4294901760, %v9543_v23  ;;  %v6268_v51 = vpack.c.bf16 %v322_v40, %v318_v9 }
  0xcb   : > { %4274 = vmatprep.subr.bf16.mxu1 %v6180_v47  ;;  %4466 = vmatprep.subr.bf16.mxu0 %v6180_v47  ;;  %9624 = vst [vmem:[#allocation188_spill] sm:$0xff] %v6222_v44  ;;  %9625 = vst [vmem:[#allocation189_spill] sm:$0xff] %v6225_v59  ;;  %v9635_v47 = vld [vmem:[#allocation125_spill] sm:$0xff]  ;;  %v6271_v43 = vsub.f32 %v9548_v26, %v318_v9  ;;  %v6274_v30 = vsub.f32 %v9547_v27, %v322_v40 }
  0xcc   : > { %9626 = vst [vmem:[#allocation190_spill] sm:$0xff] %v6228_v39  ;;  %9627 = vst [vmem:[#allocation191_spill] sm:$0xff] %v6232_v2  ;;  %v6258_v37 = vpack.c.bf16 %v316_v5, %v312_v45  ;;  %v328_v24 = vand.u32 4294901760, %v9635_v47  ;;  %v6281_v31 = vsub.f32 %v9546_v28, %v320_v34  ;;  %v6288_v40 = vsub.f32 %v9545_v29, %v324_v35  ;;  %v9650_v28 = vld [vmem:[#allocation129_spill] sm:$0xff]  ;;  %v9654_v29 = vld [vmem:[#allocation134_spill] sm:$0xff] }
  0xcd   : > { %9628 = vst [vmem:[#allocation192_spill] sm:$0xff] %v6235_v46  ;;  %9629 = vst [vmem:[#allocation193_spill] sm:$0xff] %v6242_v61  ;;  %v332_v61 = vand.u32 4294901760, %v9636_v17  ;;  %v6290_v9 = vpack.c.bf16 %v330_v16, %v326_v41  ;;  %v6293_v26 = vsub.f32 %v9544_v22, %v326_v41  ;;  %v6296_v27 = vsub.f32 %v9543_v23, %v330_v16 }
  0xce   : > { %4276 = vmatpush1.bf16.msra.mxu1 %v6190_v48  ;;  %4468 = vmatpush1.bf16.msra.mxu0 %v6190_v48  ;;  %9630 = vst [vmem:[#allocation194_spill] sm:$0xff] %v6244_v20  ;;  %9631 = vst [vmem:[#allocation195_spill] sm:$0xff] %v6251_v42  ;;  %v6261_v48 = vsub.f32 %v9550_v32, %v312_v45  ;;  %v6278_v45 = vpack.c.bf16 %v324_v35, %v320_v34  ;;  %v9643_v32 = vld [vmem:[#allocation130_spill] sm:$0xff]  ;;  %v9670_v42 = vld [vmem:[#allocation144_spill] sm:$0xff] }
  0xcf   : > { %4278 = vmatprep.subr.bf16.mxu1 %v6198_v15  ;;  %4470 = vmatprep.subr.bf16.mxu0 %v6198_v15  ;;  %9632 = vst [vmem:[#allocation196_spill] sm:$0xff] %v6254_v36  ;;  %9633 = vst [vmem:[#allocation197_spill] sm:$0xff] %v6258_v37  ;;  %v6266_v15 = vsub.f32 %v9549_v33, %v316_v5  ;;  %v334_v5 = vand.u32 4294901760, %v9643_v32  ;;  %v9644_v33 = vld [vmem:[#allocation132_spill] sm:$0xff]  ;;  %v6298_v34 = vpack.c.bf16 %v332_v61, %v328_v24 }
  0xd0   : > { %9634 = vst [vmem:[#allocation198_spill] sm:$0xff] %v6261_v48  ;;  %9638 = vst [vmem:[#allocation200_spill] sm:$0xff] %v6268_v51  ;;  %v6306_v35 = vsub.f32 %v9636_v17, %v332_v61  ;;  %v9660_v17 = vld [vmem:[#allocation135_spill] sm:$0xff]  ;;  %v9669_v48 = vld [vmem:[#allocation142_spill] sm:$0xff]  ;;  %v362_v46 = vand.u32 4294901760, %v9670_v42 }
  0xd1   : > { %9637 = vst [vmem:[#allocation199_spill] sm:$0xff] %v6266_v15  ;;  %9639 = vst [vmem:[#allocation201_spill] sm:$0xff] %v6271_v43  ;;  %v338_v15 = vand.u32 4294901760, %v9644_v33  ;;  %v6303_v43 = vsub.f32 %v9635_v47, %v328_v24  ;;  %v6315_v22 = vsub.f32 %v9643_v32, %v334_v5  ;;  %v9659_v24 = vld [vmem:[#allocation133_spill] sm:$0xff]  ;;  %v348_v47 = vand.u32 4294901760, %v9660_v17 }
  0xd2   : > { %9640 = vst [vmem:[#allocation202_spill] sm:$0xff] %v6274_v30  ;;  %4280 = vmatpush1.bf16.msra.mxu1 %v6210_v50  ;;  %4472 = vmatpush1.bf16.msra.mxu0 %v6210_v50  ;;  %9641 = vst [vmem:[#allocation203_spill] sm:$0xff] %v6278_v45  ;;  %v336_v50 = vand.u32 4294901760, %v9650_v28  ;;  %v344_v61 = vand.u32 4294901760, %v9659_v24  ;;  %v9665_v32 = vld [vmem:[#allocation137_spill] sm:$0xff]  ;;  %v358_v36 = vand.u32 4294901760, %v9669_v48 }
  0xd3   : > { %9642 = vst [vmem:[#allocation204_spill] sm:$0xff] %v6281_v31  ;;  %4282 = vmatprep.subr.bf16.mxu1 %v6222_v44  ;;  %4474 = vmatprep.subr.bf16.mxu0 %v6222_v44  ;;  %9645 = vst [vmem:[#allocation205_spill] sm:$0xff] %v6288_v40  ;;  %v9651_v31 = vld [vmem:[#allocation131_spill] sm:$0xff]  ;;  %v342_v44 = vand.u32 4294901760, %v9654_v29  ;;  %v9655_v40 = vld [vmem:[#allocation136_spill] sm:$0xff]  ;;  %v6312_v16 = vpack.c.bf16 %v338_v15, %v334_v5  ;;  %v6318_v23 = vsub.f32 %v9644_v33, %v338_v15 }
  0xd4   : > { %9646 = vst [vmem:[#allocation206_spill] sm:$0xff] %v6290_v9  ;;  %9647 = vst [vmem:[#allocation207_spill] sm:$0xff] %v6293_v26  ;;  %v340_v30 = vand.u32 4294901760, %v9651_v31  ;;  %v346_v41 = vand.u32 4294901760, %v9655_v40  ;;  %v6329_v5 = vsub.f32 %v9650_v28, %v336_v50  ;;  %v352_v15 = vand.u32 4294901760, %v9665_v32  ;;  %v9666_v33 = vld [vmem:[#allocation139_spill] sm:$0xff] }
  0xd5   : > { %9648 = vst [vmem:[#allocation208_spill] sm:$0xff] %v6296_v27  ;;  %9649 = vst [vmem:[#allocation209_spill] sm:$0xff] %v6298_v34  ;;  %v9662_v27 = vld [vmem:[#allocation140_spill] sm:$0xff] }
  0xd6   : > { %9652 = vst [vmem:[#allocation210_spill] sm:$0xff] %v6303_v43  ;;  %9653 = vst [vmem:[#allocation211_spill] sm:$0xff] %v6306_v35  ;;  %4284 = vmatpush1.bf16.msra.mxu1 %v6232_v2  ;;  %4476 = vmatpush1.bf16.msra.mxu0 %v6232_v2  ;;  %v9661_v35 = vld [vmem:[#allocation138_spill] sm:$0xff]  ;;  %v354_v2 = vand.u32 4294901760, %v9662_v27  ;;  %v6326_v26 = vpack.c.bf16 %v340_v30, %v336_v50  ;;  %v6343_v50 = vsub.f32 %v9654_v29, %v342_v44 }
  0xd7   : > { %9656 = vst [vmem:[#allocation212_spill] sm:$0xff] %v6312_v16  ;;  %9657 = vst [vmem:[#allocation213_spill] sm:$0xff] %v6315_v22  ;;  %4286 = vmatprep.subr.bf16.mxu1 %v6244_v20  ;;  %4478 = vmatprep.subr.bf16.mxu0 %v6244_v20  ;;  %v350_v43 = vand.u32 4294901760, %v9661_v35  ;;  %v6334_v22 = vsub.f32 %v9651_v31, %v340_v30  ;;  %v6336_v20 = vpack.c.bf16 %v346_v41, %v342_v44 }
  0xd8   : > { %9658 = vst [vmem:[#allocation214_spill] sm:$0xff] %v6318_v23  ;;  %9663 = vst [vmem:[#allocation215_spill] sm:$0xff] %v6326_v26  ;;  %v356_v23 = vand.u32 4294901760, %v9666_v33  ;;  %v6346_v28 = vsub.f32 %v9655_v40, %v346_v41  ;;  %v6353_v30 = vpack.c.bf16 %v348_v47, %v344_v61  ;;  %v6356_v31 = vsub.f32 %v9660_v17, %v348_v47 }
  0xd9   : > { %9664 = vst [vmem:[#allocation216_spill] sm:$0xff] %v6329_v5  ;;  %9667 = vst [vmem:[#allocation217_spill] sm:$0xff] %v6334_v22  ;;  %v6349_v5 = vsub.f32 %v9659_v24, %v344_v61  ;;  %v6358_v22 = vpack.c.bf16 %v354_v2, %v350_v43  ;;  %v6361_v44 = vsub.f32 %v9661_v35, %v350_v43  ;;  %v9680_v24 = vld [vmem:[#allocation141_spill] sm:$0xff]  ;;  %v9684_v43 = vld [vmem:[#allocation143_spill] sm:$0xff]  ;;  %v393_v35 = vand.u32 4294901760, %v6085_v12 }
  0xda   : > { %9668 = vst [vmem:[#allocation218_spill] sm:$0xff] %v6336_v20  ;;  %4288 = vmatpush1.bf16.msra.mxu1 %v6258_v37  ;;  %4480 = vmatpush1.bf16.msra.mxu0 %v6258_v37  ;;  %9671 = vst [vmem:[#allocation219_spill] sm:$0xff] %v6343_v50  ;;  %v6364_v41 = vsub.f32 %v9662_v27, %v354_v2  ;;  %v6366_v29 = vpack.c.bf16 %v356_v23, %v352_v15  ;;  %v360_v40 = vand.u32 4294901760, %v9680_v24  ;;  %v9685_v2 = vld [vmem:[#allocation149_spill] sm:$0xff]  ;;  %v9693_v50 = vld [vmem:[#allocation147_spill] sm:$0xff] }
  0xdb   : > { %9672 = vst [vmem:[#allocation220_spill] sm:$0xff] %v6346_v28  ;;  %9673 = vst [vmem:[#allocation221_spill] sm:$0xff] %v6349_v5  ;;  %4290 = vmatprep.subr.bf16.mxu1 %v6268_v51  ;;  %4482 = vmatprep.subr.bf16.mxu0 %v6268_v51  ;;  %v6370_v37 = vsub.f32 %v9665_v32, %v352_v15  ;;  %v6373_v61 = vsub.f32 %v9666_v33, %v356_v23  ;;  %v364_v17 = vand.u32 4294901760, %v9684_v43  ;;  %v9687_v15 = vld [vmem:[#allocation146_spill] sm:$0xff]  ;;  %v9688_v32 = vld [vmem:[#allocation148_spill] sm:$0xff] }
  0xdc   : > { %9674 = vst [vmem:[#allocation222_spill] sm:$0xff] %v6353_v30  ;;  %9675 = vst [vmem:[#allocation223_spill] sm:$0xff] %v6356_v31  ;;  %v6375_v47 = vpack.c.bf16 %v362_v46, %v358_v36  ;;  %v6381_v27 = vand.u32 4294901760, %v9685_v2  ;;  %v366_v23 = vand.u32 4294901760, %v9687_v15  ;;  %v370_v33 = vand.u32 4294901760, %v9688_v32  ;;  %v9692_v5 = vld [vmem:[#allocation145_spill] sm:$0xff] }
  0xdd   : > { %9676 = vst [vmem:[#allocation224_spill] sm:$0xff] %v6358_v22  ;;  %9677 = vst [vmem:[#allocation225_spill] sm:$0xff] %v6361_v44  ;;  %v405_v51 = vand.u32 4294901760, %v6088_v19  ;;  %v411_v44 = vand.u32 4294901760, %v6094_v25  ;;  %v6399_v31 = vsub.f32 %v9669_v48, %v358_v36  ;;  %v368_v28 = vand.u32 4294901760, %v9692_v5 }
  0xde   : > { %9678 = vst [vmem:[#allocation226_spill] sm:$0xff] %v6364_v41  ;;  %9679 = vst [vmem:[#allocation227_spill] sm:$0xff] %v6366_v29  ;;  %4292 = vmatpush1.bf16.msra.mxu1 %v6278_v45  ;;  %4484 = vmatpush1.bf16.msra.mxu0 %v6278_v45  ;;  %v6391_v45 = vsub.f32 %v9685_v2, %v6381_v27  ;;  %v399_v41 = vand.u32 4294901760, %v6091_v18  ;;  %v372_v39 = vand.u32 4294901760, %v9693_v50 }
  0xdf   : > { %9681 = vst [vmem:[#allocation228_spill] sm:$0xff] %v6370_v37  ;;  %9682 = vst [vmem:[#allocation229_spill] sm:$0xff] %v6373_v61  ;;  %4294 = vmatprep.subr.bf16.mxu1 %v6290_v9  ;;  %4486 = vmatprep.subr.bf16.mxu0 %v6290_v9  ;;  %v9690_v61 = vld [vmem:[#allocation150_spill] sm:$0xff]  ;;  %v6402_v9 = vsub.f32 %v9670_v42, %v362_v46  ;;  %v6408_v2 = vpack.c.bf16 %v364_v17, %v360_v40 }
  0xe0   : > { %9683 = vst [vmem:[#allocation230_spill] sm:$0xff] %v6375_v47  ;;  %9686 = vst [vmem:[#allocation149_spill] sm:$0xff] %v6381_v27  ;;  %v6394_v37 = vand.u32 4294901760, %v9690_v61  ;;  %v6411_v59 = vsub.f32 %v9680_v24, %v360_v40  ;;  %v376_v27 = vand.u32 4294901760, %v6391_v45  ;;  %v394_v36 = vsub.f32 %v6085_v12, %v393_v35 }
  0xe1   : > { %9689 = vst [vmem:[#allocation231_spill] sm:$0xff] %v6391_v45  ;;  %9694 = vst [vmem:[#allocation232_spill] sm:$0xff] %v6408_v2  ;;  %v6418_v46 = vsub.f32 %v9684_v43, %v364_v17  ;;  %v6420_v42 = vpack.c.bf16 %v370_v33, %v366_v23  ;;  %v417_v40 = vand.u32 4294901760, %v6097_v11  ;;  %v400_v12 = vsub.f32 %v6091_v18, %v399_v41 }
  0xe2   : > { %9691 = vst [vmem:[#allocation150_spill] sm:$0xff] %v6394_v37  ;;  %4296 = vmatpush1.bf16.msra.mxu1 %v6298_v34  ;;  %4488 = vmatpush1.bf16.msra.mxu0 %v6298_v34  ;;  %v6424_v48 = vsub.f32 %v9690_v61, %v6394_v37  ;;  %v377_v24 = vsub.f32 %v6391_v45, %v376_v27  ;;  %v429_v61 = vand.u32 4294901760, %v6106_v56 }
  0xe3   : > { %4298 = vmatprep.subr.bf16.mxu1 %v6312_v16  ;;  %4490 = vmatprep.subr.bf16.mxu0 %v6312_v16  ;;  %9695 = vst [vmem:[#allocation233_spill] sm:$0xff] %v6418_v46  ;;  %9696 = vst [vmem:[#allocation234_spill] sm:$0xff] %v6420_v42  ;;  %v406_v34 = vsub.f32 %v6088_v19, %v405_v51  ;;  %v412_v16 = vsub.f32 %v6094_v25, %v411_v44 }
  0xe4   : > { %9697 = vst [vmem:[#allocation235_spill] sm:$0xff] %v6424_v48  ;;  %1118 = vmatprep.mubr.f32.mxu0 %v376_v27  ;;  %v6432_v17 = vsub.f32 %v9687_v15, %v366_v23  ;;  %v6435_v43 = vsub.f32 %v9688_v32, %v370_v33  ;;  %v6437_v46 = vpack.c.bf16 %v372_v39, %v368_v28  ;;  %v378_v37 = vand.u32 4294901760, %v377_v24 }
  0xe5   : > { %v6443_v27 = vsub.f32 %v9692_v5, %v368_v28  ;;  %v6446_v45 = vsub.f32 %v9693_v50, %v372_v39  ;;  %v395_v23 = vand.u32 4294901760, %v394_v36  ;;  %v6450_v33 = vpack.c.bf16 %v405_v51, %v393_v35 }
  0xe6   : > { %9698 = vst [vmem:[#allocation236_spill] sm:$0xff] %v6435_v43  ;;  %9699 = vst [vmem:[#allocation237_spill] sm:$0xff] %v6437_v46  ;;  %4300 = vmatpush1.bf16.msra.mxu1 %v6326_v26  ;;  %4492 = vmatpush1.bf16.msra.mxu0 %v6326_v26  ;;  %v8955_v15 = vand.u32 4294901760, %v6424_v48  ;;  %v423_v32 = vand.u32 4294901760, %v6115_v54  ;;  %v435_v26 = vand.u32 4294901760, %v6118_v57  ;;  %v407_v28 = vand.u32 4294901760, %v406_v34 }
  0xe7   : > { %9700 = vst [vmem:[#allocation238_spill] sm:$0xff] %v6443_v27  ;;  %9701 = vst [vmem:[#allocation239_spill] sm:$0xff] %v6446_v45  ;;  %4302 = vmatprep.subr.bf16.mxu1 %v6336_v20  ;;  %4494 = vmatprep.subr.bf16.mxu0 %v6336_v20  ;;  %v401_v5 = vand.u32 4294901760, %v400_v12  ;;  %v413_v19 = vand.u32 4294901760, %v412_v16  ;;  %v418_v39 = vsub.f32 %v6097_v11, %v417_v40  ;;  %v441_v36 = vand.u32 4294901760, %v6121_v58 }
  0xe8   : > { %379 = vmatprep.mubr.f32.mxu1 %v378_v37  ;;  %v430_v24 = vsub.f32 %v6106_v56, %v429_v61  ;;  %v453_v50 = vand.u32 4294901760, %v6124_v8  ;;  %v447_v51 = vand.u32 4294901760, %v6127_v60  ;;  %v6462_v35 = vpack.c.bf16 %v411_v44, %v399_v41 }
  0xe9   : > { %v459_v37 = vand.u32 4294901760, %v6130_v62  ;;  %v465_v12 = vand.u32 4294901760, %v6137_v10  ;;  %v477_v34 = vand.u32 4294901760, %v6140_v13  ;;  %v6472_v16 = vsub.f32 %v6424_v48, %v8955_v15 }
  0xea   : > { %4304 = vmatpush1.bf16.msra.mxu1 %v6353_v30  ;;  %4496 = vmatpush1.bf16.msra.mxu0 %v6353_v30  ;;  %v424_v20 = vsub.f32 %v6115_v54, %v423_v32  ;;  %v436_v44 = vsub.f32 %v6118_v57, %v435_v26  ;;  %v4317_v41 = vpack.c.bf16 %v407_v28, %v395_v23  ;;  %v419_v56 = vand.u32 4294901760, %v418_v39 }
  0xeb   : > { %4306 = vmatprep.subr.bf16.mxu1 %v6358_v22  ;;  %4498 = vmatprep.subr.bf16.mxu0 %v6358_v22  ;;  %v6476_v30 = vpack.c.bf16 %v413_v19, %v401_v5  ;;  %v6478_v11 = vpack.c.bf16 %v429_v61, %v417_v40  ;;  %v431_v45 = vand.u32 4294901760, %v430_v24  ;;  %v442_v27 = vsub.f32 %v6121_v58, %v441_v36 }
  0xec   : > { %v454_v22 = vsub.f32 %v6124_v8, %v453_v50  ;;  %v448_v43 = vsub.f32 %v6127_v60, %v447_v51  ;;  %v460_v15 = vsub.f32 %v6130_v62, %v459_v37  ;;  %v466_v23 = vsub.f32 %v6137_v10, %v465_v12 }
  0xed   : > { %v478_v19 = vsub.f32 %v6140_v13, %v477_v34  ;;  %v384_v5 = vand.u32 4294901760, %v6472_v16  ;;  %v425_v40 = vand.u32 4294901760, %v424_v20  ;;  %v437_v61 = vand.u32 4294901760, %v436_v44 }
  0xee   : > { %4308 = vmatpush1.bf16.msra.mxu1 %v6366_v29  ;;  %4500 = vmatpush1.bf16.msra.mxu0 %v6366_v29  ;;  %v6491_v28 = vpack.c.bf16 %v435_v26, %v423_v32  ;;  %v471_v39 = vand.u32 4294901760, %v6147_v14  ;;  %v483_v24 = vand.u32 4294901760, %v6154_v6  ;;  %v489_v29 = vand.u32 4294901760, %v6157_v21 }
  0xef   : > { %4310 = vmatprep.subr.bf16.mxu1 %v6375_v47  ;;  %4502 = vmatprep.subr.bf16.mxu0 %v6375_v47  ;;  %v501_v10 = vand.u32 4294901760, %v6162_v55  ;;  %v4321_v62 = vpack.c.bf16 %v431_v45, %v419_v56  ;;  %v443_v13 = vand.u32 4294901760, %v442_v27  ;;  %v455_v60 = vand.u32 4294901760, %v454_v22 }
  0xf0   : > { %v6497_v8 = vpack.c.bf16 %v453_v50, %v441_v36  ;;  %v449_v20 = vand.u32 4294901760, %v448_v43  ;;  %v461_v26 = vand.u32 4294901760, %v460_v15  ;;  %v467_v32 = vand.u32 4294901760, %v466_v23 }
  0xf1   : > { %v479_v16 = vand.u32 4294901760, %v478_v19  ;;  %v4323_v44 = vpack.c.bf16 %v437_v61, %v425_v40  ;;  %v6503_v47 = vpack.c.bf16 %v459_v37, %v447_v51  ;;  %v495_v56 = vand.u32 4294901760, %v6171_v4 }
  0xf2   : > { %4312 = vmatpush1.bf16.msra.mxu1 %v6408_v2  ;;  %4504 = vmatpush1.bf16.msra.mxu0 %v6408_v2  ;;  %v507_v22 = vand.u32 4294901760, %v6174_v3  ;;  %v472_v45 = vsub.f32 %v6147_v14, %v471_v39  ;;  %v484_v50 = vsub.f32 %v6154_v6, %v483_v24  ;;  %v490_v43 = vsub.f32 %v6157_v21, %v489_v29  ;;  %v9755_v6 = vld [vmem:[#allocation195_spill] sm:$0xff]  ;;  %v9766_v14 = vld [vmem:[#allocation210_spill] sm:$0xff] }
  0xf3   : > { %4314 = vmatprep.subr.bf16.mxu1 %v6420_v42  ;;  %4506 = vmatprep.subr.bf16.mxu0 %v6420_v42  ;;  %v502_v15 = vsub.f32 %v6162_v55, %v501_v10  ;;  %v4325_v27 = vpack.c.bf16 %v455_v60, %v443_v13  ;;  %v6511_v36 = vpack.c.bf16 %v477_v34, %v465_v12  ;;  %v513_v23 = vand.u32 4294901760, %v6183_v53  ;;  %v9767_v21 = vld [vmem:[#allocation211_spill] sm:$0xff] }
  0xf4   : > { %v525_v51 = vand.u32 4294901760, %v6188_v7  ;;  %v4327_v37 = vpack.c.bf16 %v461_v26, %v449_v20  ;;  %v6517_v19 = vpack.c.bf16 %v479_v16, %v467_v32  ;;  %v519_v40 = vand.u32 4294901760, %v6193_v49 }
  0xf5   : > { %v531_v61 = vand.u32 4294901760, %v6196_v63  ;;  %v496_v60 = vsub.f32 %v6171_v4, %v495_v56  ;;  %v508_v13 = vsub.f32 %v6174_v3, %v507_v22  ;;  %v537_v12 = vand.u32 4294901760, %v6201_v0 }
  0xf6   : > { %4316 = vmatpush1.bf16.msra.mxu1 %v6437_v46  ;;  %4508 = vmatpush1.bf16.msra.mxu0 %v6437_v46  ;;  %v549_v34 = vand.u32 4294901760, %v6208_v1  ;;  %v473_v42 = vand.u32 4294901760, %v472_v45  ;;  %v485_v46 = vand.u32 4294901760, %v484_v50  ;;  %v491_v20 = vand.u32 4294901760, %v490_v43 }
  0xf7   : > { %4318 = vmatprep.subr.bf16.mxu1 %v4317_v41  ;;  %4510 = vmatprep.subr.bf16.mxu0 %v6450_v33  ;;  %v503_v26 = vand.u32 4294901760, %v502_v15  ;;  %v9702_v32 = vand.u32 4294901760, %v6424_v48  ;;  %v6528_v16 = vpack.c.bf16 %v483_v24, %v471_v39  ;;  %v514_v33 = vsub.f32 %v6183_v53, %v513_v23 }
  0xf8   : > { %v526_v41 = vsub.f32 %v6188_v7, %v525_v51  ;;  %v6534_v2 = vpack.c.bf16 %v501_v10, %v489_v29  ;;  %v520_v45 = vsub.f32 %v6193_v49, %v519_v40  ;;  %v532_v50 = vsub.f32 %v6196_v63, %v531_v61  ;;  %v9703_v10 = vld [vmem:[#allocation149_spill] sm:$0xff]  ;;  %v9705_v49 = vld [vmem:[#allocation190_spill] sm:$0xff] }
  0xf9   : > { %385 = vmatmul.mubr.f32.vlgmr.msra.gmra.mrb[0].mxu1 %v384_v5  ;;  %1122 = vmatmul.mubr.f32.vlgmr.msra.gmra.mrb[0].mxu0 %v9702_v32  ;;  %v497_v5 = vand.u32 4294901760, %v496_v60  ;;  %v509_v39 = vand.u32 4294901760, %v508_v13  ;;  %v538_v24 = vsub.f32 %v6201_v0, %v537_v12  ;;  %v550_v43 = vsub.f32 %v6208_v1, %v549_v34  ;;  %v9704_v63 = vld [vmem:[#allocation189_spill] sm:$0xff] }
  0xfa   : > { %4320 = vmatpush1.bf16.msra.mxu1 %v6476_v30  ;;  %4512 = vmatpush1.bf16.msra.mxu0 %v6462_v35  ;;  %v4331_v15 = vpack.c.bf16 %v485_v46, %v473_v42  ;;  %v4333_v32 = vpack.c.bf16 %v503_v26, %v491_v20  ;;  %v543_v30 = vand.u32 4294901760, %v6217_v52  ;;  %v555_v29 = vand.u32 4294901760, %v6220_v38  ;;  %v9707_v7 = vld [vmem:[#allocation193_spill] sm:$0xff] }
  0xfb   : > { %4322 = vmatprep.subr.bf16.mxu1 %v4321_v62  ;;  %4514 = vmatprep.subr.bf16.mxu0 %v6478_v11  ;;  %v515_v35 = vand.u32 4294901760, %v514_v33  ;;  %v527_v48 = vand.u32 4294901760, %v526_v41  ;;  %v561_v62 = vand.u32 4294901760, %v9704_v63  ;;  %v573_v11 = vand.u32 4294901760, %v9705_v49 }
  0xfc   : > { %776 = vmatprep.mubr.f32.mxu1 %v9703_v10  ;;  %1385 = vmatprep.mubr.f32.mxu0 %v9703_v10  ;;  %v4527_v60 = vpack.c.bf16 %v507_v22, %v495_v56  ;;  %v4529_v42 = vpack.c.bf16 %v525_v51, %v513_v23  ;;  %v521_v46 = vand.u32 4294901760, %v520_v45  ;;  %v533_v13 = vand.u32 4294901760, %v532_v50  ;;  %v9706_v10 = vld [vmem:[#allocation192_spill] sm:$0xff]  ;;  %v9708_v51 = vld [vmem:[#allocation195_spill] sm:$0xff]  ;;  %v9710_v50 = vld [vmem:[#allocation198_spill] sm:$0xff] }
  0xfd   : > { %v4335_v20 = vpack.c.bf16 %v509_v39, %v497_v5  ;;  %v6549_v26 = vpack.c.bf16 %v531_v61, %v519_v40  ;;  %v539_v33 = vand.u32 4294901760, %v538_v24  ;;  %v551_v41 = vand.u32 4294901760, %v550_v43  ;;  %v9709_v61 = vld [vmem:[#allocation196_spill] sm:$0xff]  ;;  %v9712_v39 = vld [vmem:[#allocation201_spill] sm:$0xff]  ;;  %v9713_v43 = vld [vmem:[#allocation202_spill] sm:$0xff] }
  0xfe   : > { %4324 = vmatpush1.bf16.msra.mxu1 %v4323_v44  ;;  %4516 = vmatpush1.bf16.msra.mxu0 %v6491_v28  ;;  %v544_v1 = vsub.f32 %v6217_v52, %v543_v30  ;;  %v556_v0 = vsub.f32 %v6220_v38, %v555_v29  ;;  %v567_v44 = vand.u32 4294901760, %v9706_v10  ;;  %v579_v28 = vand.u32 4294901760, %v9707_v7 }
  0xff   : > { %4326 = vmatprep.subr.bf16.mxu1 %v4325_v27  ;;  %4518 = vmatprep.subr.bf16.mxu0 %v6497_v8  ;;  %v4337_v56 = vpack.c.bf16 %v527_v48, %v515_v35  ;;  %v6555_v22 = vpack.c.bf16 %v549_v34, %v537_v12  ;;  %v562_v27 = vsub.f32 %v9704_v63, %v561_v62  ;;  %v585_v40 = vand.u32 4294901760, %v9708_v51  ;;  %v9711_v12 = vld [vmem:[#allocation199_spill] sm:$0xff] }
 0x100   : > { %v574_v8 = vsub.f32 %v9705_v49, %v573_v11  ;;  %v4339_v23 = vpack.c.bf16 %v533_v13, %v521_v46  ;;  %v597_v45 = vand.u32 4294901760, %v9709_v61  ;;  %v591_v5 = vand.u32 4294901760, %v9710_v50 }
 0x101   : > { %v4341_v48 = vpack.c.bf16 %v551_v41, %v539_v33  ;;  %v603_v34 = vand.u32 4294901760, %v9711_v12  ;;  %v609_v24 = vand.u32 4294901760, %v9712_v39  ;;  %v545_v35 = vand.u32 4294901760, %v544_v1 }
 0x102   : > { %4328 = vmatpush1.bf16.msra.mxu1 %v4327_v37  ;;  %4520 = vmatpush1.bf16.msra.mxu0 %v6503_v47  ;;  %v621_v37 = vand.u32 4294901760, %v9713_v43  ;;  %v557_v47 = vand.u32 4294901760, %v556_v0  ;;  %v568_v46 = vsub.f32 %v9706_v10, %v567_v44  ;;  %v580_v13 = vsub.f32 %v9707_v7, %v579_v28  ;;  %v9717_v7 = vld [vmem:[#allocation208_spill] sm:$0xff] }
 0x103   : > { %4330 = vmatprep.subr.bf16.mxu1 %v6517_v19  ;;  %4522 = vmatprep.subr.bf16.mxu0 %v6511_v36  ;;  %v6570_v49 = vpack.c.bf16 %v555_v29, %v543_v30  ;;  %v563_v63 = vand.u32 4294901760, %v562_v27  ;;  %v575_v38 = vand.u32 4294901760, %v574_v8  ;;  %v6572_v19 = vpack.c.bf16 %v573_v11, %v561_v62  ;;  %v9714_v62 = vld [vmem:[#allocation204_spill] sm:$0xff]  ;;  %v9715_v27 = vld [vmem:[#allocation205_spill] sm:$0xff] }
 0x104   : > { %v586_v36 = vsub.f32 %v9708_v51, %v585_v40  ;;  %v598_v33 = vsub.f32 %v9709_v61, %v597_v45  ;;  %v592_v1 = vsub.f32 %v9710_v50, %v591_v5  ;;  %v604_v0 = vsub.f32 %v9711_v12, %v603_v34  ;;  %v9716_v50 = vld [vmem:[#allocation207_spill] sm:$0xff] }
 0x105   : > { %v610_v30 = vsub.f32 %v9712_v39, %v609_v24  ;;  %v622_v29 = vsub.f32 %v9713_v43, %v621_v37  ;;  %v615_v11 = vand.u32 4294901760, %v9714_v62  ;;  %v569_v41 = vand.u32 4294901760, %v568_v46 }
 0x106   : > { %4332 = vmatpush1.bf16.msra.mxu1 %v4331_v15  ;;  %4524 = vmatpush1.bf16.msra.mxu0 %v6528_v16  ;;  %v4343_v15 = vpack.c.bf16 %v557_v47, %v545_v35  ;;  %v581_v16 = vand.u32 4294901760, %v580_v13  ;;  %v627_v8 = vand.u32 4294901760, %v9715_v27  ;;  %v4345_v51 = vpack.c.bf16 %v575_v38, %v563_v63 }
 0x107   : > { %4334 = vmatprep.subr.bf16.mxu1 %v4333_v32  ;;  %4526 = vmatprep.subr.bf16.mxu0 %v6534_v2  ;;  %v6584_v61 = vpack.c.bf16 %v579_v28, %v567_v44  ;;  %v633_v32 = vand.u32 4294901760, %v9716_v50  ;;  %v645_v2 = vand.u32 4294901760, %v9717_v7  ;;  %v587_v12 = vand.u32 4294901760, %v586_v36  ;;  %v9718_v28 = vld [vmem:[#allocation210_spill] sm:$0xff] }
 0x108   : > { %v599_v39 = vand.u32 4294901760, %v598_v33  ;;  %v4541_v10 = vpack.c.bf16 %v597_v45, %v585_v40  ;;  %v593_v43 = vand.u32 4294901760, %v592_v1  ;;  %v605_v35 = vand.u32 4294901760, %v604_v0  ;;  %v9719_v40 = vld [vmem:[#allocation211_spill] sm:$0xff]  ;;  %v9722_v1 = vld [vmem:[#allocation216_spill] sm:$0xff] }
 0x109   : > { %v611_v47 = vand.u32 4294901760, %v610_v30  ;;  %v623_v46 = vand.u32 4294901760, %v622_v29  ;;  %v616_v13 = vsub.f32 %v9714_v62, %v615_v11  ;;  %v4347_v38 = vpack.c.bf16 %v581_v16, %v569_v41  ;;  %v9723_v16 = vld [vmem:[#allocation217_spill] sm:$0xff] }
 0x10a   : > { %4336 = vmatpush1.bf16.msra.mxu1 %v4335_v20  ;;  %4528 = vmatpush1.bf16.msra.mxu0 %v4527_v60  ;;  %v6589_v63 = vpack.c.bf16 %v603_v34, %v591_v5  ;;  %v628_v44 = vsub.f32 %v9715_v27, %v627_v8  ;;  %v639_v52 = vand.u32 4294901760, %v9718_v28  ;;  %v634_v60 = vsub.f32 %v9716_v50, %v633_v32  ;;  %v9721_v5 = vld [vmem:[#allocation214_spill] sm:$0xff]  ;;  %v9724_v27 = vld [vmem:[#allocation219_spill] sm:$0xff] }
 0x10b   : > { %4338 = vmatprep.subr.bf16.mxu1 %v4337_v56  ;;  %4530 = vmatprep.subr.bf16.mxu0 %v4529_v42  ;;  %v646_v20 = vsub.f32 %v9717_v7, %v645_v2  ;;  %v651_v45 = vand.u32 4294901760, %v9719_v40  ;;  %v9720_v56 = vld [vmem:[#allocation213_spill] sm:$0xff]  ;;  %v4349_v36 = vpack.c.bf16 %v599_v39, %v587_v12  ;;  %v6598_v33 = vpack.c.bf16 %v621_v37, %v609_v24  ;;  %v9725_v12 = vld [vmem:[#allocation220_spill] sm:$0xff] }
 0x10c   : > { %v657_v42 = vand.u32 4294901760, %v9720_v56  ;;  %v669_v34 = vand.u32 4294901760, %v9721_v5  ;;  %v663_v0 = vand.u32 4294901760, %v9722_v1  ;;  %v4351_v30 = vpack.c.bf16 %v605_v35, %v593_v43  ;;  %v9726_v35 = vld [vmem:[#allocation221_spill] sm:$0xff] }
 0x10d   : > { %v4353_v29 = vpack.c.bf16 %v623_v46, %v611_v47  ;;  %v617_v41 = vand.u32 4294901760, %v616_v13  ;;  %v675_v7 = vand.u32 4294901760, %v9723_v16  ;;  %v629_v50 = vand.u32 4294901760, %v628_v44  ;;  %v9727_v46 = vld [vmem:[#allocation223_spill] sm:$0xff] }
 0x10e   : > { %4340 = vmatpush1.bf16.msra.mxu1 %v4339_v23  ;;  %4532 = vmatpush1.bf16.msra.mxu0 %v6549_v26  ;;  %v640_v23 = vsub.f32 %v9718_v28, %v639_v52  ;;  %v681_v26 = vand.u32 4294901760, %v9724_v27  ;;  %v693_v39 = vand.u32 4294901760, %v9725_v12  ;;  %v635_v24 = vand.u32 4294901760, %v634_v60 }
 0x10f   : > { %4342 = vmatprep.subr.bf16.mxu1 %v4341_v48  ;;  %4534 = vmatprep.subr.bf16.mxu0 %v6555_v22  ;;  %v647_v37 = vand.u32 4294901760, %v646_v20  ;;  %v652_v62 = vsub.f32 %v9719_v40, %v651_v45  ;;  %v658_v48 = vsub.f32 %v9720_v56, %v657_v42  ;;  %v670_v22 = vsub.f32 %v9721_v5, %v669_v34  ;;  %v9728_v20 = vld [vmem:[#allocation225_spill] sm:$0xff]  ;;  %v9729_v56 = vld [vmem:[#allocation226_spill] sm:$0xff] }
 0x110   : > { %v664_v43 = vsub.f32 %v9722_v1, %v663_v0  ;;  %v687_v47 = vand.u32 4294901760, %v9726_v35  ;;  %v699_v13 = vand.u32 4294901760, %v9727_v46  ;;  %v4547_v44 = vpack.c.bf16 %v627_v8, %v615_v11 }
 0x111   : > { %v676_v60 = vsub.f32 %v9723_v16, %v675_v7  ;;  %v705_v40 = vand.u32 4294901760, %v9728_v20  ;;  %v4355_v28 = vpack.c.bf16 %v629_v50, %v617_v41  ;;  %v682_v5 = vsub.f32 %v9724_v27, %v681_v26  ;;  %v9730_v41 = vld [vmem:[#allocation228_spill] sm:$0xff] }
 0x112   : > { %4344 = vmatpush1.bf16.msra.mxu1 %v4343_v15  ;;  %4536 = vmatpush1.bf16.msra.mxu0 %v6570_v49  ;;  %v717_v15 = vand.u32 4294901760, %v9729_v56  ;;  %v4549_v49 = vpack.c.bf16 %v645_v2, %v633_v32  ;;  %v694_v1 = vsub.f32 %v9725_v12, %v693_v39  ;;  %v4357_v53 = vpack.c.bf16 %v647_v37, %v635_v24  ;;  %v9731_v37 = vld [vmem:[#allocation229_spill] sm:$0xff] }
 0x113   : > { %4346 = vmatprep.subr.bf16.mxu1 %v4345_v51  ;;  %4538 = vmatprep.subr.bf16.mxu0 %v6572_v19  ;;  %v641_v3 = vand.u32 4294901760, %v640_v23  ;;  %v653_v4 = vand.u32 4294901760, %v652_v62  ;;  %v659_v55 = vand.u32 4294901760, %v658_v48  ;;  %v671_v51 = vand.u32 4294901760, %v670_v22 }
 0x114   : > { %v665_v19 = vand.u32 4294901760, %v664_v43  ;;  %v688_v11 = vsub.f32 %v9726_v35, %v687_v47  ;;  %v700_v8 = vsub.f32 %v9727_v46, %v699_v13  ;;  %v677_v50 = vand.u32 4294901760, %v676_v60 }
 0x115   : > { %v706_v32 = vsub.f32 %v9728_v20, %v705_v40  ;;  %v718_v2 = vsub.f32 %v9729_v56, %v717_v15  ;;  %v711_v23 = vand.u32 4294901760, %v9730_v41  ;;  %v4551_v62 = vpack.c.bf16 %v651_v45, %v639_v52 }
 0x116   : > { %4348 = vmatpush1.bf16.msra.mxu1 %v4347_v38  ;;  %4540 = vmatpush1.bf16.msra.mxu0 %v6584_v61  ;;  %v683_v24 = vand.u32 4294901760, %v682_v5  ;;  %v695_v38 = vand.u32 4294901760, %v694_v1  ;;  %v723_v61 = vand.u32 4294901760, %v9731_v37  ;;  %v4359_v48 = vpack.c.bf16 %v653_v4, %v641_v3  ;;  %v9732_v1 = vld [vmem:[#allocation233_spill] sm:$0xff] }
 0x117   : > { %4350 = vmatprep.subr.bf16.mxu1 %v4349_v36  ;;  %4542 = vmatprep.subr.bf16.mxu0 %v4541_v10  ;;  %v4553_v22 = vpack.c.bf16 %v669_v34, %v657_v42  ;;  %v4555_v43 = vpack.c.bf16 %v675_v7, %v663_v0  ;;  %v6627_v35 = vpack.c.bf16 %v693_v39, %v681_v26  ;;  %v689_v36 = vand.u32 4294901760, %v688_v11  ;;  %v9734_v11 = vld [vmem:[#allocation162_spill] sm:$0xff]  ;;  %v9746_v26 = vld [vmem:[#allocation181_spill] sm:$0xff] }
 0x118   : > { %v4361_v10 = vpack.c.bf16 %v671_v51, %v659_v55  ;;  %v701_v60 = vand.u32 4294901760, %v700_v8  ;;  %v9020_v56 = vand.u32 4294901760, %v6399_v31  ;;  %v4363_v52 = vpack.c.bf16 %v677_v50, %v665_v19  ;;  %v9735_v50 = vld [vmem:[#allocation163_spill] sm:$0xff] }
 0x119   : > { %v707_v45 = vand.u32 4294901760, %v706_v32  ;;  %v719_v5 = vand.u32 4294901760, %v718_v2  ;;  %v6633_v4 = vsub.f32 %v9730_v41, %v711_v23  ;;  %v4365_v3 = vpack.c.bf16 %v695_v38, %v683_v24  ;;  %v9736_v32 = vld [vmem:[#allocation164_spill] sm:$0xff]  ;;  %v9737_v24 = vld [vmem:[#allocation165_spill] sm:$0xff]  ;;  %v9738_v38 = vld [vmem:[#allocation166_spill] sm:$0xff] }
 0x11a   : > { %4352 = vmatpush1.bf16.msra.mxu1 %v4351_v30  ;;  %4544 = vmatpush1.bf16.msra.mxu0 %v6589_v63  ;;  %v6636_v7 = vsub.f32 %v9731_v37, %v723_v61  ;;  %v9019_v63 = vand.u32 4294901760, %v6402_v9  ;;  %v9018_v55 = vand.u32 4294901760, %v6411_v59  ;;  %v6640_v42 = vpack.c.bf16 %v699_v13, %v687_v47  ;;  %v9733_v13 = vld [vmem:[#allocation236_spill] sm:$0xff] }
 0x11b   : > { %4354 = vmatprep.subr.bf16.mxu1 %v4353_v29  ;;  %4546 = vmatprep.subr.bf16.mxu0 %v6598_v33  ;;  %v6642_v34 = vpack.c.bf16 %v717_v15, %v705_v40  ;;  %v9017_v33 = vand.u32 4294901760, %v9732_v1  ;;  %v9016_v0 = vand.u32 4294901760, %v6432_v17  ;;  %v4367_v30 = vpack.c.bf16 %v701_v60, %v689_v36  ;;  %v9760_v36 = vld [vmem:[#allocation202_spill] sm:$0xff] }
 0x11c   : > { %v6649_v29 = vsub.f32 %v6399_v31, %v9020_v56  ;;  %v4369_v39 = vpack.c.bf16 %v719_v5, %v707_v45  ;;  %v713_v40 = vand.u32 4294901760, %v6633_v4  ;;  %v4563_v47 = vpack.c.bf16 %v723_v61, %v711_v23  ;;  %v9740_v4 = vld [vmem:[#allocation238_spill] sm:$0xff]  ;;  %v9758_v61 = vld [vmem:[#allocation199_spill] sm:$0xff] }
 0x11d   : > { %v9021_v15 = vand.u32 4294901760, %v9733_v13  ;;  %v736_v51 = vsub.f32 %v6411_v59, %v9018_v55  ;;  %v6670_v19 = vsub.f32 %v6432_v17, %v9016_v0  ;;  %v9761_v45 = vld [vmem:[#allocation239_spill] sm:$0xff]  ;;  %v9772_v56 = vld [vmem:[#allocation226_spill] sm:$0xff] }
 0x11e   : > { %4356 = vmatpush1.bf16.msra.mxu1 %v4355_v28  ;;  %4548 = vmatpush1.bf16.msra.mxu0 %v4547_v44  ;;  %v725_v28 = vand.u32 4294901760, %v6636_v7  ;;  %v742_v44 = vsub.f32 %v6402_v9, %v9019_v63  ;;  %v731_v23 = vand.u32 4294901760, %v6649_v29  ;;  %v9756_v29 = vld [vmem:[#allocation196_spill] sm:$0xff]  ;;  %v771_v0 = vand.u32 4294901760, %v9761_v45  ;;  %v9769_v7 = vld [vmem:[#allocation214_spill] sm:$0xff] }
 0x11f   : > { %4358 = vmatprep.subr.bf16.mxu1 %v4357_v53  ;;  %4550 = vmatprep.subr.bf16.mxu0 %v4549_v49  ;;  %v748_v49 = vsub.f32 %v9732_v1, %v9017_v33  ;;  %v766_v5 = vsub.f32 %v9733_v13, %v9021_v15  ;;  %v9748_v33 = vld [vmem:[#allocation184_spill] sm:$0xff]  ;;  %v9773_v53 = vand.u32 4294901760, %v6399_v31  ;;  %v755_v8 = vand.u32 4294901760, %v6670_v19  ;;  %v9780_v19 = vld [vmem:[#allocation157_spill] sm:$0xff] }
 0x120   : > { %v9765_v63 = vld [vmem:[#allocation208_spill] sm:$0xff]  ;;  %v743_v2 = vand.u32 4294901760, %v742_v44  ;;  %v737_v44 = vand.u32 4294901760, %v736_v51  ;;  %v4371_v15 = vpack.c.bf16 %v725_v28, %v713_v40  ;;  %v772_v60 = vsub.f32 %v9761_v45, %v771_v0 }
 0x121   : > { %v749_v55 = vand.u32 4294901760, %v748_v49  ;;  %v9775_v40 = vand.u32 4294901760, %v6411_v59  ;;  %v9776_v28 = vand.u32 4294901760, %v9732_v1 }
 0x122   : > { %4360 = vmatpush1.bf16.msra.mxu1 %v4359_v48  ;;  %4552 = vmatpush1.bf16.msra.mxu0 %v4551_v62  ;;  %v759_v48 = vand.u32 4294901760, %v9740_v4  ;;  %v9768_v62 = vld [vmem:[#allocation213_spill] sm:$0xff]  ;;  %v4373_v51 = vpack.c.bf16 %v743_v2, %v731_v23  ;;  %v9777_v2 = vand.u32 4294901760, %v6432_v17 }
 0x123   : > { %4362 = vmatprep.subr.bf16.mxu1 %v4361_v10  ;;  %4554 = vmatprep.subr.bf16.mxu0 %v4553_v22  ;;  %v9763_v10 = vld [vmem:[#allocation205_spill] sm:$0xff]  ;;  %v4567_v49 = vpack.c.bf16 %v9776_v28, %v9775_v40  ;;  %v9792_v40 = vpack.c.bf16 %v9734_v11, %v6121_v58  ;;  %v9795_v28 = vld [vmem:[#allocation159_spill] sm:$0xff]  ;;  %v9802_v11 = vld [vmem:[#allocation172_spill] sm:$0xff] }
 0x124   : > { %v9771_v22 = vld [vmem:[#allocation221_spill] sm:$0xff]  ;;  %v9801_v58 = vld [vmem:[#allocation167_spill] sm:$0xff] }
 0x126   : > { %4364 = vmatpush1.bf16.msra.mxu1 %v4363_v52  ;;  %4556 = vmatpush1.bf16.msra.mxu0 %v4555_v43  ;;  %v9770_v52 = vld [vmem:[#allocation216_spill] sm:$0xff]  ;;  %v9774_v43 = vand.u32 4294901760, %v6402_v9 }
 0x127   : > { %4366 = vmatprep.subr.bf16.mxu1 %v4365_v3  ;;  %4558 = vmatprep.subr.bf16.mxu0 %v6627_v35  ;;  %v760_v3 = vsub.f32 %v9740_v4, %v759_v48  ;;  %v773_v4 = vand.u32 4294901760, %v772_v60  ;;  %v9781_v60 = vld [vmem:[#allocation151_spill] sm:$0xff] }
 0x128   : > { %v4565_v35 = vpack.c.bf16 %v9774_v43, %v9773_v53  ;;  %v9778_v53 = vand.u32 4294901760, %v9733_v13  ;;  %v9783_v43 = vld [vmem:[#allocation160_spill] sm:$0xff] }
 0x12a   : > { %4368 = vmatpush1.bf16.msra.mxu1 %v4367_v30  ;;  %4560 = vmatpush1.bf16.msra.mxu0 %v6640_v42  ;;  %v767_v30 = vand.u32 4294901760, %v766_v5  ;;  %v4375_v42 = vpack.c.bf16 %v749_v55, %v737_v44  ;;  %v4569_v23 = vpack.c.bf16 %v9778_v53, %v9777_v2  ;;  %v9779_v55 = vld [vmem:[#allocation156_spill] sm:$0xff]  ;;  %v9788_v44 = vld [vmem:[#allocation231_spill] sm:$0xff] }
 0x12b   : > { %4370 = vmatprep.subr.bf16.mxu1 %v4369_v39  ;;  %4562 = vmatprep.subr.bf16.mxu0 %v6642_v34  ;;  %v761_v39 = vand.u32 4294901760, %v760_v3  ;;  %v4381_v5 = vpack.c.bf16 %v9780_v19, %v9779_v55  ;;  %v9803_v2 = vld [vmem:[#allocation171_spill] sm:$0xff]  ;;  %v9813_v19 = vld [vmem:[#allocation176_spill] sm:$0xff] }
 0x12c   : > { %v4377_v34 = vpack.c.bf16 %v767_v30, %v755_v8  ;;  %v9782_v8 = vld [vmem:[#allocation158_spill] sm:$0xff]  ;;  %v9790_v30 = vpack.c.bf16 %v6118_v57, %v6115_v54  ;;  %v9797_v54 = vld [vmem:[#allocation161_spill] sm:$0xff]  ;;  %v9804_v53 = vpack.c.bf16 %v9802_v11, %v9803_v2  ;;  %v9839_v2 = vld [vmem:[#allocation200_spill] sm:$0xff] }
 0x12d   : > { %v4385_v3 = vpack.c.bf16 %v9783_v43, %v9782_v8  ;;  %v9798_v57 = vld [vmem:[#allocation170_spill] sm:$0xff]  ;;  %v9816_v8 = vld [vmem:[#allocation179_spill] sm:$0xff] }
 0x12e   : > { %4372 = vmatpush1.bf16.msra.mxu1 %v4371_v15  ;;  %4564 = vmatpush1.bf16.msra.mxu0 %v4563_v47  ;;  %v4379_v15 = vpack.c.bf16 %v773_v4, %v761_v39  ;;  %v4571_v47 = vpack.c.bf16 %v771_v0, %v759_v48  ;;  %v9785_v0 = vpack.c.bf16 %v6094_v25, %v6091_v18  ;;  %v9786_v4 = vld [vmem:[#allocation152_spill] sm:$0xff]  ;;  %v9787_v48 = vld [vmem:[#allocation153_spill] sm:$0xff]  ;;  %v9793_v18 = vld [vmem:[#allocation155_spill] sm:$0xff] }
 0x12f   : > { %4374 = vmatprep.subr.bf16.mxu1 %v4373_v51  ;;  %4566 = vmatprep.subr.bf16.mxu0 %v4565_v35  ;;  %v9784_v35 = vld [vmem:[#allocation150_spill] sm:$0xff]  ;;  %v9789_v51 = vld [vmem:[#allocation149_spill] sm:$0xff]  ;;  %v9794_v25 = vpack.c.bf16 %v9736_v32, %v9735_v50  ;;  %v9799_v39 = vld [vmem:[#allocation168_spill] sm:$0xff] }
 0x130   : > { %v9805_v50 = vld [vmem:[#allocation169_spill] sm:$0xff]  ;;  %v9806_v32 = vld [vmem:[#allocation175_spill] sm:$0xff] }
 0x131   : > { %v9817_v43 = vld [vmem:[#allocation183_spill] sm:$0xff] }
 0x132   : > { %4376 = vmatpush1.bf16.msra.mxu1 %v4375_v42  ;;  %4568 = vmatpush1.bf16.msra.mxu0 %v4567_v49  ;;  %v9791_v42 = vld [vmem:[#allocation154_spill] sm:$0xff]  ;;  %v9796_v49 = vpack.c.bf16 %v9738_v38, %v9737_v24  ;;  %v9809_v24 = vld [vmem:[#allocation173_spill] sm:$0xff] }
 0x133   : > { %4378 = vmatprep.subr.bf16.mxu1 %v4377_v34  ;;  %4570 = vmatprep.subr.bf16.mxu0 %v4569_v23  ;;  %v9800_v34 = vpack.c.bf16 %v9798_v57, %v9799_v39  ;;  %v9807_v23 = vld [vmem:[#allocation174_spill] sm:$0xff] }
 0x134   : > { %v9810_v38 = vld [vmem:[#allocation178_spill] sm:$0xff] }
 0x135   : > { %v9834_v57 = vld [vmem:[#allocation198_spill] sm:$0xff] }
 0x136   : > { %4380 = vmatpush1.bf16.msra.mxu1 %v4379_v15  ;;  %4572 = vmatpush1.bf16.msra.mxu0 %v4571_v47  ;;  %v9808_v15 = vpack.c.bf16 %v9806_v32, %v9807_v23  ;;  %v9811_v47 = vld [vmem:[#allocation177_spill] sm:$0xff]  ;;  %v9835_v39 = vpack.c.bf16 %v9758_v61, %v9834_v57  ;;  %v9845_v61 = vld [vmem:[#allocation206_spill] sm:$0xff]  ;;  %v9846_v23 = vpack.c.bf16 %v9767_v21, %v9766_v14  ;;  %v9886_v57 = vld [vmem:[#allocation31_spill] sm:$0xff] }
 0x137   : > { %4382 = vmatprep.subr.bf16.mxu1 %v4381_v5  ;;  %4574 = vmatprep.subr.bf16.mxu0 %v9781_v60  ;;  %v9812_v55 = vpack.c.bf16 %v9810_v38, %v9811_v47  ;;  %v9814_v5 = vld [vmem:[#allocation180_spill] sm:$0xff]  ;;  %v9852_v38 = vpack.c.bf16 %v9725_v12, %v9724_v27  ;;  %v9853_v14 = vld [vmem:[#allocation218_spill] sm:$0xff]  ;;  %v9854_v21 = vpack.c.bf16 %v9727_v46, %v9771_v22  ;;  %v9859_v27 = vld [vmem:[#allocation227_spill] sm:$0xff] }
 0x138   : > { %v9815_v60 = vpack.c.bf16 %v9746_v26, %v9814_v5  ;;  %v9827_v26 = vld [vmem:[#allocation188_spill] sm:$0xff]  ;;  %v9860_v12 = vpack.c.bf16 %v6402_v9, %v6399_v31  ;;  %v9861_v46 = vld [vmem:[#allocation230_spill] sm:$0xff]  ;;  %v9867_v5 = vld [vmem:[#allocation23_spill] sm:$0xff]  ;;  %v9868_v31 = vpack.c.bf16 %v9733_v13, %v6432_v17 }
 0x139   : > { %778 = vmatmul.mubr.f32.vlgmr.msra.gmra.mrb[0].mxu1 %v9784_v35  ;;  %1387 = vmatmul.mubr.f32.vlgmr.msra.gmra.mrb[0].mxu0 %v9784_v35  ;;  %v9862_v22 = vld [vmem:[#allocation22_spill] sm:$0xff]  ;;  %v9877_v13 = vld [vmem:[#allocation25_spill] sm:$0xff] }
 0x13a   : > { %4384 = vmatpush1.bf16.msra.mxu1 %v9785_v0  ;;  %4576 = vmatpush1.bf16.msra.mxu0 %v9786_v4  ;;  %v9819_v0 = vld [vmem:[#allocation182_spill] sm:$0xff]  ;;  %v9820_v4 = vld [vmem:[#allocation187_spill] sm:$0xff]  ;;  %v9057_v47 = vand.u32 4294901760, %v9862_v22 }
 0x13b   : > { %4386 = vmatprep.subr.bf16.mxu1 %v4385_v3  ;;  %4578 = vmatprep.subr.bf16.mxu0 %v9787_v48  ;;  %v9818_v3 = vpack.c.bf16 %v9748_v33, %v9817_v43  ;;  %v9821_v48 = vld [vmem:[#allocation186_spill] sm:$0xff]  ;;  %v9831_v33 = vld [vmem:[#allocation191_spill] sm:$0xff]  ;;  %v9872_v43 = vld [vmem:[#allocation28_spill] sm:$0xff] }
 0x13c   : > { %978 = vmatprep.mubr.f32.mxu1 %v9788_v44  ;;  %1522 = vmatprep.mubr.f32.mxu0 %v9789_v51  ;;  %v9822_v44 = vpack.c.bf16 %v9820_v4, %v9821_v48  ;;  %v9823_v51 = vld [vmem:[#allocation185_spill] sm:$0xff]  ;;  %v9869_v9 = vld [vmem:[#allocation234_spill] sm:$0xff] }
 0x13d   : > { %v9875_v48 = vld [vmem:[#allocation237_spill] sm:$0xff] }
 0x13e   : > { %4388 = vmatpush1.bf16.msra.mxu1 %v9790_v30  ;;  %4580 = vmatpush1.bf16.msra.mxu0 %v9791_v42  ;;  %v9824_v30 = vld [vmem:[#allocation190_spill] sm:$0xff]  ;;  %v9825_v42 = vld [vmem:[#allocation189_spill] sm:$0xff] }
 0x13f   : > { %4390 = vmatprep.subr.bf16.mxu1 %v9792_v40  ;;  %4582 = vmatprep.subr.bf16.mxu0 %v9793_v18  ;;  %v9826_v40 = vpack.c.bf16 %v9824_v30, %v9825_v42  ;;  %v9828_v18 = vld [vmem:[#allocation193_spill] sm:$0xff]  ;;  %v9879_v30 = vld [vmem:[#allocation27_spill] sm:$0xff] }
 0x140   : > { %v9044_v42 = vand.u32 4294901760, %v9879_v30 }
 0x142   : > { %4392 = vmatpush1.bf16.msra.mxu1 %v9794_v25  ;;  %4584 = vmatpush1.bf16.msra.mxu0 %v9795_v28  ;;  %v9829_v25 = vld [vmem:[#allocation192_spill] sm:$0xff] }
 0x143   : > { %4394 = vmatprep.subr.bf16.mxu1 %v9796_v49  ;;  %4586 = vmatprep.subr.bf16.mxu0 %v9797_v54  ;;  %v9830_v28 = vpack.c.bf16 %v9828_v18, %v9829_v25  ;;  %v9832_v49 = vpack.c.bf16 %v9756_v29, %v9755_v6  ;;  %v9833_v54 = vld [vmem:[#allocation194_spill] sm:$0xff]  ;;  %v9842_v6 = vld [vmem:[#allocation203_spill] sm:$0xff]  ;;  %v9882_v18 = vld [vmem:[#allocation32_spill] sm:$0xff] }
 0x144   : > { %v9843_v29 = vld [vmem:[#allocation207_spill] sm:$0xff]  ;;  %v9042_v25 = vand.u32 4294901760, %v9882_v18 }
 0x145   : > { %v9844_v32 = vpack.c.bf16 %v9765_v63, %v9843_v29  ;;  %v9851_v63 = vld [vmem:[#allocation215_spill] sm:$0xff] }
 0x146   : > { %4396 = vmatpush1.bf16.msra.mxu1 %v9800_v34  ;;  %4588 = vmatpush1.bf16.msra.mxu0 %v9801_v58  ;;  %v9836_v34 = vld [vmem:[#allocation197_spill] sm:$0xff]  ;;  %v9892_v29 = vld [vmem:[#allocation35_spill] sm:$0xff] }
 0x147   : > { %4398 = vmatprep.subr.bf16.mxu1 %v9804_v53  ;;  %4590 = vmatprep.subr.bf16.mxu0 %v9805_v50  ;;  %v9837_v58 = vld [vmem:[#allocation201_spill] sm:$0xff]  ;;  %v9840_v53 = vld [vmem:[#allocation204_spill] sm:$0xff] }
 0x148   : > { %v9838_v11 = vpack.c.bf16 %v9760_v36, %v9837_v58  ;;  %v9841_v50 = vpack.c.bf16 %v9763_v10, %v9840_v53  ;;  %v9847_v36 = vld [vmem:[#allocation209_spill] sm:$0xff]  ;;  %v9849_v10 = vld [vmem:[#allocation212_spill] sm:$0xff] }
 0x14a   : > { %4400 = vmatpush1.bf16.msra.mxu1 %v9808_v15  ;;  %4592 = vmatpush1.bf16.msra.mxu0 %v9809_v24  ;;  %v9848_v15 = vpack.c.bf16 %v9769_v7, %v9768_v62  ;;  %v9850_v24 = vpack.c.bf16 %v9723_v16, %v9770_v52  ;;  %v9855_v62 = vld [vmem:[#allocation222_spill] sm:$0xff]  ;;  %v9856_v7 = vpack.c.bf16 %v9772_v56, %v9728_v20  ;;  %v9857_v16 = vld [vmem:[#allocation224_spill] sm:$0xff] }
 0x14b   : > { %4402 = vmatprep.subr.bf16.mxu1 %v9812_v55  ;;  %4594 = vmatprep.subr.bf16.mxu0 %v9813_v19  ;;  %v9858_v52 = vpack.c.bf16 %v9731_v37, %v9730_v41  ;;  %v9863_v55 = vld [vmem:[#allocation24_spill] sm:$0xff]  ;;  %v9864_v56 = vpack.c.bf16 %v9732_v1, %v6411_v59  ;;  %v9866_v41 = vld [vmem:[#allocation21_spill] sm:$0xff]  ;;  %v9871_v59 = vld [vmem:[#allocation26_spill] sm:$0xff] }
 0x14c   : > { %v9054_v19 = vand.u32 4294901760, %v9863_v55  ;;  %v9865_v20 = vld [vmem:[#allocation232_spill] sm:$0xff]  ;;  %v9053_v37 = vand.u32 4294901760, %v9866_v41  ;;  %v9049_v1 = vand.u32 4294901760, %v9871_v59 }
 0x14e   : > { %4404 = vmatpush1.bf16.msra.mxu1 %v9815_v60  ;;  %4596 = vmatpush1.bf16.msra.mxu0 %v9816_v8  ;;  %v9052_v60 = vand.u32 4294901760, %v9867_v5  ;;  %v6886_v8 = vpack.c.bf16 %v9054_v19, %v9057_v47 }
 0x14f   : > { %4406 = vmatprep.subr.bf16.mxu1 %v9818_v3  ;;  %4598 = vmatprep.subr.bf16.mxu0 %v9819_v0  ;;  %v9048_v3 = vand.u32 4294901760, %v9872_v43  ;;  %v9873_v0 = vld [vmem:[#allocation238_spill] sm:$0xff] }
 0x150   : > { %9870 = vst [vmem:[#allocation217_spill] sm:$0xff] %v6886_v8  ;;  %v9874_v4 = vpack.c.bf16 %v9761_v45, %v9873_v0  ;;  %v6898_v17 = vpack.c.bf16 %v9052_v60, %v9053_v37  ;;  %v9906_v0 = vld [vmem:[#allocation46_spill] sm:$0xff]  ;;  %v9925_v37 = vld [vmem:[#allocation60_spill] sm:$0xff] }
 0x151   : > { %v6907_v45 = vpack.c.bf16 %v9048_v3, %v9049_v1  ;;  %v9922_v3 = vld [vmem:[#allocation55_spill] sm:$0xff]  ;;  %v9080_v19 = vand.u32 4294901760, %v9925_v37 }
 0x152   : > { %4408 = vmatpush1.bf16.msra.mxu1 %v9822_v44  ;;  %4600 = vmatpush1.bf16.msra.mxu0 %v9823_v51  ;;  %9876 = vst [vmem:[#allocation219_spill] sm:$0xff] %v6898_v17  ;;  %v9878_v44 = vmov %v9877_v13  ;;  %v9047_v51 = vand.u32 4294901760, %v9877_v13  ;;  %v9070_v1 = vand.u32 4294901760, %v9922_v3 }
 0x153   : > { %4410 = vmatprep.subr.bf16.mxu1 %v9826_v40  ;;  %4602 = vmatprep.subr.bf16.mxu0 %v9827_v26  ;;  %9880 = vst [vmem:[#allocation220_spill] sm:$0xff] %v6907_v45  ;;  %v9881_v40 = vld [vmem:[#allocation30_spill] sm:$0xff] }
 0x154   : > { %v9043_v26 = vand.u32 4294901760, %v9881_v40 }
 0x156   : > { %4412 = vmatpush1.bf16.msra.mxu1 %v9830_v28  ;;  %4604 = vmatpush1.bf16.msra.mxu0 %v9831_v33  ;;  %v9883_v28 = vld [vmem:[#allocation235_spill] sm:$0xff]  ;;  %v6919_v33 = vpack.c.bf16 %v9044_v42, %v9047_v51 }
 0x157   : > { %4414 = vmatprep.subr.bf16.mxu1 %v9832_v49  ;;  %4606 = vmatprep.subr.bf16.mxu0 %v9833_v54  ;;  %v9885_v49 = vld [vmem:[#allocation29_spill] sm:$0xff] }
 0x158   : > { %9884 = vst [vmem:[#allocation223_spill] sm:$0xff] %v6919_v33  ;;  %v9039_v54 = vand.u32 4294901760, %v9885_v49 }
 0x15a   : > { %4416 = vmatpush1.bf16.msra.mxu1 %v9835_v39  ;;  %4608 = vmatpush1.bf16.msra.mxu0 %v9836_v34  ;;  %v9038_v39 = vand.u32 4294901760, %v9886_v57  ;;  %v9888_v34 = vld [vmem:[#allocation34_spill] sm:$0xff] }
 0x15b   : > { %4418 = vmatprep.subr.bf16.mxu1 %v9838_v11  ;;  %4610 = vmatprep.subr.bf16.mxu0 %v9839_v2  ;;  %v9037_v58 = vand.u32 4294901760, %v9888_v34  ;;  %v9889_v11 = vld [vmem:[#allocation36_spill] sm:$0xff] }
 0x15c   : > { %v9034_v2 = vand.u32 4294901760, %v9889_v11  ;;  %v6939_v53 = vpack.c.bf16 %v9038_v39, %v9039_v54  ;;  %v9916_v39 = vld [vmem:[#allocation51_spill] sm:$0xff] }
 0x15d   : > { %v9055_v54 = vand.u32 4294901760, %v9916_v39 }
 0x15e   : > { %4420 = vmatpush1.bf16.msra.mxu1 %v9841_v50  ;;  %4612 = vmatpush1.bf16.msra.mxu0 %v9842_v6  ;;  %9890 = vst [vmem:[#allocation228_spill] sm:$0xff] %v6939_v53  ;;  %v9891_v50 = vld [vmem:[#allocation33_spill] sm:$0xff] }
 0x15f   : > { %4422 = vmatprep.subr.bf16.mxu1 %v9844_v32  ;;  %4614 = vmatprep.subr.bf16.mxu0 %v9845_v61  ;;  %v9033_v6 = vand.u32 4294901760, %v9891_v50  ;;  %v9032_v32 = vand.u32 4294901760, %v9892_v29  ;;  %v6949_v61 = vpack.c.bf16 %v9034_v2, %v9037_v58 }
 0x161   : > { %9893 = vst [vmem:[#allocation229_spill] sm:$0xff] %v6949_v61 }
 0x162   : > { %4424 = vmatpush1.bf16.msra.mxu1 %v9846_v23  ;;  %4616 = vmatpush1.bf16.msra.mxu0 %v9847_v36  ;;  %v9894_v23 = vld [vmem:[#allocation38_spill] sm:$0xff] }
 0x163   : > { %4426 = vmatprep.subr.bf16.mxu1 %v9848_v15  ;;  %4618 = vmatprep.subr.bf16.mxu0 %v9849_v10  ;;  %v9029_v36 = vand.u32 4294901760, %v9894_v23  ;;  %v9895_v15 = vld [vmem:[#allocation40_spill] sm:$0xff] }
 0x164   : > { %v9028_v10 = vand.u32 4294901760, %v9895_v15 }
 0x166   : > { %4428 = vmatpush1.bf16.msra.mxu1 %v9850_v24  ;;  %4620 = vmatpush1.bf16.msra.mxu0 %v9851_v63  ;;  %v6959_v24 = vpack.c.bf16 %v9032_v32, %v9033_v6  ;;  %v9897_v63 = vld [vmem:[#allocation37_spill] sm:$0xff]  ;;  %v9913_v6 = vld [vmem:[#allocation52_spill] sm:$0xff] }
 0x167   : > { %4430 = vmatprep.subr.bf16.mxu1 %v9852_v38  ;;  %4622 = vmatprep.subr.bf16.mxu0 %v9853_v14  ;;  %v9027_v38 = vand.u32 4294901760, %v9897_v63  ;;  %v9898_v14 = vld [vmem:[#allocation39_spill] sm:$0xff]  ;;  %v9050_v2 = vand.u32 4294901760, %v9913_v6 }
 0x168   : > { %9896 = vst [vmem:[#allocation233_spill] sm:$0xff] %v6959_v24 }
 0x16a   : > { %4432 = vmatpush1.bf16.msra.mxu1 %v9854_v21  ;;  %4624 = vmatpush1.bf16.msra.mxu0 %v9855_v62  ;;  %v9026_v21 = vand.u32 4294901760, %v9898_v14  ;;  %v6969_v62 = vpack.c.bf16 %v9028_v10, %v9029_v36  ;;  %v9910_v10 = vld [vmem:[#allocation47_spill] sm:$0xff] }
 0x16b   : > { %4434 = vmatprep.subr.bf16.mxu1 %v9856_v7  ;;  %4626 = vmatprep.subr.bf16.mxu0 %v9857_v16  ;;  %v9900_v7 = vld [vmem:[#allocation42_spill] sm:$0xff]  ;;  %v9045_v36 = vand.u32 4294901760, %v9910_v10 }
 0x16c   : > { %9899 = vst [vmem:[#allocation236_spill] sm:$0xff] %v6969_v62  ;;  %v9031_v16 = vand.u32 4294901760, %v9900_v7 }
 0x16e   : > { %4436 = vmatpush1.bf16.msra.mxu1 %v9858_v52  ;;  %4628 = vmatpush1.bf16.msra.mxu0 %v9859_v27  ;;  %v9901_v52 = vld [vmem:[#allocation44_spill] sm:$0xff] }
 0x16f   : > { %4438 = vmatprep.subr.bf16.mxu1 %v9860_v12  ;;  %4630 = vmatprep.subr.bf16.mxu0 %v9861_v46  ;;  %v9030_v27 = vand.u32 4294901760, %v9901_v52  ;;  %v6979_v12 = vpack.c.bf16 %v9026_v21, %v9027_v38  ;;  %v9903_v46 = vld [vmem:[#allocation41_spill] sm:$0xff] }
 0x170   : > { %v9909_v21 = vld [vmem:[#allocation45_spill] sm:$0xff] }
 0x171   : > { %9902 = vst [vmem:[#allocation162_spill] sm:$0xff] %v6979_v12  ;;  %v9046_v38 = vand.u32 4294901760, %v9909_v21 }
 0x172   : > { %4440 = vmatpush1.bf16.msra.mxu1 %v9864_v56  ;;  %4632 = vmatpush1.bf16.msra.mxu0 %v9865_v20  ;;  %v9036_v56 = vand.u32 4294901760, %v9903_v46  ;;  %v9904_v20 = vld [vmem:[#allocation43_spill] sm:$0xff] }
 0x173   : > { %4442 = vmatprep.subr.bf16.mxu1 %v9868_v31  ;;  %4634 = vmatprep.subr.bf16.mxu0 %v9869_v9  ;;  %v9035_v31 = vand.u32 4294901760, %v9904_v20  ;;  %v6989_v9 = vpack.c.bf16 %v9030_v27, %v9031_v16  ;;  %v9912_v16 = vld [vmem:[#allocation50_spill] sm:$0xff] }
 0x174   : > { %v9051_v32 = vand.u32 4294901760, %v9912_v16 }
 0x175   : > { %9905 = vst [vmem:[#allocation163_spill] sm:$0xff] %v6989_v9 }
 0x176   : > { %4444 = vmatpush1.bf16.msra.mxu1 %v9874_v4  ;;  %4636 = vmatpush1.bf16.msra.mxu0 %v9875_v48  ;;  %v9041_v4 = vand.u32 4294901760, %v9906_v0  ;;  %v9907_v48 = vld [vmem:[#allocation48_spill] sm:$0xff] }
 0x177   : > { %4638 = vmatprep.subr.bf16.mxu1 %v6886_v8  ;;  %5022 = vmatprep.subr.bf16.mxu0 %v6886_v8  ;;  %v9040_v13 = vand.u32 4294901760, %v9907_v48  ;;  %v9957_v8 = vld [vmem:[#allocation78_spill] sm:$0xff] }
 0x179   : > { %981 = vmatmul.mubr.f32.vlgmr.msra.gmra.mrb[0].mxu1 %v9883_v28  ;;  %1524 = vmatmul.mubr.f32.vlgmr.msra.gmra.mrb[0].mxu0 %v9784_v35  ;;  %v6929_v35 = vpack.c.bf16 %v9042_v25, %v9043_v26  ;;  %v6999_v28 = vpack.c.bf16 %v9035_v31, %v9036_v56  ;;  %v7009_v27 = vpack.c.bf16 %v9040_v13, %v9041_v4  ;;  %v9915_v56 = vld [vmem:[#allocation49_spill] sm:$0xff]  ;;  %v9918_v4 = vld [vmem:[#allocation54_spill] sm:$0xff]  ;;  %v9919_v26 = vld [vmem:[#allocation56_spill] sm:$0xff] }
 0x17a   : > { %4640 = vmatpush1.bf16.msra.mxu1 %v6898_v17  ;;  %5024 = vmatpush1.bf16.msra.mxu0 %v6898_v17  ;;  %v7019_v31 = vpack.c.bf16 %v9045_v36, %v9046_v38  ;;  %v9056_v58 = vand.u32 4294901760, %v9915_v56  ;;  %v7029_v13 = vpack.c.bf16 %v9050_v2, %v9051_v32  ;;  %v9063_v25 = vand.u32 4294901760, %v9918_v4  ;;  %v9921_v38 = vld [vmem:[#allocation53_spill] sm:$0xff]  ;;  %v9924_v32 = vld [vmem:[#allocation58_spill] sm:$0xff] }
 0x17b   : > { %4642 = vmatprep.subr.bf16.mxu1 %v6907_v45  ;;  %9887 = vst [vmem:[#allocation225_spill] sm:$0xff] %v6929_v35  ;;  %5026 = vmatprep.subr.bf16.mxu0 %v6907_v45  ;;  %9908 = vst [vmem:[#allocation164_spill] sm:$0xff] %v6999_v28  ;;  %v9062_v42 = vand.u32 4294901760, %v9919_v26  ;;  %v9071_v51 = vand.u32 4294901760, %v9921_v38  ;;  %v9085_v60 = vand.u32 4294901760, %v9924_v32  ;;  %v9949_v17 = vld [vmem:[#allocation74_spill] sm:$0xff] }
 0x17c   : > { %9911 = vst [vmem:[#allocation165_spill] sm:$0xff] %v7009_v27  ;;  %9914 = vst [vmem:[#allocation166_spill] sm:$0xff] %v7019_v31  ;;  %v7039_v36 = vpack.c.bf16 %v9055_v54, %v9056_v58  ;;  %v9927_v58 = vld [vmem:[#allocation57_spill] sm:$0xff]  ;;  %v9976_v32 = vld [vmem:[#allocation83_spill] sm:$0xff] }
 0x17d   : > { %9917 = vst [vmem:[#allocation181_spill] sm:$0xff] %v7029_v13  ;;  %v7049_v2 = vpack.c.bf16 %v9062_v42, %v9063_v25  ;;  %v7059_v54 = vpack.c.bf16 %v9070_v1, %v9071_v51  ;;  %v9084_v47 = vand.u32 4294901760, %v9927_v58  ;;  %v7069_v42 = vpack.c.bf16 %v9080_v19, %v9085_v60  ;;  %v9930_v25 = vld [vmem:[#allocation62_spill] sm:$0xff]  ;;  %v9933_v51 = vld [vmem:[#allocation61_spill] sm:$0xff]  ;;  %v9972_v58 = vld [vmem:[#allocation84_spill] sm:$0xff] }
 0x17e   : > { %4644 = vmatpush1.bf16.msra.mxu1 %v6919_v33  ;;  %5028 = vmatpush1.bf16.msra.mxu0 %v6919_v33  ;;  %9920 = vst [vmem:[#allocation184_spill] sm:$0xff] %v7039_v36  ;;  %v9948_v33 = vld [vmem:[#allocation71_spill] sm:$0xff]  ;;  %v9145_v37 = vand.u32 4294901760, %v9972_v58 }
 0x17f   : > { %4646 = vmatprep.subr.bf16.mxu1 %v6929_v35  ;;  %5030 = vmatprep.subr.bf16.mxu0 %v6929_v35  ;;  %9923 = vst [vmem:[#allocation195_spill] sm:$0xff] %v7049_v2  ;;  %9926 = vst [vmem:[#allocation196_spill] sm:$0xff] %v7059_v54 }
 0x180   : > { %9929 = vst [vmem:[#allocation199_spill] sm:$0xff] %v7069_v42 }
 0x182   : > { %4648 = vmatpush1.bf16.msra.mxu1 %v6939_v53  ;;  %5032 = vmatpush1.bf16.msra.mxu0 %v6939_v53  ;;  %v9947_v53 = vld [vmem:[#allocation69_spill] sm:$0xff] }
 0x183   : > { %4650 = vmatprep.subr.bf16.mxu1 %v6949_v61  ;;  %5034 = vmatprep.subr.bf16.mxu0 %v6949_v61  ;;  %v9954_v45 = vand.u32 4294901760, %v9947_v53 }
 0x186   : > { %4652 = vmatpush1.bf16.msra.mxu1 %v6959_v24  ;;  %5036 = vmatpush1.bf16.msra.mxu0 %v6959_v24 }
 0x187   : > { %4654 = vmatprep.subr.bf16.mxu1 %v6969_v62  ;;  %5038 = vmatprep.subr.bf16.mxu0 %v6969_v62  ;;  %v9952_v62 = vld [vmem:[#allocation75_spill] sm:$0xff] }
 0x18a   : > { %4656 = vmatpush1.bf16.msra.mxu1 %v6979_v12  ;;  %5040 = vmatpush1.bf16.msra.mxu0 %v6979_v12  ;;  %v9934_v12 = vld [vmem:[#allocation63_spill] sm:$0xff] }
 0x18b   : > { %4658 = vmatprep.subr.bf16.mxu1 %v6989_v9  ;;  %5042 = vmatprep.subr.bf16.mxu0 %v6989_v9  ;;  %v9094_v24 = vand.u32 4294901760, %v9934_v12  ;;  %v9938_v12 = vld [vmem:[#allocation66_spill] sm:$0xff] }
 0x18e   : > { %4660 = vmatpush1.bf16.msra.mxu1 %v6999_v28  ;;  %5044 = vmatpush1.bf16.msra.mxu0 %v6999_v28  ;;  %v9931_v28 = vld [vmem:[#allocation64_spill] sm:$0xff] }
 0x18f   : > { %4662 = vmatprep.subr.bf16.mxu1 %v7009_v27  ;;  %5046 = vmatprep.subr.bf16.mxu0 %v7009_v27  ;;  %v9082_v9 = vand.u32 4294901760, %v9931_v28 }
 0x192   : > { %4664 = vmatpush1.bf16.msra.mxu1 %v7019_v31  ;;  %5048 = vmatpush1.bf16.msra.mxu0 %v7019_v31  ;;  %v9928_v31 = vld [vmem:[#allocation59_spill] sm:$0xff] }
 0x193   : > { %4666 = vmatprep.subr.bf16.mxu1 %v7029_v13  ;;  %5050 = vmatprep.subr.bf16.mxu0 %v7029_v13  ;;  %v9081_v27 = vand.u32 4294901760, %v9928_v31  ;;  %v9083_v13 = vand.u32 4294901760, %v9930_v25  ;;  %v9958_v25 = vld [vmem:[#allocation80_spill] sm:$0xff] }
 0x195   : > { %v7079_v1 = vpack.c.bf16 %v9081_v27, %v9084_v47  ;;  %v7089_v19 = vpack.c.bf16 %v9082_v9, %v9083_v13  ;;  %v9115_v13 = vand.u32 4294901760, %v9938_v12  ;;  %v9940_v47 = vld [vmem:[#allocation68_spill] sm:$0xff] }
 0x196   : > { %4668 = vmatpush1.bf16.msra.mxu1 %v7039_v36  ;;  %5052 = vmatpush1.bf16.msra.mxu0 %v7039_v36  ;;  %v9095_v36 = vand.u32 4294901760, %v9933_v51  ;;  %v9114_v60 = vand.u32 4294901760, %v9940_v47  ;;  %v9951_v47 = vld [vmem:[#allocation73_spill] sm:$0xff]  ;;  %v9959_v51 = vand.u32 4294901760, %v9949_v17 }
 0x197   : > { %4670 = vmatprep.subr.bf16.mxu1 %v7049_v2  ;;  %5054 = vmatprep.subr.bf16.mxu0 %v7049_v2  ;;  %9932 = vst [vmem:[#allocation202_spill] sm:$0xff] %v7079_v1  ;;  %9936 = vst [vmem:[#allocation239_spill] sm:$0xff] %v7089_v19  ;;  %v9942_v2 = vld [vmem:[#allocation67_spill] sm:$0xff] }
 0x198   : > { %v7097_v27 = vpack.c.bf16 %v9094_v24, %v9095_v36  ;;  %v1670_v61 = vand.u32 4294901760, %v9942_v2  ;;  %v7112_v24 = vpack.c.bf16 %v9114_v60, %v9115_v13  ;;  %v9950_v60 = vld [vmem:[#allocation76_spill] sm:$0xff]  ;;  %v9966_v13 = vld [vmem:[#allocation79_spill] sm:$0xff] }
 0x199   : > { %v9143_v17 = vand.u32 4294901760, %v9966_v13 }
 0x19a   : > { %4672 = vmatpush1.bf16.msra.mxu1 %v7059_v54  ;;  %5056 = vmatpush1.bf16.msra.mxu0 %v7059_v54  ;;  %9937 = vst [vmem:[#allocation205_spill] sm:$0xff] %v7097_v27  ;;  %9943 = vst [vmem:[#allocation208_spill] sm:$0xff] %v7112_v24 }
 0x19b   : > { %4674 = vmatprep.subr.bf16.mxu1 %v7069_v42  ;;  %5058 = vmatprep.subr.bf16.mxu0 %v7069_v42  ;;  %v9941_v42 = vld [vmem:[#allocation65_spill] sm:$0xff] }
 0x19c   : > { %v1666_v54 = vand.u32 4294901760, %v9941_v42 }
 0x19e   : > { %4676 = vmatpush1.bf16.msra.mxu1 %v7079_v1  ;;  %5060 = vmatpush1.bf16.msra.mxu0 %v7079_v1  ;;  %v7114_v36 = vpack.c.bf16 %v1670_v61, %v1666_v54  ;;  %v9946_v1 = vld [vmem:[#allocation72_spill] sm:$0xff] }
 0x19f   : > { %4678 = vmatprep.subr.bf16.mxu1 %v7089_v19  ;;  %5062 = vmatprep.subr.bf16.mxu0 %v7089_v19  ;;  %v9945_v19 = vld [vmem:[#allocation70_spill] sm:$0xff]  ;;  %v9127_v12 = vand.u32 4294901760, %v9946_v1  ;;  %v9967_v1 = vmov %v9966_v13 }
 0x1a0   : > { %9944 = vst [vmem:[#allocation210_spill] sm:$0xff] %v7114_v36 }
 0x1a2   : > { %4680 = vmatpush1.bf16.msra.mxu1 %v7097_v27  ;;  %5064 = vmatpush1.bf16.msra.mxu0 %v7097_v27  ;;  %v9128_v27 = vand.u32 4294901760, %v9945_v19 }
 0x1a3   : > { %4682 = vmatprep.subr.bf16.mxu1 %v7112_v24  ;;  %5066 = vmatprep.subr.bf16.mxu0 %v7112_v24  ;;  %v9955_v24 = vand.u32 4294901760, %v9948_v33 }
 0x1a4   : > { %v7132_v35 = vpack.c.bf16 %v9127_v12, %v9128_v27  ;;  %v9962_v12 = vand.u32 4294901760, %v9951_v47  ;;  %v9965_v27 = vld [vmem:[#allocation77_spill] sm:$0xff] }
 0x1a5   : > { %v7138_v28 = vpack.c.bf16 %v9955_v24, %v9954_v45  ;;  %v9963_v45 = vand.u32 4294901760, %v9952_v62  ;;  %v9144_v9 = vand.u32 4294901760, %v9965_v27 }
 0x1a6   : > { %4684 = vmatpush1.bf16.msra.mxu1 %v7114_v36  ;;  %5068 = vmatpush1.bf16.msra.mxu0 %v7114_v36  ;;  %9953 = vst [vmem:[#allocation211_spill] sm:$0xff] %v7132_v35  ;;  %v9960_v36 = vand.u32 4294901760, %v9950_v60  ;;  %v9971_v60 = vld [vmem:[#allocation82_spill] sm:$0xff] }
 0x1a7   : > { %9956 = vst [vmem:[#allocation213_spill] sm:$0xff] %v7138_v28  ;;  %4686 = vmatprep.subr.bf16.mxu1 %v7132_v35  ;;  %5070 = vmatprep.subr.bf16.mxu0 %v7132_v35  ;;  %v7155_v24 = vpack.c.bf16 %v9963_v45, %v9962_v12  ;;  %v9146_v19 = vand.u32 4294901760, %v9971_v60  ;;  %v7175_v13 = vpack.c.bf16 %v9143_v17, %v9144_v9  ;;  %v9974_v12 = vld [vmem:[#allocation81_spill] sm:$0xff]  ;;  %v9980_v17 = vand.u32 4294901760, %v9863_v55 }
 0x1a8   : > { %v7146_v31 = vpack.c.bf16 %v9960_v36, %v9959_v51  ;;  %v9968_v51 = vand.u32 4294901760, %v9957_v8  ;;  %v9969_v36 = vand.u32 4294901760, %v9958_v25  ;;  %v9975_v45 = vmov %v9974_v12 }
 0x1a9   : > { %9964 = vst [vmem:[#allocation216_spill] sm:$0xff] %v7155_v24  ;;  %9973 = vst [vmem:[#allocation226_spill] sm:$0xff] %v7175_v13 }
 0x1aa   : > { %9961 = vst [vmem:[#allocation214_spill] sm:$0xff] %v7146_v31  ;;  %4688 = vmatpush1.bf16.msra.mxu1 %v7138_v28  ;;  %5072 = vmatpush1.bf16.msra.mxu0 %v7138_v28  ;;  %v7165_v35 = vpack.c.bf16 %v9969_v36, %v9968_v51  ;;  %v9149_v28 = vand.u32 4294901760, %v9974_v12  ;;  %v7185_v51 = vpack.c.bf16 %v9145_v37, %v9146_v19  ;;  %v9978_v36 = vand.u32 4294901760, %v9862_v22 }
 0x1ab   : > { %4690 = vmatprep.subr.bf16.mxu1 %v7146_v31  ;;  %5074 = vmatprep.subr.bf16.mxu0 %v7146_v31  ;;  %v7195_v12 = vsub.f32 %v9863_v55, %v9980_v17  ;;  %v9982_v37 = vand.u32 4294901760, %v9976_v32 }
 0x1ac   : > { %9970 = vst [vmem:[#allocation221_spill] sm:$0xff] %v7165_v35  ;;  %9977 = vst [vmem:[#allocation156_spill] sm:$0xff] %v7185_v51  ;;  %v7190_v31 = vsub.f32 %v9862_v22, %v9978_v36 }
 0x1ad   : > { %9981 = vst [vmem:[#allocation151_spill] sm:$0xff] %v7195_v12  ;;  %v9151_v3 = vand.u32 4294901760, %v7195_v12  ;;  %v7205_v19 = vpack.c.bf16 %v9982_v37, %v9149_v28  ;;  %v7219_v28 = vsub.f32 %v9941_v42, %v1666_v54  ;;  %v9989_v42 = vand.u32 4294901760, %v9867_v5 }
 0x1ae   : > { %4692 = vmatpush1.bf16.msra.mxu1 %v7155_v24  ;;  %5076 = vmatpush1.bf16.msra.mxu0 %v7155_v24  ;;  %9979 = vst [vmem:[#allocation157_spill] sm:$0xff] %v7190_v31  ;;  %v9150_v9 = vand.u32 4294901760, %v7190_v31 }
 0x1af   : > { %4694 = vmatprep.subr.bf16.mxu1 %v7165_v35  ;;  %5078 = vmatprep.subr.bf16.mxu0 %v7165_v35  ;;  %9983 = vst [vmem:[#allocation158_spill] sm:$0xff] %v7205_v19  ;;  %v1736_v36 = vsub.f32 %v7195_v12, %v9151_v3  ;;  %9984 = vst [vmem:[#allocation160_spill] sm:$0xff] %v7219_v28  ;;  %v9153_v3 = vand.u32 4294901760, %v7219_v28  ;;  %v10001_v35 = vld [vmem:[#allocation19_spill] sm:$0xff] }
 0x1b0   : > { %v1724_v17 = vsub.f32 %v7190_v31, %v9150_v9  ;;  %v7222_v9 = vsub.f32 %v9942_v2, %v1670_v61  ;;  %v245_v61 = vld [vmem:[%s7237_s18 + $0x8] sm:$0xff]  ;;  %v9987_v2 = vand.u32 4294901760, %v9866_v41 }
 0x1b1   : > { %v1737_v55 = vand.u32 4294901760, %v1736_v36  ;;  %v1994_v36 = vsub.f32 %v7219_v28, %v9153_v3 }
 0x1b2   : > { %4696 = vmatpush1.bf16.msra.mxu1 %v7175_v13  ;;  %5080 = vmatpush1.bf16.msra.mxu0 %v7175_v13  ;;  %v1725_v22 = vand.u32 4294901760, %v1724_v17  ;;  %9985 = vst [vmem:[#allocation150_spill] sm:$0xff] %v7222_v9  ;;  %v9155_v17 = vand.u32 4294901760, %v7222_v9  ;;  %v7243_v3 = vsub.f32 %v9866_v41, %v9987_v2  ;;  %v9995_v2 = vand.u32 4294901760, %v9878_v44 }
 0x1b3   : > { %4698 = vmatprep.subr.bf16.mxu1 %v7185_v51  ;;  %5082 = vmatprep.subr.bf16.mxu0 %v7185_v51  ;;  %v9999_v51 = vld [vmem:[#allocation20_spill] sm:$0xff] }
 0x1b4   : > { %v4701_v37 = vpack.c.bf16 %v1737_v55, %v1725_v22  ;;  %v2006_v22 = vsub.f32 %v7222_v9, %v9155_v17  ;;  %v1995_v55 = vand.u32 4294901760, %v1994_v36  ;;  %9988 = vst [vmem:[#allocation153_spill] sm:$0xff] %v7243_v3  ;;  %v7248_v17 = vsub.f32 %v9867_v5, %v9989_v42 }
 0x1b5   : > { %v9991_v36 = vand.u32 4294901760, %v9871_v59  ;;  %v7263_v41 = vsub.f32 %v9878_v44, %v9995_v2  ;;  %v9997_v42 = vand.u32 4294901760, %v9879_v30  ;;  %v7272_v13 = vadd.f32 %v245_v61, %v9999_v51 }
 0x1b6   : > { %4700 = vmatpush1.bf16.msra.mxu1 %v7205_v19  ;;  %5084 = vmatpush1.bf16.msra.mxu0 %v7205_v19  ;;  %9990 = vst [vmem:[#allocation231_spill] sm:$0xff] %v7248_v17  ;;  %v244_v19 = vld [vmem:[%s7237_s18] sm:$0xff]  ;;  %v10002_v51 = vand.u32 4294901760, %v9881_v40 }
 0x1b7   : > { %4702 = vmatprep.subr.bf16.mxu1 %v4701_v37  ;;  %5086 = vmatprep.subr.bf16.mxu0 %v4701_v37  ;;  %v2007_v37 = vand.u32 4294901760, %v2006_v22  ;;  %v7253_v22 = vsub.f32 %v9871_v59, %v9991_v36  ;;  %9996 = vst [vmem:[#allocation155_spill] sm:$0xff] %v7263_v41  ;;  %v7268_v5 = vsub.f32 %v9879_v30, %v9997_v42  ;;  %v7275_v36 = vstv %s5775_s16 }
 0x1b8   : > { %10000 = vst [vmem:[#allocation161_spill] sm:$0xff] %v7275_v36  ;;  %v9178_v59 = vand.u32 4294901760, %v7243_v3  ;;  %v7283_v42 = vadd.f32 %v244_v19, %v10001_v35  ;;  %v7289_v61 = vsub.f32 %v9881_v40, %v10002_v51  ;;  %v10004_v35 = vand.u32 4294901760, %v9882_v18 }
 0x1b9   : > { %v7232_v54 = vpack.c.bf16 %v2007_v37, %v1995_v55  ;;  %9992 = vst [vmem:[#allocation149_spill] sm:$0xff] %v7253_v22  ;;  %v9993_v55 = vand.u32 4294901760, %v9872_v43  ;;  %9998 = vst [vmem:[#allocation159_spill] sm:$0xff] %v7268_v5  ;;  %v10006_v51 = vand.u32 4294901760, %v7248_v17  ;;  %v10007_v40 = vand.u32 4294901760, %v7253_v22 }
 0x1ba   : > { %10003 = vst [vmem:[#allocation170_spill] sm:$0xff] %v7289_v61  ;;  %v1548_v44 = vadd.f32 %v7275_v36, %v7283_v42  ;;  %v1730_v19 = vsub.f32 %v7243_v3, %v9178_v59  ;;  %v7305_v30 = vsub.f32 %v9882_v18, %v10004_v35  ;;  %v7320_v3 = vstv %s5777_s17 }
 0x1bb   : > { %9986 = vst [vmem:[#allocation152_spill] sm:$0xff] %v7232_v54  ;;  %v7258_v37 = vsub.f32 %v9872_v43, %v9993_v55  ;;  %v1538_v55 = vsub.f32 %v7272_v13, %v7275_v36  ;;  %v1549_v43 = vadd.f32 %v7275_v36, %v7272_v13  ;;  %v1742_v2 = vsub.f32 %v7248_v17, %v10006_v51 }
 0x1bc   : > { %10005 = vst [vmem:[#allocation168_spill] sm:$0xff] %v7305_v30  ;;  %v1748_v24 = vsub.f32 %v7253_v22, %v10007_v40  ;;  %v10009_v54 = vand.u32 4294901760, %v7263_v41  ;;  %10010 = vst [vmem:[#allocation167_spill] sm:$0xff] %v7320_v3  ;;  %v10011_v35 = vand.u32 4294901760, %v7268_v5  ;;  %v10012_v17 = vand.u32 4294901760, %v9885_v49 }
 0x1bd   : > { %9994 = vst [vmem:[#allocation154_spill] sm:$0xff] %v7258_v37  ;;  %v10008_v12 = vand.u32 4294901760, %v7258_v37  ;;  %v7331_v22 = vstv %s1532_s20  ;;  %v7347_v51 = vadd.f32 %v1548_v44, %v7320_v3  ;;  %v10015_v56 = vand.u32 4294901760, %v7289_v61 }
 0x1be   : > { %v1754_v59 = vsub.f32 %v7263_v41, %v10009_v54  ;;  %v1766_v18 = vsub.f32 %v7268_v5, %v10011_v35  ;;  %v7329_v40 = vsub.f32 %v9885_v49, %v10012_v17  ;;  %10013 = vst [vmem:[#allocation172_spill] sm:$0xff] %v7331_v22  ;;  %v1537_v54 = vsub.f32 %v7283_v42, %v7275_v36 }
 0x1bf   : > { %v1760_v31 = vsub.f32 %v7258_v37, %v10008_v12  ;;  %v7334_v12 = vsub.f32 %v1538_v55, %v7320_v3  ;;  %v10014_v41 = vand.u32 4294901760, %v9886_v57  ;;  %v7344_v35 = vadd.f32 %v1549_v43, %v7320_v3 }
 0x1c0   : > { %v1731_v17 = vand.u32 4294901760, %v1730_v19  ;;  %v9203_v49 = vand.u32 4294901760, %v7305_v30  ;;  %v1743_v5 = vand.u32 4294901760, %v1742_v2  ;;  %v1749_v38 = vand.u32 4294901760, %v1748_v24 }
 0x1c1   : > { %v7341_v37 = vsub.f32 %v9886_v57, %v10014_v41  ;;  %v1761_v26 = vand.u32 4294901760, %v1760_v31  ;;  %v1755_v4 = vand.u32 4294901760, %v1754_v59  ;;  %v1767_v39 = vand.u32 4294901760, %v1766_v18 }
 0x1c2   : > { %v7353_v6 = vsub.f32 %v7289_v61, %v10015_v56  ;;  %v10016_v43 = vand.u32 4294901760, %v9888_v34  ;;  %v1541_v19 = vadd.f32 %v7320_v3, %v1538_v55  ;;  %v1540_v2 = vadd.f32 %v7320_v3, %v1537_v54 }
 0x1c3   : > { %v1544_v31 = vsub.f32 %v1537_v54, %v7320_v3  ;;  %v1563_v18 = vmax.f32 %v7334_v12, 0.0  ;;  %vm1534_vm0 = vcmp.ge.f32.partialorder %v7283_v42, %v7331_v22  ;;  %v1552_v56 = vmin.f32 %v7347_v51, 0.0 }
 0x1c4   : > { %v7359_v44 = vsub.f32 %v9888_v34, %v10016_v43  ;;  %v7372_v24 = vsub.f32 %v7305_v30, %v9203_v49  ;;  %v10018_v55 = vand.u32 4294901760, %v9889_v11  ;;  %vm1535_vm1 = vcmp.ge.f32.partialorder %v7272_v13, %v7331_v22 }
 0x1c5   : > { %v1553_v54 = vmin.f32 %v7344_v35, 0.0  ;;  %v1562_v59 = vmax.f32 %v1544_v31, 0.0  ;;  %v7382_v41 = vpack.c.bf16 %v1743_v5, %v1731_v17  ;;  %v7384_v34 = vpack.c.bf16 %v1761_v26, %v1749_v38 }
 0x1c6   : > { %10017 = vst [vmem:[#allocation171_spill] sm:$0xff] %v7359_v44  ;;  %v7377_v43 = vsub.f32 %v9889_v11, %v10018_v55  ;;  %v7386_v61 = vpack.c.bf16 %v1767_v39, %v1755_v4  ;;  %v10022_v30 = vand.u32 4294901760, %v7329_v40  ;;  %v10024_v26 = vand.u32 4294901760, %v7341_v37 }
 0x1c7   : > { %10019 = vst [vmem:[#allocation169_spill] sm:$0xff] %v7382_v41  ;;  %10020 = vst [vmem:[#allocation175_spill] sm:$0xff] %v7384_v34  ;;  %v10025_v39 = vand.u32 4294901760, %v9891_v50  ;;  %v10028_v49 = vand.u32 4294901760, %v9892_v29  ;;  %v10075_v22 = vand.u32 4294901760, %v9901_v52 }
 0x1c8   : > { %10021 = vst [vmem:[#allocation174_spill] sm:$0xff] %v7386_v61  ;;  %v7392_v55 = vsub.f32 %v7329_v40, %v10022_v30  ;;  %v7400_v38 = vsub.f32 %v7341_v37, %v10024_v26  ;;  %v7409_v30 = vpack.c.bf16 %v7222_v9, %v7219_v28  ;;  %v10034_v28 = vand.u32 4294901760, %v9951_v47 }
 0x1c9   : > { %v7405_v4 = vsub.f32 %v9891_v50, %v10025_v39  ;;  %v7418_v26 = vsub.f32 %v9892_v29, %v10028_v49  ;;  %v10029_v50 = vand.u32 4294901760, %v9947_v53 }
 0x1ca   : > { %10026 = vst [vmem:[#allocation178_spill] sm:$0xff] %v7409_v30 }
 0x1cb   : > { %v7426_v9 = vsub.f32 %v9947_v53, %v10029_v50  ;;  %v7444_v50 = vsub.f32 %v9951_v47, %v10034_v28 }
 0x1cd   : > { %10030 = vst [vmem:[#allocation176_spill] sm:$0xff] %v7426_v9 }
 0x24c   : > { %v982_v51 = vpop.f32.mrb[0].mxu1  ;;  %v1525_v57 = vpop.f32.mrb[0].mxu0 }
 0x24d   : > { %v7395_v16 = vadd.f32 %v1525_v57, %v982_v51  ;;  %v984_v35 = vpop.f32.mrb[1].mxu1  ;;  %v1527_v5 = vpop.f32.mrb[1].mxu0  ;;  %v10033_v51 = vand.u32 4294901760, %v7359_v44 }
 0x24e   : > { %v7411_v17 = vadd.f32 %v1527_v5, %v984_v35  ;;  %v10031_v35 = vand.u32 4294901760, %v9948_v33 }
 0x24f   : > { %10023 = vst [vmem:[#allocation173_spill] sm:$0xff] %v7395_v16  ;;  %v1542_v11 = vmin.f32 %v1540_v2, %v7395_v16  ;;  %v1556_v39 = vsub.f32 %v7395_v16, %v7275_v36  ;;  %v7439_v29 = vsub.f32 %v7359_v44, %v10033_v51  ;;  %vm1572_vm6 = vcmp.ge.f32.partialorder %v7395_v16, 0.0 }
 0x250   : > { %10027 = vst [vmem:[#allocation177_spill] sm:$0xff] %v7411_v17  ;;  %v7431_v5 = vsub.f32 %v9948_v33, %v10031_v35  ;;  %v1543_v57 = vmin.f32 %v1541_v19, %v7411_v17  ;;  %v1557_v49 = vsub.f32 %v7411_v17, %v7275_v36  ;;  %vm1573_vm7 = vcmp.ge.f32.partialorder %v7411_v17, 0.0 }
 0x251   : > { %v1546_v53 = vmax.f32 %v1542_v11, %v1544_v31  ;;  %v7447_v30 = vadd.f32 %v1556_v39, %v7320_v3  ;;  %v7450_v35 = vsub.f32 %v1556_v39, %v7320_v3  ;;  %v10040_v11 = vand.u32 4294901760, %v9952_v62 }
 0x252   : > { %10032 = vst [vmem:[#allocation180_spill] sm:$0xff] %v7431_v5  ;;  %v7454_v33 = vpack.c.bf16 %v7431_v5, %v7426_v9  ;;  %v1547_v36 = vmax.f32 %v1543_v57, %v7334_v12  ;;  %v7458_v51 = vadd.f32 %v1557_v49, %v7320_v3  ;;  %v7461_v44 = vsub.f32 %v1557_v49, %v7320_v3 }
 0x253   : > { %10035 = vst [vmem:[#allocation179_spill] sm:$0xff] %v7447_v30  ;;  %10036 = vst [vmem:[#allocation183_spill] sm:$0xff] %v7450_v35  ;;  %v7466_v28 = vsub.f32 %v9952_v62, %v10040_v11  ;;  %vm1560_vm2 = vcmp.ge.f32.partialorder %v7283_v42, %v7447_v30  ;;  %vm1566_vm3 = vcmp.ge.f32.partialorder %v7283_v42, %v7450_v35  ;;  %v10041_v31 = vand.u32 4294901760, %v9957_v8 }
 0x254   : > { %10037 = vst [vmem:[#allocation182_spill] sm:$0xff] %v7454_v33  ;;  %10038 = vst [vmem:[#allocation187_spill] sm:$0xff] %v7458_v51  ;;  %v10043_v57 = vand.u32 4294901760, %v9958_v25  ;;  %vm1561_vm4 = vcmp.ge.f32.partialorder %v7272_v13, %v7458_v51  ;;  %vm1567_vm5 = vcmp.ge.f32.partialorder %v7272_v13, %v7461_v44  ;;  %v1568_v49 = vsel %vm1566_vm3, %v7395_v16, %v1540_v2  ;;  %v10140_v33 = vld [vmem:[#allocation59_spill] sm:$0xff] }
 0x255   : > { %10039 = vst [vmem:[#allocation186_spill] sm:$0xff] %v7461_v44  ;;  %v7475_v12 = vsub.f32 %v9957_v8, %v10041_v31  ;;  %v1569_v11 = vsel %vm1567_vm5, %v7411_v17, %v1541_v19  ;;  %v1554_v31 = vsel %vm1534_vm0, %v1546_v53, %v1552_v56  ;;  %v1570_v8 = vsel %vm1560_vm2, %v1562_v59, %v1568_v49 }
 0x256   : > { %v7480_v39 = vsub.f32 %v9958_v25, %v10043_v57  ;;  %v7494_v57 = vpack.c.bf16 %v7466_v28, %v7444_v50  ;;  %v1555_v25 = vsel %vm1535_vm1, %v1547_v36, %v1553_v54  ;;  %v1571_v47 = vsel %vm1561_vm4, %v1563_v18, %v1569_v11 }
 0x257   : > { %10042 = vst [vmem:[#allocation185_spill] sm:$0xff] %v7475_v12  ;;  %v1574_v2 = vsel %vm1572_vm6, %v1554_v31, %v1570_v8  ;;  %v1575_v19 = vsel %vm1573_vm7, %v1555_v25, %v1571_v47  ;;  %v10047_v53 = vand.u32 4294901760, %v9965_v27  ;;  %v10049_v56 = vand.u32 4294901760, %v9967_v1 }
 0x258   : > { %10044 = vst [vmem:[#allocation190_spill] sm:$0xff] %v7480_v39  ;;  %10045 = vst [vmem:[#allocation189_spill] sm:$0xff] %v7494_v57  ;;  %v7504_v42 = vand.u32 4294901760, %v1574_v2  ;;  %v7516_v36 = vand.u32 4294901760, %v1575_v19  ;;  %v10052_v8 = vand.u32 4294901760, %v9894_v23  ;;  %v7526_v25 = vpack.c.bf16 %v7480_v39, %v7475_v12 }
 0x259   : > { %v7509_v59 = vsub.f32 %v9965_v27, %v10047_v53  ;;  %v7514_v13 = vsub.f32 %v9967_v1, %v10049_v56  ;;  %v10055_v11 = vand.u32 4294901760, %v9895_v15  ;;  %v10068_v62 = vand.u32 4294901760, %v7405_v4 }
 0x25a   : > { %10046 = vst [vmem:[#allocation188_spill] sm:$0xff] %v7504_v42  ;;  %10051 = vst [vmem:[#allocation191_spill] sm:$0xff] %v7516_v36  ;;  %v7522_v47 = vsub.f32 %v9894_v23, %v10052_v8  ;;  %v7529_v54 = vsub.f32 %v1574_v2, %v7504_v42  ;;  %v7542_v56 = vsub.f32 %v1575_v19, %v7516_v36  ;;  %v10057_v8 = vand.u32 4294901760, %v9897_v63 }
 0x25b   : > { %10048 = vst [vmem:[#allocation193_spill] sm:$0xff] %v7509_v59  ;;  %10050 = vst [vmem:[#allocation192_spill] sm:$0xff] %v7514_v13  ;;  %v7535_v31 = vsub.f32 %v9895_v15, %v10055_v11  ;;  %v7539_v53 = vpack.c.bf16 %v7514_v13, %v7509_v59  ;;  %v10058_v2 = vand.u32 4294901760, %v9971_v60  ;;  %v10060_v11 = vand.u32 4294901760, %v9972_v58 }
 0x25c   : > { %10053 = vst [vmem:[#allocation194_spill] sm:$0xff] %v7526_v25  ;;  %10054 = vst [vmem:[#allocation198_spill] sm:$0xff] %v7529_v54  ;;  %v7547_v18 = vsub.f32 %v9897_v63, %v10057_v8  ;;  %v10062_v19 = vand.u32 4294901760, %v9898_v14  ;;  %v10063_v8 = vand.u32 4294901760, %v9975_v45  ;;  %v10074_v30 = vand.u32 4294901760, %v9900_v7 }
 0x25d   : > { %10056 = vst [vmem:[#allocation197_spill] sm:$0xff] %v7539_v53  ;;  %v7552_v49 = vsub.f32 %v9971_v60, %v10058_v2  ;;  %v7557_v1 = vsub.f32 %v9972_v58, %v10060_v11  ;;  %v10065_v2 = vand.u32 4294901760, %v9976_v32  ;;  %v10067_v58 = vand.u32 4294901760, %v7377_v43 }
 0x25e   : > { %v7563_v23 = vsub.f32 %v9898_v14, %v10062_v19  ;;  %v7568_v27 = vsub.f32 %v9975_v45, %v10063_v8  ;;  %v1802_v19 = vsub.f32 %v7405_v4, %v10068_v62  ;;  %v10070_v8 = vand.u32 4294901760, %v7529_v54 }
 0x25f   : > { %10059 = vst [vmem:[#allocation201_spill] sm:$0xff] %v7552_v49  ;;  %10061 = vst [vmem:[#allocation200_spill] sm:$0xff] %v7557_v1  ;;  %v7573_v60 = vsub.f32 %v9976_v32, %v10065_v2  ;;  %v1808_v15 = vsub.f32 %v7377_v43, %v10067_v58  ;;  %v7584_v14 = vpack.c.bf16 %v7557_v1, %v7552_v49  ;;  %v10071_v2 = vand.u32 4294901760, %v7418_v26 }
 0x260   : > { %10064 = vst [vmem:[#allocation204_spill] sm:$0xff] %v7568_v27  ;;  %v1713_v45 = vsub.f32 %v7529_v54, %v10070_v8  ;;  %v10073_v62 = vand.u32 4294901760, %v7542_v56  ;;  %v7604_v8 = vsub.f32 %v9900_v7, %v10074_v30  ;;  %v1779_v32 = vand.u32 4294901760, %v7392_v55 }
 0x261   : > { %10066 = vst [vmem:[#allocation203_spill] sm:$0xff] %v7573_v60  ;;  %10069 = vst [vmem:[#allocation207_spill] sm:$0xff] %v7584_v14  ;;  %v1814_v11 = vsub.f32 %v7418_v26, %v10071_v2  ;;  %v7595_v58 = vpack.c.bf16 %v7573_v60, %v7568_v27  ;;  %v7609_v2 = vsub.f32 %v9901_v52, %v10075_v22  ;;  %v1791_v30 = vand.u32 4294901760, %v7400_v38 }
 0x262   : > { %v1707_v63 = vsub.f32 %v7542_v56, %v10073_v62  ;;  %v10076_v62 = vand.u32 4294901760, %v9903_v46  ;;  %v1797_v7 = vand.u32 4294901760, %v7439_v29  ;;  %v1809_v16 = vand.u32 4294901760, %v1808_v15 }
 0x263   : > { %10072 = vst [vmem:[#allocation206_spill] sm:$0xff] %v7595_v58  ;;  %v1714_v3 = vand.u32 4294901760, %v1713_v45  ;;  %v1803_v22 = vand.u32 4294901760, %v1802_v19  ;;  %v10077_v52 = vand.u32 4294901760, %v7522_v47  ;;  %v10078_v44 = vand.u32 4294901760, %v9904_v20  ;;  %v10113_v58 = vld [vmem:[#allocation56_spill] sm:$0xff] }
 0x264   : > { %v7617_v51 = vsub.f32 %v9903_v46, %v10076_v62  ;;  %v1708_v35 = vand.u32 4294901760, %v1707_v63  ;;  %v1815_v62 = vand.u32 4294901760, %v1814_v11  ;;  %v10079_v63 = vand.u32 4294901760, %v7535_v31 }
 0x265   : > { %v1820_v55 = vsub.f32 %v7522_v47, %v10077_v52  ;;  %v7627_v17 = vsub.f32 %v9904_v20, %v10078_v44  ;;  %v10080_v45 = vand.u32 4294901760, %v7547_v18  ;;  %v10081_v19 = vand.u32 4294901760, %v7563_v23 }
 0x266   : > { %1709 = vmatprep.mubr.f32.mxu1 %v1708_v35  ;;  %v1832_v38 = vsub.f32 %v7535_v31, %v10079_v63  ;;  %v10082_v11 = vand.u32 4294901760, %v9906_v0  ;;  %v10084_v63 = vand.u32 4294901760, %v7372_v24  ;;  %v7654_v15 = vpack.c.bf16 %v1791_v30, %v1779_v32 }
 0x267   : > { %1715 = vmatmul.mubr.f32.vlgmr.msra.gmra.mrb[2].mxu1 %v1714_v3  ;;  %v1826_v52 = vsub.f32 %v7547_v18, %v10080_v45  ;;  %v1838_v44 = vsub.f32 %v7563_v23, %v10081_v19  ;;  %v10083_v3 = vand.u32 4294901760, %v7353_v6  ;;  %v10087_v19 = vand.u32 4294901760, %v9907_v48 }
 0x268   : > { %v7644_v20 = vsub.f32 %v9906_v0, %v10082_v11  ;;  %4704 = vmatpush1.bf16.msra.mxu1 %v7382_v41  ;;  %2106 = vmatprep.mubr.f32.mxu1 %v7516_v36  ;;  %10086 = vst [vmem:[#allocation212_spill] sm:$0xff] %v7654_v15  ;;  %v7662_v11 = vpack.c.bf16 %v1809_v16, %v1797_v7  ;;  %v1821_v29 = vand.u32 4294901760, %v1820_v55  ;;  %v10089_v6 = vand.u32 4294901760, %v9909_v21  ;;  %v10108_v41 = vld [vmem:[#allocation54_spill] sm:$0xff] }
 0x269   : > { %v7652_v45 = vpack.c.bf16 %v10084_v63, %v10083_v3  ;;  %v7659_v35 = vsub.f32 %v9907_v48, %v10087_v19  ;;  %4706 = vmatprep.subr.bf16.mxu1 %v7384_v34  ;;  %v7670_v3 = vpack.c.bf16 %v1815_v62, %v1803_v22  ;;  %v1833_v32 = vand.u32 4294901760, %v1832_v38 }
 0x26a   : > { %10088 = vst [vmem:[#allocation215_spill] sm:$0xff] %v7662_v11  ;;  %v7668_v24 = vsub.f32 %v9909_v21, %v10089_v6  ;;  %v10091_v30 = vand.u32 4294901760, %v7604_v8  ;;  %v10092_v19 = vand.u32 4294901760, %v7609_v2  ;;  %v1827_v16 = vand.u32 4294901760, %v1826_v52 }
 0x26b   : > { %10085 = vst [vmem:[#allocation209_spill] sm:$0xff] %v7652_v45  ;;  %10090 = vst [vmem:[#allocation218_spill] sm:$0xff] %v7670_v3  ;;  %v1839_v55 = vand.u32 4294901760, %v1838_v44  ;;  %v10093_v0 = vand.u32 4294901760, %v7617_v51  ;;  %v10094_v62 = vand.u32 4294901760, %v9910_v10  ;;  %v10097_v44 = vld [vmem:[#allocation52_spill] sm:$0xff] }
 0x26c   : > { %v1844_v63 = vsub.f32 %v7604_v8, %v10091_v30  ;;  %v1856_v7 = vsub.f32 %v7609_v2, %v10092_v19  ;;  %4708 = vmatpush1.bf16.msra.mxu1 %v7386_v61  ;;  %v10095_v30 = vld [vmem:[#allocation50_spill] sm:$0xff]  ;;  %v10098_v19 = vand.u32 4294901760, %v10097_v44  ;;  %v10100_v6 = vand.u32 4294901760, %v7627_v17 }
 0x26d   : > { %v1850_v46 = vsub.f32 %v7617_v51, %v10093_v0  ;;  %v7687_v38 = vsub.f32 %v9910_v10, %v10094_v62  ;;  %v10096_v21 = vand.u32 4294901760, %v10095_v30  ;;  %4710 = vmatprep.subr.bf16.mxu1 %v7652_v45  ;;  %v10101_v62 = vld [vmem:[#allocation49_spill] sm:$0xff]  ;;  %v10109_v36 = vand.u32 4294901760, %v10108_v41 }
 0x26e   : > { %v7697_v0 = vsub.f32 %v10097_v44, %v10098_v19  ;;  %v1862_v22 = vsub.f32 %v7627_v17, %v10100_v6  ;;  %v10102_v10 = vand.u32 4294901760, %v10101_v62  ;;  %v7714_v19 = vpack.c.bf16 %v1833_v32, %v1821_v29 }
 0x26f   : > { %v7692_v52 = vsub.f32 %v10095_v30, %v10096_v21  ;;  %v10104_v21 = vld [vmem:[#allocation51_spill] sm:$0xff]  ;;  %v1845_v44 = vand.u32 4294901760, %v1844_v63  ;;  %v1857_v45 = vand.u32 4294901760, %v1856_v7  ;;  %v7719_v6 = vsub.f32 %v10108_v41, %v10109_v36  ;;  %v10119_v36 = vld [vmem:[#allocation53_spill] sm:$0xff] }
 0x270   : > { %10099 = vst [vmem:[#allocation222_spill] sm:$0xff] %v7697_v0  ;;  %v7707_v61 = vsub.f32 %v10101_v62, %v10102_v10  ;;  %v10105_v30 = vand.u32 4294901760, %v10104_v21  ;;  %10107 = vst [vmem:[#allocation230_spill] sm:$0xff] %v7714_v19  ;;  %v7721_v48 = vpack.c.bf16 %v1839_v55, %v1827_v16  ;;  %v1851_v54 = vand.u32 4294901760, %v1850_v46  ;;  %4712 = vmatpush1.bf16.msra.mxu1 %v7654_v15  ;;  %v10121_v46 = vld [vmem:[#allocation55_spill] sm:$0xff]  ;;  %v10123_v55 = vld [vmem:[#allocation58_spill] sm:$0xff] }
 0x271   : > { %10110 = vst [vmem:[#allocation232_spill] sm:$0xff] %v7719_v6  ;;  %v10112_v10 = vand.u32 4294901760, %v7644_v20  ;;  %v10114_v14 = vand.u32 4294901760, %v10113_v58  ;;  %v10116_v29 = vand.u32 4294901760, %v7659_v35  ;;  %4714 = vmatprep.subr.bf16.mxu1 %v7662_v11  ;;  %v1863_v7 = vand.u32 4294901760, %v1862_v22 }
 0x272   : > { %10103 = vst [vmem:[#allocation224_spill] sm:$0xff] %v7707_v61  ;;  %v7712_v34 = vsub.f32 %v10104_v21, %v10105_v30  ;;  %10111 = vst [vmem:[#allocation234_spill] sm:$0xff] %v7721_v48  ;;  %v10117_v16 = vand.u32 4294901760, %v7668_v24  ;;  %v7744_v21 = vpack.c.bf16 %v1857_v45, %v1845_v44  ;;  %v10120_v41 = vand.u32 4294901760, %v10119_v36  ;;  %v10126_v44 = vld [vmem:[#allocation60_spill] sm:$0xff] }
 0x273   : > { %v1868_v62 = vsub.f32 %v7644_v20, %v10112_v10  ;;  %v7729_v30 = vsub.f32 %v10113_v58, %v10114_v14  ;;  %v1880_v32 = vsub.f32 %v7659_v35, %v10116_v29  ;;  %v10122_v58 = vand.u32 4294901760, %v10121_v46 }
 0x274   : > { %10106 = vst [vmem:[#allocation227_spill] sm:$0xff] %v7712_v34  ;;  %v1874_v14 = vsub.f32 %v7668_v24, %v10117_v16  ;;  %10118 = vst [vmem:[#allocation237_spill] sm:$0xff] %v7744_v21  ;;  %v7750_v63 = vsub.f32 %v10119_v36, %v10120_v41  ;;  %v10124_v15 = vand.u32 4294901760, %v10123_v55  ;;  %v10127_v29 = vand.u32 4294901760, %v10126_v44  ;;  %4716 = vmatpush1.bf16.msra.mxu1 %v7670_v3 }
 0x275   : > { %10115 = vst [vmem:[#allocation238_spill] sm:$0xff] %v7729_v30  ;;  %v7755_v22 = vsub.f32 %v10121_v46, %v10122_v58  ;;  %v1869_v11 = vand.u32 4294901760, %v1868_v62  ;;  %v1881_v41 = vand.u32 4294901760, %v1880_v32  ;;  %v10129_v36 = vand.u32 4294901760, %v7687_v38  ;;  %4718 = vmatprep.subr.bf16.mxu1 %v7714_v19  ;;  %v10136_v19 = vld [vmem:[#allocation57_spill] sm:$0xff] }
 0x276   : > { %v7761_v45 = vsub.f32 %v10123_v55, %v10124_v15  ;;  %v7766_v10 = vsub.f32 %v10126_v44, %v10127_v29  ;;  %v10130_v62 = vand.u32 4294901760, %v7692_v52  ;;  %v10131_v46 = vand.u32 4294901760, %v7697_v0 }
 0x277   : > { %v1886_v58 = vsub.f32 %v7687_v38, %v10129_v36  ;;  %v7779_v55 = vpack.c.bf16 %v1863_v7, %v1851_v54  ;;  %v1875_v29 = vand.u32 4294901760, %v1874_v14  ;;  %v10133_v44 = vand.u32 4294901760, %v7707_v61 }
 0x278   : > { %10125 = vst [vmem:[#allocation235_spill] sm:$0xff] %v7761_v45  ;;  %10128 = vst [vmem:[#allocation240_spill] sm:$0xff] %v7766_v10  ;;  %v1892_v16 = vsub.f32 %v7692_v52, %v10130_v62  ;;  %v1904_v15 = vsub.f32 %v7697_v0, %v10131_v46  ;;  %v10134_v3 = vand.u32 4294901760, %v7712_v34  ;;  %v10135_v53 = vand.u32 4294901760, %v7719_v6  ;;  %4720 = vmatpush1.bf16.msra.mxu1 %v7721_v48 }
 0x279   : > { %10132 = vst [vmem:[#allocation241_spill] sm:$0xff] %v7779_v55  ;;  %v1898_v32 = vsub.f32 %v7707_v61, %v10133_v44  ;;  %v10137_v54 = vand.u32 4294901760, %v10136_v19  ;;  %v10139_v14 = vand.u32 4294901760, %v7729_v30  ;;  %v7808_v46 = vpack.c.bf16 %v1881_v41, %v1869_v11  ;;  %4722 = vmatprep.subr.bf16.mxu1 %v7744_v21  ;;  %v10147_v61 = vld [vmem:[#allocation64_spill] sm:$0xff] }
 0x27a   : > { %v1910_v36 = vsub.f32 %v7712_v34, %v10134_v3  ;;  %v1916_v62 = vsub.f32 %v7719_v6, %v10135_v53  ;;  %v10141_v34 = vand.u32 4294901760, %v10140_v33  ;;  %v1887_v25 = vand.u32 4294901760, %v1886_v58 }
 0x27b   : > { %v7795_v7 = vsub.f32 %v10136_v19, %v10137_v54  ;;  %v1928_v44 = vsub.f32 %v7729_v30, %v10139_v14  ;;  %10143 = vst [vmem:[#allocation244_spill] sm:$0xff] %v7808_v46  ;;  %v1893_v54 = vand.u32 4294901760, %v1892_v16  ;;  %v1905_v19 = vand.u32 4294901760, %v1904_v15  ;;  %v10144_v30 = vld [vmem:[#allocation62_spill] sm:$0xff]  ;;  %v10157_v15 = vld [vmem:[#allocation63_spill] sm:$0xff] }
 0x27c   : > { %v7805_v53 = vsub.f32 %v10140_v33, %v10141_v34  ;;  %v1899_v6 = vand.u32 4294901760, %v1898_v32  ;;  %v1911_v14 = vand.u32 4294901760, %v1910_v36  ;;  %v10145_v57 = vand.u32 4294901760, %v10144_v30  ;;  %4724 = vmatpush1.bf16.msra.mxu1 %v7779_v55 }
 0x27d   : > { %10138 = vst [vmem:[#allocation242_spill] sm:$0xff] %v7795_v7  ;;  %v10148_v0 = vand.u32 4294901760, %v10147_v61  ;;  %v1917_v33 = vand.u32 4294901760, %v1916_v62  ;;  %v10149_v11 = vand.u32 4294901760, %v7750_v63  ;;  %v10150_v41 = vand.u32 4294901760, %v7755_v22  ;;  %4726 = vmatprep.subr.bf16.mxu1 %v7808_v46 }
 0x27e   : > { %10142 = vst [vmem:[#allocation243_spill] sm:$0xff] %v7805_v53  ;;  %v7814_v3 = vsub.f32 %v10144_v30, %v10145_v57  ;;  %v1929_v32 = vand.u32 4294901760, %v1928_v44  ;;  %v10151_v57 = vand.u32 4294901760, %v7761_v45  ;;  %v10152_v30 = vand.u32 4294901760, %v7766_v10 }
 0x27f   : > { %v7819_v34 = vsub.f32 %v10147_v61, %v10148_v0  ;;  %v1922_v16 = vsub.f32 %v7750_v63, %v10149_v11  ;;  %v1934_v58 = vsub.f32 %v7755_v22, %v10150_v41  ;;  %v7836_v11 = vpack.c.bf16 %v1887_v25, %v1875_v29  ;;  %v10155_v41 = vld [vmem:[#allocation61_spill] sm:$0xff]  ;;  %v10159_v25 = vld [vmem:[#allocation66_spill] sm:$0xff] }
 0x280   : > { %10146 = vst [vmem:[#allocation245_spill] sm:$0xff] %v7814_v3  ;;  %v1940_v36 = vsub.f32 %v7761_v45, %v10151_v57  ;;  %v1952_v0 = vsub.f32 %v7766_v10, %v10152_v30  ;;  %v7838_v61 = vpack.c.bf16 %v1905_v19, %v1893_v54  ;;  %v10156_v21 = vand.u32 4294901760, %v10155_v41  ;;  %v10161_v54 = vld [vmem:[#allocation68_spill] sm:$0xff] }
 0x281   : > { %10153 = vst [vmem:[#allocation246_spill] sm:$0xff] %v7836_v11  ;;  %v10158_v48 = vand.u32 4294901760, %v10157_v15  ;;  %v10160_v29 = vand.u32 4294901760, %v10159_v25  ;;  %v10162_v55 = vand.u32 4294901760, %v10161_v54  ;;  %v10164_v46 = vand.u32 4294901760, %v7795_v7  ;;  %4728 = vmatpush1.bf16.msra.mxu1 %v7836_v11 }
 0x282   : > { %10154 = vst [vmem:[#allocation247_spill] sm:$0xff] %v7838_v61  ;;  %v7843_v44 = vsub.f32 %v10155_v41, %v10156_v21  ;;  %v7863_v41 = vpack.c.bf16 %v1911_v14, %v1899_v6  ;;  %v7868_v10 = vpack.c.bf16 %v1929_v32, %v1917_v33  ;;  %v1941_v62 = vand.u32 4294901760, %v1940_v36  ;;  %v10167_v14 = vld [vmem:[#allocation70_spill] sm:$0xff]  ;;  %4730 = vmatprep.subr.bf16.mxu1 %v7838_v61 }
 0x283   : > { %v7848_v57 = vsub.f32 %v10157_v15, %v10158_v48  ;;  %v7856_v19 = vsub.f32 %v10159_v25, %v10160_v29  ;;  %v7861_v21 = vsub.f32 %v10161_v54, %v10162_v55  ;;  %v1923_v48 = vand.u32 4294901760, %v1922_v16 }
 0x284   : > { %10163 = vst [vmem:[#allocation248_spill] sm:$0xff] %v7863_v41  ;;  %v1935_v15 = vand.u32 4294901760, %v1934_v58  ;;  %v1946_v30 = vsub.f32 %v7795_v7, %v10164_v46  ;;  %10165 = vst [vmem:[#allocation249_spill] sm:$0xff] %v7868_v10  ;;  %v1953_v45 = vand.u32 4294901760, %v1952_v0  ;;  %v10166_v29 = vand.u32 4294901760, %v7805_v53  ;;  %v10169_v46 = vld [vmem:[#allocation72_spill] sm:$0xff] }
 0x285   : > { %v10168_v16 = vand.u32 4294901760, %v10167_v14  ;;  %v10170_v33 = vand.u32 4294901760, %v10169_v46  ;;  %v10171_v36 = vand.u32 4294901760, %v7814_v3  ;;  %v9323_v55 = vand.u32 4294901760, %v7856_v19  ;;  %4732 = vmatpush1.bf16.msra.mxu1 %v7863_v41 }
 0x286   : > { %v1958_v25 = vsub.f32 %v7805_v53, %v10166_v29  ;;  %v10172_v29 = vand.u32 4294901760, %v7819_v34  ;;  %v1947_v54 = vand.u32 4294901760, %v1946_v30  ;;  %v7897_v11 = vpack.c.bf16 %v1953_v45, %v1941_v62  ;;  %4734 = vmatprep.subr.bf16.mxu1 %v7868_v10 }
 0x287   : > { %v7879_v58 = vsub.f32 %v10167_v14, %v10168_v16  ;;  %v7884_v32 = vsub.f32 %v10169_v46, %v10170_v33  ;;  %v1964_v0 = vsub.f32 %v7814_v3, %v10171_v36  ;;  %v9325_v16 = vand.u32 4294901760, %v7861_v21  ;;  %v10175_v46 = vld [vmem:[#allocation74_spill] sm:$0xff]  ;;  %v10177_v36 = vld [vmem:[#allocation76_spill] sm:$0xff] }
 0x288   : > { %v1976_v6 = vsub.f32 %v7819_v34, %v10172_v29  ;;  %v7895_v14 = vpack.c.bf16 %v1935_v15, %v1923_v48  ;;  %10174 = vst [vmem:[#allocation251_spill] sm:$0xff] %v7897_v11  ;;  %v1959_v33 = vand.u32 4294901760, %v1958_v25  ;;  %v10176_v61 = vand.u32 4294901760, %v10175_v46 }
 0x289   : > { %v10178_v3 = vand.u32 4294901760, %v10177_v36  ;;  %v10179_v29 = vand.u32 4294901760, %v7843_v44  ;;  %v10180_v45 = vand.u32 4294901760, %v7848_v57  ;;  %v1965_v25 = vand.u32 4294901760, %v1964_v0 }
 0x28a   : > { %10173 = vst [vmem:[#allocation250_spill] sm:$0xff] %v7895_v14  ;;  %v7902_v53 = vsub.f32 %v10175_v46, %v10176_v61  ;;  %v1977_v48 = vand.u32 4294901760, %v1976_v6  ;;  %v7927_v46 = vpack.c.bf16 %v1959_v33, %v1947_v54  ;;  %4736 = vmatpush1.bf16.msra.mxu1 %v7895_v14  ;;  %v10185_v30 = vand.u32 4294901760, %v7426_v9 }
 0x28b   : > { %v7907_v7 = vsub.f32 %v10177_v36, %v10178_v3  ;;  %v1970_v15 = vsub.f32 %v7843_v44, %v10179_v29  ;;  %v1982_v62 = vsub.f32 %v7848_v57, %v10180_v45  ;;  %v1988_v3 = vsub.f32 %v7856_v19, %v9323_v55  ;;  %4738 = vmatprep.subr.bf16.mxu1 %v7897_v11 }
 0x28c   : > { %v2000_v29 = vsub.f32 %v7861_v21, %v9325_v16  ;;  %10181 = vst [vmem:[#allocation252_spill] sm:$0xff] %v7927_v46  ;;  %v10182_v55 = vand.u32 4294901760, %v7879_v58  ;;  %v10183_v16 = vand.u32 4294901760, %v7884_v32  ;;  %v7939_v54 = vpack.c.bf16 %v1977_v48, %v1965_v25 }
 0x28d   : > { %v1971_v6 = vand.u32 4294901760, %v1970_v15  ;;  %v1983_v0 = vand.u32 4294901760, %v1982_v62  ;;  %v1989_v33 = vand.u32 4294901760, %v1988_v3  ;;  %v2018_v45 = vsub.f32 %v7426_v9, %v10185_v30 }
 0x28e   : > { %v2012_v10 = vsub.f32 %v7879_v58, %v10182_v55  ;;  %v2024_v36 = vsub.f32 %v7884_v32, %v10183_v16  ;;  %10184 = vst [vmem:[#allocation253_spill] sm:$0xff] %v7939_v54  ;;  %v2001_v61 = vand.u32 4294901760, %v2000_v29  ;;  %v10186_v15 = vand.u32 4294901760, %v7431_v5  ;;  %4740 = vmatpush1.bf16.msra.mxu1 %v7927_v46 }
 0x28f   : > { %v10187_v55 = vand.u32 4294901760, %v7902_v53  ;;  %v10188_v16 = vand.u32 4294901760, %v7907_v7  ;;  %v7956_v3 = vpack.c.bf16 %v1983_v0, %v1971_v6  ;;  %4742 = vmatprep.subr.bf16.mxu1 %v7939_v54  ;;  %v9333_v41 = vand.u32 4294901760, %v7480_v39 }
 0x290   : > { %v2030_v62 = vsub.f32 %v7431_v5, %v10186_v15  ;;  %v2013_v30 = vand.u32 4294901760, %v2012_v10  ;;  %v2025_v29 = vand.u32 4294901760, %v2024_v36  ;;  %v7959_v15 = vpack.c.bf16 %v2001_v61, %v1989_v33 }
 0x291   : > { %v2036_v14 = vsub.f32 %v7902_v53, %v10187_v55  ;;  %v2048_v11 = vsub.f32 %v7907_v7, %v10188_v16  ;;  %10189 = vst [vmem:[#allocation254_spill] sm:$0xff] %v7956_v3  ;;  %v9332_v55 = vand.u32 4294901760, %v7475_v12  ;;  %v2019_v5 = vand.u32 4294901760, %v2018_v45 }
 0x292   : > { %10190 = vst [vmem:[#allocation255_spill] sm:$0xff] %v7959_v15  ;;  %v2031_v16 = vand.u32 4294901760, %v2030_v62  ;;  %v10191_v48 = vand.u32 4294901760, %v7444_v50  ;;  %v10192_v6 = vand.u32 4294901760, %v7466_v28  ;;  %4744 = vmatpush1.bf16.msra.mxu1 %v7956_v3  ;;  %v7970_v36 = vpack.c.bf16 %v2025_v29, %v2013_v30  ;;  %v10240_v3 = vld [vmem:[#allocation235_spill] sm:$0xff] }
 0x293   : > { %v2037_v9 = vand.u32 4294901760, %v2036_v14  ;;  %v2049_v25 = vand.u32 4294901760, %v2048_v11  ;;  %v9334_v61 = vand.u32 4294901760, %v7509_v59  ;;  %v9335_v0 = vand.u32 4294901760, %v7514_v13  ;;  %4746 = vmatprep.subr.bf16.mxu1 %v7959_v15 }
 0x294   : > { %v2042_v46 = vsub.f32 %v7444_v50, %v10191_v48  ;;  %v2054_v10 = vsub.f32 %v7466_v28, %v10192_v6  ;;  %10193 = vst [vmem:[#allocation256_spill] sm:$0xff] %v7970_v36  ;;  %v2060_v11 = vsub.f32 %v7475_v12, %v9332_v55  ;;  %v2072_v14 = vsub.f32 %v7480_v39, %v9333_v41  ;;  %v10196_v6 = vld [vmem:[#allocation152_spill] sm:$0xff]  ;;  %v10261_v39 = vld [vmem:[#allocation219_spill] sm:$0xff]  ;;  %v10270_v12 = vld [vmem:[#allocation162_spill] sm:$0xff] }
 0x295   : > { %v7983_v62 = vpack.c.bf16 %v2031_v16, %v2019_v5  ;;  %v7985_v48 = vpack.c.bf16 %v2049_v25, %v2037_v9  ;;  %v2066_v55 = vsub.f32 %v7509_v59, %v9334_v61  ;;  %v2078_v41 = vsub.f32 %v7514_v13, %v9335_v0  ;;  %v10257_v13 = vld [vmem:[#allocation207_spill] sm:$0xff]  ;;  %v10258_v59 = vld [vmem:[#allocation206_spill] sm:$0xff] }
 0x296   : > { %v2043_v30 = vand.u32 4294901760, %v2042_v46  ;;  %v2055_v29 = vand.u32 4294901760, %v2054_v10  ;;  %4748 = vmatpush1.bf16.msra.mxu1 %v10196_v6  ;;  %v2061_v9 = vand.u32 4294901760, %v2060_v11  ;;  %v2073_v5 = vand.u32 4294901760, %v2072_v14 }
 0x297   : > { %10194 = vst [vmem:[#allocation257_spill] sm:$0xff] %v7983_v62  ;;  %10195 = vst [vmem:[#allocation258_spill] sm:$0xff] %v7985_v48  ;;  %4750 = vmatprep.subr.bf16.mxu1 %v7970_v36  ;;  %v10197_v46 = vand.u32 4294901760, %v7552_v49  ;;  %v10198_v16 = vand.u32 4294901760, %v7557_v1  ;;  %v2067_v0 = vand.u32 4294901760, %v2066_v55  ;;  %v2079_v45 = vand.u32 4294901760, %v2078_v41 }
 0x298   : > { %v8003_v61 = vpack.c.bf16 %v2055_v29, %v2043_v30  ;;  %v10200_v33 = vand.u32 4294901760, %v7568_v27  ;;  %v10201_v11 = vand.u32 4294901760, %v7573_v60 }
 0x299   : > { %v2084_v25 = vsub.f32 %v7552_v49, %v10197_v46  ;;  %v2096_v10 = vsub.f32 %v7557_v1, %v10198_v16  ;;  %v8013_v46 = vpack.c.bf16 %v2073_v5, %v2061_v9  ;;  %v8016_v30 = vpack.c.bf16 %v2079_v45, %v2067_v0  ;;  %v10206_v9 = vld [vmem:[#allocation157_spill] sm:$0xff]  ;;  %v10207_v5 = vld [vmem:[#allocation151_spill] sm:$0xff]  ;;  %v10251_v1 = vld [vmem:[#allocation178_spill] sm:$0xff] }
 0x29a   : > { %10199 = vst [vmem:[#allocation259_spill] sm:$0xff] %v8003_v61  ;;  %4752 = vmatpush1.bf16.msra.mxu1 %v7983_v62  ;;  %v2090_v36 = vsub.f32 %v7568_v27, %v10200_v33  ;;  %v2102_v14 = vsub.f32 %v7573_v60, %v10201_v11  ;;  %v10209_v0 = vld [vmem:[#allocation153_spill] sm:$0xff]  ;;  %v10210_v45 = vld [vmem:[#allocation231_spill] sm:$0xff]  ;;  %v10236_v62 = vld [vmem:[#allocation232_spill] sm:$0xff] }
 0x29b   : > { %4754 = vmatprep.subr.bf16.mxu1 %v7985_v48  ;;  %10202 = vst [vmem:[#allocation260_spill] sm:$0xff] %v8013_v46  ;;  %v2085_v6 = vand.u32 4294901760, %v2084_v25  ;;  %v2097_v16 = vand.u32 4294901760, %v2096_v10  ;;  %10203 = vst [vmem:[#allocation261_spill] sm:$0xff] %v8016_v30  ;;  %v8027_v25 = vpack.c.bf16 %v10207_v5, %v10206_v9  ;;  %v10213_v10 = vld [vmem:[#allocation154_spill] sm:$0xff]  ;;  %v10246_v27 = vld [vmem:[#allocation245_spill] sm:$0xff] }
 0x29c   : > { %v2091_v55 = vand.u32 4294901760, %v2090_v36  ;;  %v2103_v41 = vand.u32 4294901760, %v2102_v14  ;;  %v8032_v36 = vpack.c.bf16 %v10210_v45, %v10209_v0  ;;  %v10215_v14 = vld [vmem:[#allocation155_spill] sm:$0xff]  ;;  %v10254_v49 = vld [vmem:[#allocation189_spill] sm:$0xff] }
 0x29d   : > { %v8019_v29 = vpack.c.bf16 %v2097_v16, %v2085_v6  ;;  %10208 = vst [vmem:[#allocation157_spill] sm:$0xff] %v8027_v25  ;;  %v10212_v6 = vld [vmem:[#allocation149_spill] sm:$0xff]  ;;  %v10216_v16 = vld [vmem:[#allocation159_spill] sm:$0xff] }
 0x29e   : > { %4756 = vmatpush1.bf16.msra.mxu1 %v8003_v61  ;;  %v8022_v33 = vpack.c.bf16 %v2103_v41, %v2091_v55  ;;  %10211 = vst [vmem:[#allocation151_spill] sm:$0xff] %v8032_v36  ;;  %v8037_v11 = vpack.c.bf16 %v10213_v10, %v10212_v6  ;;  %v8044_v55 = vpack.c.bf16 %v10216_v16, %v10215_v14  ;;  %v10218_v41 = vld [vmem:[#allocation170_spill] sm:$0xff]  ;;  %v10233_v61 = vld [vmem:[#allocation224_spill] sm:$0xff] }
 0x29f   : > { %4758 = vmatprep.subr.bf16.mxu1 %v8013_v46  ;;  %10204 = vst [vmem:[#allocation262_spill] sm:$0xff] %v8019_v29 }
 0x2a0   : > { %10205 = vst [vmem:[#allocation263_spill] sm:$0xff] %v8022_v33  ;;  %10214 = vst [vmem:[#allocation153_spill] sm:$0xff] %v8037_v11 }
 0x2a1   : > { %10217 = vst [vmem:[#allocation231_spill] sm:$0xff] %v8044_v55 }
 0x2a2   : > { %4760 = vmatpush1.bf16.msra.mxu1 %v8016_v30 }
 0x2a3   : > { %4762 = vmatprep.subr.bf16.mxu1 %v8019_v29 }
 0x2a6   : > { %4764 = vmatpush1.bf16.msra.mxu1 %v8022_v33  ;;  %v10219_v33 = vld [vmem:[#allocation168_spill] sm:$0xff] }
 0x2a7   : > { %4766 = vmatprep.subr.bf16.mxu1 %v8027_v25  ;;  %v8049_v29 = vpack.c.bf16 %v10219_v33, %v10218_v41  ;;  %v8054_v25 = vpack.c.bf16 %v7341_v37, %v7329_v40 }
 0x2a9   : > { %2108 = vmatmul.mubr.f32.vlgmr.msra.gmra.mrb[2].mxu1 %v7504_v42  ;;  %10220 = vst [vmem:[#allocation149_spill] sm:$0xff] %v8049_v29  ;;  %10221 = vst [vmem:[#allocation154_spill] sm:$0xff] %v8054_v25  ;;  %v10243_v42 = vld [vmem:[#allocation242_spill] sm:$0xff] }
 0x2aa   : > { %4768 = vmatpush1.bf16.msra.mxu1 %v8032_v36  ;;  %2308 = vmatprep.mubr.f32.mxu1 %v7542_v56  ;;  %v10222_v36 = vld [vmem:[#allocation171_spill] sm:$0xff] }
 0x2ab   : > { %4770 = vmatprep.subr.bf16.mxu1 %v8037_v11  ;;  %v8059_v30 = vpack.c.bf16 %v7377_v43, %v10222_v36  ;;  %v8064_v11 = vpack.c.bf16 %v7418_v26, %v7405_v4 }
 0x2ad   : > { %10223 = vst [vmem:[#allocation155_spill] sm:$0xff] %v8059_v30  ;;  %10224 = vst [vmem:[#allocation159_spill] sm:$0xff] %v8064_v11 }
 0x2ae   : > { %4772 = vmatpush1.bf16.msra.mxu1 %v8044_v55  ;;  %v8069_v55 = vpack.c.bf16 %v7535_v31, %v7522_v47 }
 0x2af   : > { %4774 = vmatprep.subr.bf16.mxu1 %v8049_v29  ;;  %v8074_v29 = vpack.c.bf16 %v7563_v23, %v7547_v18 }
 0x2b0   : > { %10225 = vst [vmem:[#allocation170_spill] sm:$0xff] %v8069_v55 }
 0x2b1   : > { %10226 = vst [vmem:[#allocation168_spill] sm:$0xff] %v8074_v29 }
 0x2b2   : > { %4776 = vmatpush1.bf16.msra.mxu1 %v8054_v25  ;;  %v8079_v25 = vpack.c.bf16 %v7609_v2, %v7604_v8 }
 0x2b3   : > { %4778 = vmatprep.subr.bf16.mxu1 %v8059_v30  ;;  %v8084_v30 = vpack.c.bf16 %v7627_v17, %v7617_v51 }
 0x2b4   : > { %10227 = vst [vmem:[#allocation171_spill] sm:$0xff] %v8079_v25 }
 0x2b5   : > { %10228 = vst [vmem:[#allocation264_spill] sm:$0xff] %v8084_v30 }
 0x2b6   : > { %4780 = vmatpush1.bf16.msra.mxu1 %v8064_v11  ;;  %v8089_v11 = vpack.c.bf16 %v7659_v35, %v7644_v20 }
 0x2b7   : > { %4782 = vmatprep.subr.bf16.mxu1 %v8069_v55  ;;  %v8094_v55 = vpack.c.bf16 %v7687_v38, %v7668_v24 }
 0x2b8   : > { %10229 = vst [vmem:[#allocation265_spill] sm:$0xff] %v8089_v11 }
 0x2b9   : > { %10230 = vst [vmem:[#allocation266_spill] sm:$0xff] %v8094_v55 }
 0x2ba   : > { %4784 = vmatpush1.bf16.msra.mxu1 %v8074_v29  ;;  %v10231_v29 = vld [vmem:[#allocation222_spill] sm:$0xff] }
 0x2bb   : > { %4786 = vmatprep.subr.bf16.mxu1 %v8079_v25  ;;  %v8099_v46 = vpack.c.bf16 %v10231_v29, %v7692_v52  ;;  %v10234_v25 = vld [vmem:[#allocation227_spill] sm:$0xff] }
 0x2bc   : > { %v8104_v48 = vpack.c.bf16 %v10234_v25, %v10233_v61 }
 0x2bd   : > { %10232 = vst [vmem:[#allocation222_spill] sm:$0xff] %v8099_v46 }
 0x2be   : > { %4788 = vmatpush1.bf16.msra.mxu1 %v8084_v30  ;;  %10235 = vst [vmem:[#allocation224_spill] sm:$0xff] %v8104_v48  ;;  %v10237_v30 = vld [vmem:[#allocation238_spill] sm:$0xff] }
 0x2bf   : > { %4790 = vmatprep.subr.bf16.mxu1 %v8089_v11  ;;  %v8109_v15 = vpack.c.bf16 %v10237_v30, %v10236_v62  ;;  %v8114_v11 = vpack.c.bf16 %v7755_v22, %v7750_v63 }
 0x2c1   : > { %10238 = vst [vmem:[#allocation227_spill] sm:$0xff] %v8109_v15  ;;  %10239 = vst [vmem:[#allocation232_spill] sm:$0xff] %v8114_v11 }
 0x2c2   : > { %4792 = vmatpush1.bf16.msra.mxu1 %v8094_v55  ;;  %v10241_v55 = vld [vmem:[#allocation240_spill] sm:$0xff] }
 0x2c3   : > { %4794 = vmatprep.subr.bf16.mxu1 %v8099_v46  ;;  %v8119_v54 = vpack.c.bf16 %v10241_v55, %v10240_v3  ;;  %v10244_v46 = vld [vmem:[#allocation243_spill] sm:$0xff] }
 0x2c4   : > { %v8124_v60 = vpack.c.bf16 %v10244_v46, %v10243_v42 }
 0x2c5   : > { %10242 = vst [vmem:[#allocation238_spill] sm:$0xff] %v8119_v54 }
 0x2c6   : > { %4796 = vmatpush1.bf16.msra.mxu1 %v8104_v48  ;;  %10245 = vst [vmem:[#allocation235_spill] sm:$0xff] %v8124_v60  ;;  %v8129_v48 = vpack.c.bf16 %v7819_v34, %v10246_v27 }
 0x2c7   : > { %4798 = vmatprep.subr.bf16.mxu1 %v8109_v15  ;;  %v8134_v15 = vpack.c.bf16 %v7848_v57, %v7843_v44 }
 0x2c8   : > { %10247 = vst [vmem:[#allocation240_spill] sm:$0xff] %v8129_v48 }
 0x2c9   : > { %10248 = vst [vmem:[#allocation242_spill] sm:$0xff] %v8134_v15 }
 0x2ca   : > { %4800 = vmatpush1.bf16.msra.mxu1 %v8114_v11  ;;  %v8139_v11 = vpack.c.bf16 %v7861_v21, %v7856_v19 }
 0x2cb   : > { %4802 = vmatprep.subr.bf16.mxu1 %v8119_v54  ;;  %v8145_v54 = vpack.c.bf16 %v7884_v32, %v7879_v58 }
 0x2cc   : > { %10249 = vst [vmem:[#allocation243_spill] sm:$0xff] %v8139_v11 }
 0x2cd   : > { %10250 = vst [vmem:[#allocation245_spill] sm:$0xff] %v8145_v54 }
 0x2ce   : > { %4804 = vmatpush1.bf16.msra.mxu1 %v8124_v60  ;;  %v8151_v60 = vpack.c.bf16 %v7907_v7, %v7902_v53 }
 0x2cf   : > { %4806 = vmatprep.subr.bf16.mxu1 %v8129_v48  ;;  %v10253_v48 = vld [vmem:[#allocation182_spill] sm:$0xff] }
 0x2d0   : > { %10252 = vst [vmem:[#allocation267_spill] sm:$0xff] %v8151_v60 }
 0x2d2   : > { %4808 = vmatpush1.bf16.msra.mxu1 %v8134_v15  ;;  %v10255_v15 = vld [vmem:[#allocation194_spill] sm:$0xff] }
 0x2d3   : > { %4810 = vmatprep.subr.bf16.mxu1 %v8139_v11  ;;  %v10256_v11 = vld [vmem:[#allocation197_spill] sm:$0xff] }
 0x2d6   : > { %4812 = vmatpush1.bf16.msra.mxu1 %v10251_v1  ;;  %v10259_v1 = vld [vmem:[#allocation217_spill] sm:$0xff] }
 0x2d7   : > { %4814 = vmatprep.subr.bf16.mxu1 %v8145_v54  ;;  %v10260_v54 = vld [vmem:[#allocation198_spill] sm:$0xff] }
 0x2da   : > { %4816 = vmatpush1.bf16.msra.mxu1 %v10253_v48  ;;  %v10262_v48 = vand.u32 4294901760, %v7542_v56  ;;  %v10272_v56 = vld [vmem:[#allocation164_spill] sm:$0xff] }
 0x2db   : > { %4818 = vmatprep.subr.bf16.mxu1 %v8151_v60  ;;  %v10263_v60 = vld [vmem:[#allocation220_spill] sm:$0xff] }
 0x2de   : > { %4820 = vmatpush1.bf16.msra.mxu1 %v10254_v49  ;;  %v10264_v49 = vld [vmem:[#allocation223_spill] sm:$0xff] }
 0x2df   : > { %4822 = vmatprep.subr.bf16.mxu1 %v10255_v15  ;;  %v10265_v15 = vld [vmem:[#allocation225_spill] sm:$0xff] }
 0x2e2   : > { %4824 = vmatpush1.bf16.msra.mxu1 %v10256_v11  ;;  %v10266_v11 = vld [vmem:[#allocation228_spill] sm:$0xff] }
 0x2e3   : > { %4826 = vmatprep.subr.bf16.mxu1 %v10257_v13  ;;  %v10267_v13 = vld [vmem:[#allocation229_spill] sm:$0xff] }
 0x2e6   : > { %4828 = vmatpush1.bf16.msra.mxu1 %v10258_v59  ;;  %v10268_v59 = vld [vmem:[#allocation233_spill] sm:$0xff] }
 0x2e7   : > { %4830 = vmatprep.subr.bf16.mxu1 %v10259_v1  ;;  %v10269_v1 = vld [vmem:[#allocation236_spill] sm:$0xff] }
 0x2e9   : > { %2311 = vmatmul.mubr.f32.vlgmr.msra.gmra.mrb[2].mxu1 %v10260_v54 }
 0x2ea   : > { %4832 = vmatpush1.bf16.msra.mxu1 %v10261_v39  ;;  %2448 = vmatprep.mubr.f32.mxu1 %v10262_v48  ;;  %v10271_v39 = vld [vmem:[#allocation163_spill] sm:$0xff]  ;;  %v10273_v48 = vld [vmem:[#allocation165_spill] sm:$0xff] }
 0x2eb   : > { %4834 = vmatprep.subr.bf16.mxu1 %v10263_v60  ;;  %v10274_v60 = vld [vmem:[#allocation166_spill] sm:$0xff] }
 0x2ee   : > { %4836 = vmatpush1.bf16.msra.mxu1 %v10264_v49  ;;  %v10275_v49 = vld [vmem:[#allocation181_spill] sm:$0xff] }
 0x2ef   : > { %4838 = vmatprep.subr.bf16.mxu1 %v10265_v15  ;;  %v10276_v15 = vld [vmem:[#allocation184_spill] sm:$0xff] }
 0x2f2   : > { %4840 = vmatpush1.bf16.msra.mxu1 %v10266_v11  ;;  %v10277_v11 = vld [vmem:[#allocation195_spill] sm:$0xff] }
 0x2f3   : > { %4842 = vmatprep.subr.bf16.mxu1 %v10267_v13  ;;  %v10278_v13 = vld [vmem:[#allocation196_spill] sm:$0xff] }
 0x2f6   : > { %4844 = vmatpush1.bf16.msra.mxu1 %v10268_v59  ;;  %v10279_v59 = vld [vmem:[#allocation199_spill] sm:$0xff] }
 0x2f7   : > { %4846 = vmatprep.subr.bf16.mxu1 %v10269_v1  ;;  %v10280_v1 = vld [vmem:[#allocation202_spill] sm:$0xff] }
 0x2fa   : > { %4848 = vmatpush1.bf16.msra.mxu1 %v10270_v12  ;;  %v10281_v12 = vld [vmem:[#allocation239_spill] sm:$0xff] }
 0x2fb   : > { %4850 = vmatprep.subr.bf16.mxu1 %v10271_v39  ;;  %v10282_v39 = vld [vmem:[#allocation205_spill] sm:$0xff] }
 0x2fe   : > { %4852 = vmatpush1.bf16.msra.mxu1 %v10272_v56  ;;  %v10283_v56 = vld [vmem:[#allocation208_spill] sm:$0xff] }
 0x2ff   : > { %4854 = vmatprep.subr.bf16.mxu1 %v10273_v48  ;;  %v10284_v48 = vld [vmem:[#allocation210_spill] sm:$0xff] }
 0x302   : > { %4856 = vmatpush1.bf16.msra.mxu1 %v10274_v60  ;;  %v10285_v60 = vld [vmem:[#allocation211_spill] sm:$0xff] }
 0x303   : > { %4858 = vmatprep.subr.bf16.mxu1 %v10275_v49  ;;  %v10286_v49 = vld [vmem:[#allocation213_spill] sm:$0xff] }
 0x306   : > { %4860 = vmatpush1.bf16.msra.mxu1 %v10276_v15  ;;  %v10287_v15 = vld [vmem:[#allocation214_spill] sm:$0xff] }
 0x307   : > { %4862 = vmatprep.subr.bf16.mxu1 %v10277_v11  ;;  %v10288_v11 = vld [vmem:[#allocation216_spill] sm:$0xff] }
 0x30a   : > { %4864 = vmatpush1.bf16.msra.mxu1 %v10278_v13  ;;  %v10289_v13 = vld [vmem:[#allocation221_spill] sm:$0xff] }
 0x30b   : > { %4866 = vmatprep.subr.bf16.mxu1 %v10279_v59  ;;  %v10290_v59 = vld [vmem:[#allocation226_spill] sm:$0xff] }
 0x30e   : > { %4868 = vmatpush1.bf16.msra.mxu1 %v10280_v1  ;;  %v10291_v1 = vld [vmem:[#allocation156_spill] sm:$0xff] }
 0x30f   : > { %4870 = vmatprep.subr.bf16.mxu1 %v10281_v12 }
 0x312   : > { %4872 = vmatpush1.bf16.msra.mxu1 %v10282_v39  ;;  %v10292_v39 = vand.u32 4294901760, %v10206_v9  ;;  %v10299_v9 = vand.u32 4294901760, %v10260_v54  ;;  %v10305_v54 = vand.u32 4294901760, %v7329_v40  ;;  %v10315_v40 = vand.u32 4294901760, %v7535_v31 }
 0x313   : > { %4874 = vmatprep.subr.bf16.mxu1 %v10283_v56  ;;  %v10293_v56 = vand.u32 4294901760, %v10207_v5  ;;  %v10301_v5 = vand.u32 4294901760, %v10215_v14  ;;  %v10309_v14 = vand.u32 4294901760, %v7377_v43  ;;  %v10317_v43 = vand.u32 4294901760, %v7547_v18 }
 0x314   : > { %v10324_v31 = vand.u32 4294901760, %v7627_v17  ;;  %v10327_v18 = vand.u32 4294901760, %v7659_v35  ;;  %v10332_v17 = vand.u32 4294901760, %v7692_v52  ;;  %v10336_v35 = vand.u32 4294901760, %v10234_v25 }
 0x315   : > { %v8198_v12 = vpack.c.bf16 %v10293_v56, %v10292_v39  ;;  %v10300_v39 = vld [vmem:[#allocation191_spill] sm:$0xff]  ;;  %v10341_v52 = vand.u32 4294901760, %v7750_v63  ;;  %v10345_v25 = vand.u32 4294901760, %v10241_v55  ;;  %v10350_v63 = vand.u32 4294901760, %v10246_v27  ;;  %v10359_v27 = vld [vmem:[#allocation160_spill] sm:$0xff] }
 0x316   : > { %4876 = vmatpush1.bf16.msra.mxu1 %v10284_v48  ;;  %v10294_v48 = vld [vmem:[#allocation158_spill] sm:$0xff]  ;;  %v10354_v55 = vand.u32 4294901760, %v7848_v57  ;;  %v10365_v57 = vand.u32 4294901760, %v7884_v32  ;;  %v10376_v32 = vand.u32 4294901760, %v7466_v28 }
 0x317   : > { %4878 = vmatprep.subr.bf16.mxu1 %v10285_v60 }
 0x31a   : > { %4880 = vmatpush1.bf16.msra.mxu1 %v10286_v49  ;;  %v10295_v49 = vand.u32 4294901760, %v10209_v0  ;;  %v10303_v0 = vand.u32 4294901760, %v10218_v41  ;;  %v10312_v41 = vand.u32 4294901760, %v7418_v26  ;;  %v10321_v26 = vand.u32 4294901760, %v7609_v2 }
 0x31b   : > { %4882 = vmatprep.subr.bf16.mxu1 %v10287_v15  ;;  %v10296_v15 = vand.u32 4294901760, %v10210_v45  ;;  %v10306_v45 = vand.u32 4294901760, %v7341_v37  ;;  %v10314_v37 = vand.u32 4294901760, %v7522_v47  ;;  %v10323_v47 = vand.u32 4294901760, %v7617_v51 }
 0x31c   : > { %v10330_v2 = vand.u32 4294901760, %v7687_v38  ;;  %v10333_v51 = vand.u32 4294901760, %v10231_v29  ;;  %v10339_v38 = vand.u32 4294901760, %v10237_v30  ;;  %v10342_v29 = vand.u32 4294901760, %v7755_v22 }
 0x31d   : > { %v8205_v60 = vpack.c.bf16 %v10296_v15, %v10295_v49  ;;  %v10302_v49 = vand.u32 4294901760, %v10216_v16  ;;  %v10348_v30 = vand.u32 4294901760, %v10244_v46  ;;  %v10351_v22 = vand.u32 4294901760, %v7819_v34 }
 0x31e   : > { %4884 = vmatpush1.bf16.msra.mxu1 %v10288_v11  ;;  %v10357_v46 = vand.u32 4294901760, %v7861_v21  ;;  %v10360_v34 = vand.u32 4294901760, %v10359_v27 }
 0x31f   : > { %4886 = vmatprep.subr.bf16.mxu1 %v10289_v13  ;;  %v8222_v15 = vpack.c.bf16 %v10302_v49, %v10301_v5 }
 0x322   : > { %4888 = vmatpush1.bf16.msra.mxu1 %v10290_v59  ;;  %v10297_v59 = vand.u32 4294901760, %v10212_v6  ;;  %v8236_v6 = vpack.c.bf16 %v10306_v45, %v10305_v54  ;;  %v8299_v45 = vpack.c.bf16 %v10333_v51, %v10332_v17  ;;  %v10373_v17 = vand.u32 4294901760, %v7907_v7  ;;  %v10383_v7 = vld [vmem:[#allocation193_spill] sm:$0xff] }
 0x323   : > { %4890 = vmatprep.subr.bf16.mxu1 %v10291_v1  ;;  %v10298_v1 = vand.u32 4294901760, %v10213_v10  ;;  %v10308_v10 = vand.u32 4294901760, %v10222_v36  ;;  %v10318_v36 = vand.u32 4294901760, %v7563_v23  ;;  %v10326_v23 = vand.u32 4294901760, %v7644_v20 }
 0x324   : > { %10307 = vst [vmem:[#allocation198_spill] sm:$0xff] %v8236_v6  ;;  %10334 = vst [vmem:[#allocation273_spill] sm:$0xff] %v8299_v45  ;;  %v10335_v20 = vand.u32 4294901760, %v10233_v61  ;;  %v10344_v61 = vand.u32 4294901760, %v10240_v3  ;;  %v10353_v3 = vand.u32 4294901760, %v7843_v44  ;;  %v10364_v44 = vand.u32 4294901760, %v7879_v58 }
 0x325   : > { %v8212_v13 = vpack.c.bf16 %v10298_v1, %v10297_v59  ;;  %v10304_v1 = vand.u32 4294901760, %v10219_v33  ;;  %v8243_v16 = vpack.c.bf16 %v10309_v14, %v10308_v10  ;;  %v10311_v33 = vand.u32 4294901760, %v7405_v4 }
 0x326   : > { %4892 = vmatpush1.bf16.msra.mxu1 %v10294_v48  ;;  %v8264_v5 = vpack.c.bf16 %v10318_v36, %v10317_v43  ;;  %v10320_v4 = vand.u32 4294901760, %v7604_v8  ;;  %v10329_v8 = vand.u32 4294901760, %v7668_v24  ;;  %v8306_v10 = vpack.c.bf16 %v10336_v35, %v10335_v20  ;;  %v10378_v35 = vld [vmem:[#allocation185_spill] sm:$0xff] }
 0x327   : > { %4894 = vmatprep.subr.bf16.mxu1 %v8198_v12  ;;  %v8229_v59 = vpack.c.bf16 %v10304_v1, %v10303_v0  ;;  %10310 = vst [vmem:[#allocation216_spill] sm:$0xff] %v8243_v16  ;;  %v8250_v56 = vpack.c.bf16 %v10312_v41, %v10311_v33  ;;  %v8278_v0 = vpack.c.bf16 %v10324_v31, %v10323_v47  ;;  %v10338_v24 = vand.u32 4294901760, %v10236_v62 }
 0x328   : > { %10319 = vst [vmem:[#allocation268_spill] sm:$0xff] %v8264_v5  ;;  %v8271_v49 = vpack.c.bf16 %v10321_v26, %v10320_v4  ;;  %v8285_v1 = vpack.c.bf16 %v10327_v18, %v10326_v23  ;;  %v8292_v54 = vpack.c.bf16 %v10330_v2, %v10329_v8  ;;  %10337 = vst [vmem:[#allocation274_spill] sm:$0xff] %v8306_v10  ;;  %v10347_v62 = vand.u32 4294901760, %v10243_v42  ;;  %v10361_v4 = vld [vmem:[#allocation150_spill] sm:$0xff]  ;;  %v10369_v23 = vld [vmem:[#allocation180_spill] sm:$0xff] }
 0x329   : > { %2452 = vmatmul.mubr.f32.vlgmr.msra.gmra.mrb[2].mxu1 %v10299_v9  ;;  %10313 = vst [vmem:[#allocation158_spill] sm:$0xff] %v8250_v56  ;;  %v8257_v9 = vpack.c.bf16 %v10315_v40, %v10314_v37  ;;  %10325 = vst [vmem:[#allocation270_spill] sm:$0xff] %v8278_v0  ;;  %v8313_v14 = vpack.c.bf16 %v10339_v38, %v10338_v24  ;;  %v8320_v33 = vpack.c.bf16 %v10342_v29, %v10341_v52  ;;  %v10380_v38 = vld [vmem:[#allocation190_spill] sm:$0xff] }
 0x32a   : > { %4896 = vmatpush1.bf16.msra.mxu1 %v8205_v60  ;;  %2715 = vmatprep.mubr.f32.mxu1 %v10300_v39  ;;  %10322 = vst [vmem:[#allocation269_spill] sm:$0xff] %v8271_v49  ;;  %10328 = vst [vmem:[#allocation271_spill] sm:$0xff] %v8285_v1  ;;  %v8327_v41 = vpack.c.bf16 %v10345_v25, %v10344_v61  ;;  %v8334_v37 = vpack.c.bf16 %v10348_v30, %v10347_v62  ;;  %v10356_v42 = vand.u32 4294901760, %v7856_v19  ;;  %v10367_v19 = vld [vmem:[#allocation176_spill] sm:$0xff] }
 0x32b   : > { %4898 = vmatprep.subr.bf16.mxu1 %v8212_v13  ;;  %10316 = vst [vmem:[#allocation191_spill] sm:$0xff] %v8257_v9  ;;  %10331 = vst [vmem:[#allocation272_spill] sm:$0xff] %v8292_v54  ;;  %v8341_v40 = vpack.c.bf16 %v10351_v22, %v10350_v63  ;;  %v8348_v43 = vpack.c.bf16 %v10354_v55, %v10353_v3  ;;  %v10362_v26 = vand.u32 4294901760, %v10361_v4  ;;  %v10368_v21 = vand.u32 4294901760, %v10367_v19  ;;  %v10385_v61 = vld [vmem:[#allocation192_spill] sm:$0xff]  ;;  %v10403_v19 = vld [vmem:[#allocation225_spill] sm:$0xff] }
 0x32c   : > { %10340 = vst [vmem:[#allocation275_spill] sm:$0xff] %v8313_v14  ;;  %10343 = vst [vmem:[#allocation276_spill] sm:$0xff] %v8320_v33  ;;  %v8355_v36 = vpack.c.bf16 %v10357_v46, %v10356_v42  ;;  %v8369_v31 = vpack.c.bf16 %v10365_v57, %v10364_v44  ;;  %v10370_v18 = vand.u32 4294901760, %v10369_v23  ;;  %v10372_v2 = vand.u32 4294901760, %v7902_v53  ;;  %v10390_v30 = vld [vmem:[#allocation200_spill] sm:$0xff]  ;;  %v10395_v42 = vld [vmem:[#allocation203_spill] sm:$0xff] }
 0x32d   : > { %10346 = vst [vmem:[#allocation277_spill] sm:$0xff] %v8327_v41  ;;  %10349 = vst [vmem:[#allocation278_spill] sm:$0xff] %v8334_v37  ;;  %v8362_v47 = vpack.c.bf16 %v10362_v26, %v10360_v34  ;;  %v10375_v58 = vand.u32 4294901760, %v7444_v50  ;;  %v10379_v24 = vand.u32 4294901760, %v10378_v35  ;;  %v10381_v52 = vand.u32 4294901760, %v10380_v38  ;;  %v10388_v50 = vld [vmem:[#allocation201_spill] sm:$0xff] }
 0x32e   : > { %4900 = vmatpush1.bf16.msra.mxu1 %v8222_v15  ;;  %10352 = vst [vmem:[#allocation279_spill] sm:$0xff] %v8341_v40  ;;  %10355 = vst [vmem:[#allocation280_spill] sm:$0xff] %v8348_v43  ;;  %v8376_v8 = vpack.c.bf16 %v10370_v18, %v10368_v21  ;;  %v8383_v51 = vpack.c.bf16 %v10373_v17, %v10372_v2  ;;  %v10384_v53 = vand.u32 4294901760, %v10383_v7  ;;  %v10386_v25 = vand.u32 4294901760, %v10385_v61  ;;  %v10393_v3 = vld [vmem:[#allocation204_spill] sm:$0xff]  ;;  %v10398_v34 = vld [vmem:[#allocation217_spill] sm:$0xff] }
 0x32f   : > { %4902 = vmatprep.subr.bf16.mxu1 %v8229_v59  ;;  %10358 = vst [vmem:[#allocation281_spill] sm:$0xff] %v8355_v36  ;;  %10363 = vst [vmem:[#allocation160_spill] sm:$0xff] %v8362_v47  ;;  %v8390_v20 = vpack.c.bf16 %v10376_v32, %v10375_v58  ;;  %v8397_v29 = vpack.c.bf16 %v10381_v52, %v10379_v24  ;;  %v10389_v28 = vand.u32 4294901760, %v10388_v50  ;;  %v10391_v63 = vand.u32 4294901760, %v10390_v30  ;;  %v10399_v4 = vld [vmem:[#allocation188_spill] sm:$0xff]  ;;  %v10400_v26 = vld [vmem:[#allocation219_spill] sm:$0xff] }
 0x330   : > { %10366 = vst [vmem:[#allocation150_spill] sm:$0xff] %v8369_v31  ;;  %10371 = vst [vmem:[#allocation176_spill] sm:$0xff] %v8376_v8  ;;  %v8404_v62 = vpack.c.bf16 %v10386_v25, %v10384_v53  ;;  %v10394_v55 = vand.u32 4294901760, %v10393_v3  ;;  %v10396_v46 = vand.u32 4294901760, %v10395_v42  ;;  %v10401_v44 = vld [vmem:[#allocation220_spill] sm:$0xff]  ;;  %v10402_v57 = vld [vmem:[#allocation223_spill] sm:$0xff] }
 0x331   : > { %10374 = vst [vmem:[#allocation180_spill] sm:$0xff] %v8383_v51  ;;  %10377 = vst [vmem:[#allocation282_spill] sm:$0xff] %v8390_v20  ;;  %v8411_v22 = vpack.c.bf16 %v10391_v63, %v10389_v28  ;;  %v10404_v21 = vld [vmem:[#allocation228_spill] sm:$0xff]  ;;  %v10405_v23 = vld [vmem:[#allocation229_spill] sm:$0xff] }
 0x332   : > { %4904 = vmatpush1.bf16.msra.mxu1 %v8236_v6  ;;  %10382 = vst [vmem:[#allocation185_spill] sm:$0xff] %v8397_v29  ;;  %10387 = vst [vmem:[#allocation190_spill] sm:$0xff] %v8404_v62  ;;  %v8418_v27 = vpack.c.bf16 %v10396_v46, %v10394_v55  ;;  %v10406_v18 = vld [vmem:[#allocation233_spill] sm:$0xff]  ;;  %v10407_v2 = vld [vmem:[#allocation236_spill] sm:$0xff] }
 0x333   : > { %4906 = vmatprep.subr.bf16.mxu1 %v8243_v16  ;;  %10392 = vst [vmem:[#allocation193_spill] sm:$0xff] %v8411_v22  ;;  %v10408_v17 = vld [vmem:[#allocation162_spill] sm:$0xff]  ;;  %v10409_v58 = vld [vmem:[#allocation163_spill] sm:$0xff]  ;;  %v10410_v32 = vld [vmem:[#allocation164_spill] sm:$0xff] }
 0x334   : > { %10397 = vst [vmem:[#allocation192_spill] sm:$0xff] %v8418_v27  ;;  %v10412_v35 = vld [vmem:[#allocation166_spill] sm:$0xff]  ;;  %v10413_v24 = vld [vmem:[#allocation181_spill] sm:$0xff]  ;;  %v10414_v38 = vld [vmem:[#allocation184_spill] sm:$0xff] }
 0x335   : > { %v10415_v52 = vld [vmem:[#allocation195_spill] sm:$0xff]  ;;  %v10416_v7 = vld [vmem:[#allocation196_spill] sm:$0xff]  ;;  %v10418_v61 = vld [vmem:[#allocation202_spill] sm:$0xff] }
 0x336   : > { %4908 = vmatpush1.bf16.msra.mxu1 %v8250_v56  ;;  %v10417_v53 = vld [vmem:[#allocation199_spill] sm:$0xff]  ;;  %v10420_v50 = vld [vmem:[#allocation205_spill] sm:$0xff]  ;;  %v10421_v28 = vld [vmem:[#allocation208_spill] sm:$0xff] }
 0x337   : > { %4910 = vmatprep.subr.bf16.mxu1 %v8257_v9  ;;  %v10419_v25 = vld [vmem:[#allocation239_spill] sm:$0xff]  ;;  %v10422_v30 = vld [vmem:[#allocation210_spill] sm:$0xff]  ;;  %v10424_v3 = vld [vmem:[#allocation213_spill] sm:$0xff] }
 0x338   : > { %v10423_v63 = vld [vmem:[#allocation211_spill] sm:$0xff]  ;;  %v10425_v55 = vld [vmem:[#allocation214_spill] sm:$0xff]  ;;  %v10426_v42 = vld [vmem:[#allocation221_spill] sm:$0xff] }
 0x339   : > { %v10427_v46 = vld [vmem:[#allocation226_spill] sm:$0xff]  ;;  %v10437_v9 = vld [vmem:[#allocation172_spill] sm:$0xff] }
 0x33a   : > { %4912 = vmatpush1.bf16.msra.mxu1 %v8264_v5 }
 0x33b   : > { %4914 = vmatprep.subr.bf16.mxu1 %v8271_v49 }
 0x33e   : > { %4916 = vmatpush1.bf16.msra.mxu1 %v8278_v0  ;;  %v10436_v0 = vld [vmem:[#allocation186_spill] sm:$0xff] }
 0x33f   : > { %4918 = vmatprep.subr.bf16.mxu1 %v8285_v1 }
 0x342   : > { %4920 = vmatpush1.bf16.msra.mxu1 %v8292_v54 }
 0x343   : > { %4922 = vmatprep.subr.bf16.mxu1 %v8299_v45  ;;  %v10434_v45 = vld [vmem:[#allocation183_spill] sm:$0xff] }
 0x346   : > { %4924 = vmatpush1.bf16.msra.mxu1 %v8306_v10 }
 0x347   : > { %4926 = vmatprep.subr.bf16.mxu1 %v8313_v14 }
 0x34a   : > { %4928 = vmatpush1.bf16.msra.mxu1 %v8320_v33 }
 0x34b   : > { %4930 = vmatprep.subr.bf16.mxu1 %v8327_v41 }
 0x34e   : > { %4932 = vmatpush1.bf16.msra.mxu1 %v8334_v37  ;;  %v10432_v37 = vld [vmem:[#allocation167_spill] sm:$0xff] }
 0x34f   : > { %4934 = vmatprep.subr.bf16.mxu1 %v8341_v40 }
 0x352   : > { %4936 = vmatpush1.bf16.msra.mxu1 %v8348_v43 }
 0x353   : > { %4938 = vmatprep.subr.bf16.mxu1 %v8355_v36 }
 0x356   : > { %4940 = vmatpush1.bf16.msra.mxu1 %v8362_v47 }
 0x357   : > { %4942 = vmatprep.subr.bf16.mxu1 %v8369_v31  ;;  %v10431_v31 = vld [vmem:[#allocation161_spill] sm:$0xff] }
 0x35a   : > { %4944 = vmatpush1.bf16.msra.mxu1 %v8376_v8 }
 0x35b   : > { %4946 = vmatprep.subr.bf16.mxu1 %v8383_v51  ;;  %v8462_v51 = vld [vmem:[%s7237_s18 + $0x8] sm:$0xff] }
 0x35c   : > { %10430 = vst [vmem:[#allocation200_spill] sm:$0xff] %v8462_v51 }
 0x35e   : > { %4948 = vmatpush1.bf16.msra.mxu1 %v8390_v20 }
 0x35f   : > { %4950 = vmatprep.subr.bf16.mxu1 %v8397_v29 }
 0x362   : > { %4952 = vmatpush1.bf16.msra.mxu1 %v8404_v62  ;;  %v8458_v62 = vld [vmem:[%s7237_s18] sm:$0xff] }
 0x363   : > { %4954 = vmatprep.subr.bf16.mxu1 %v8411_v22  ;;  %10429 = vst [vmem:[#allocation201_spill] sm:$0xff] %v8458_v62 }
 0x366   : > { %4956 = vmatpush1.bf16.msra.mxu1 %v8418_v27  ;;  %v10428_v27 = vld [vmem:[#allocation156_spill] sm:$0xff] }
 0x367   : > { %4958 = vmatprep.subr.bf16.mxu1 %v10398_v34 }
 0x369   : > { %2717 = vmatmul.mubr.f32.vlgmr.msra.gmra.mrb[2].mxu1 %v10399_v4 }
 0x36a   : > { %4960 = vmatpush1.bf16.msra.mxu1 %v10400_v26  ;;  %2852 = vmatprep.mubr.f32.mxu1 %v10300_v39  ;;  %v10411_v39 = vld [vmem:[#allocation165_spill] sm:$0xff] }
 0x36b   : > { %4962 = vmatprep.subr.bf16.mxu1 %v10401_v44 }
 0x36e   : > { %4964 = vmatpush1.bf16.msra.mxu1 %v10402_v57 }
 0x36f   : > { %4966 = vmatprep.subr.bf16.mxu1 %v10403_v19 }
 0x372   : > { %4968 = vmatpush1.bf16.msra.mxu1 %v10404_v21 }
 0x373   : > { %4970 = vmatprep.subr.bf16.mxu1 %v10405_v23 }
 0x376   : > { %4972 = vmatpush1.bf16.msra.mxu1 %v10406_v18 }
 0x377   : > { %4974 = vmatprep.subr.bf16.mxu1 %v10407_v2 }
 0x37a   : > { %4976 = vmatpush1.bf16.msra.mxu1 %v10408_v17 }
 0x37b   : > { %4978 = vmatprep.subr.bf16.mxu1 %v10409_v58 }
 0x37e   : > { %4980 = vmatpush1.bf16.msra.mxu1 %v10410_v32 }
 0x37f   : > { %4982 = vmatprep.subr.bf16.mxu1 %v10411_v39 }
 0x382   : > { %4984 = vmatpush1.bf16.msra.mxu1 %v10412_v35 }
 0x383   : > { %4986 = vmatprep.subr.bf16.mxu1 %v10413_v24 }
 0x386   : > { %4988 = vmatpush1.bf16.msra.mxu1 %v10414_v38 }
 0x387   : > { %4990 = vmatprep.subr.bf16.mxu1 %v10415_v52 }
 0x38a   : > { %4992 = vmatpush1.bf16.msra.mxu1 %v10416_v7 }
 0x38b   : > { %4994 = vmatprep.subr.bf16.mxu1 %v10417_v53 }
 0x38e   : > { %4996 = vmatpush1.bf16.msra.mxu1 %v10418_v61 }
 0x38f   : > { %4998 = vmatprep.subr.bf16.mxu1 %v10419_v25 }
 0x392   : > { %5000 = vmatpush1.bf16.msra.mxu1 %v10420_v50 }
 0x393   : > { %5002 = vmatprep.subr.bf16.mxu1 %v10421_v28 }
 0x396   : > { %5004 = vmatpush1.bf16.msra.mxu1 %v10422_v30 }
 0x397   : > { %5006 = vmatprep.subr.bf16.mxu1 %v10423_v63 }
 0x39a   : > { %5008 = vmatpush1.bf16.msra.mxu1 %v10424_v3 }
 0x39b   : > { %5010 = vmatprep.subr.bf16.mxu1 %v10425_v55 }
 0x39e   : > { %5012 = vmatpush1.bf16.msra.mxu1 %v10288_v11 }
 0x39f   : > { %5014 = vmatprep.subr.bf16.mxu1 %v10426_v42 }
 0x3a2   : > { %5016 = vmatpush1.bf16.msra.mxu1 %v10427_v46 }
 0x3a3   : > { %5018 = vmatprep.subr.bf16.mxu1 %v10428_v27 }
 0x3a6   : > { %5020 = vmatpush1.bf16.msra.mxu1 %v10294_v48 }
 0x3a9   : > { %2854 = vmatmul.mubr.f32.vlgmr.msra.gmra.mrb[2].mxu1 %v10399_v4 }
 0x47c   : > { %v2855_v22 = vpop.f32.mrb[2].mxu1 }
 0x47d   : > { %v5407_v29 = vadd.f32 %v8458_v62, %v2855_v22  ;;  %v2857_v20 = vpop.f32.mrb[3].mxu1 }
 0x47e   : > { %v5408_v8 = vadd.f32 %v8462_v51, %v2857_v20  ;;  %v10433_v51 = vld [vmem:[#allocation173_spill] sm:$0xff] }
 0x47f   : > { %v2862_v47 = vsub.f32 %v5407_v29, %v10431_v31  ;;  %v2872_v36 = vadd.f32 %v5407_v29, %v10431_v31  ;;  %vm2884_vm8 = vcmp.ge.f32.partialorder %v5407_v29, %v10434_v45  ;;  %vm2860_vm10 = vcmp.ge.f32.partialorder %v5407_v29, %v10437_v9 }
 0x480   : > { %v2863_v43 = vsub.f32 %v5408_v8, %v10431_v31  ;;  %v2873_v40 = vadd.f32 %v5408_v8, %v10431_v31  ;;  %v10435_v31 = vld [vmem:[#allocation177_spill] sm:$0xff]  ;;  %vm2885_vm9 = vcmp.ge.f32.partialorder %v5408_v8, %v10436_v0  ;;  %vm2861_vm12 = vcmp.ge.f32.partialorder %v5408_v8, %v10437_v9 }
 0x481   : > { %v2864_v4 = vadd.f32 %v2862_v47, %v10432_v37  ;;  %v2868_v41 = vsub.f32 %v2862_v47, %v10432_v37  ;;  %v2874_v33 = vadd.f32 %v2872_v36, %v10432_v37 }
 0x482   : > { %v2865_v22 = vadd.f32 %v2863_v43, %v10432_v37  ;;  %v2869_v62 = vsub.f32 %v2863_v43, %v10432_v37  ;;  %v2875_v20 = vadd.f32 %v2873_v40, %v10432_v37  ;;  %v10438_v43 = vld [vmem:[#allocation179_spill] sm:$0xff] }
 0x483   : > { %v2866_v14 = vmin.f32 %v2864_v4, %v10433_v51  ;;  %v2882_v10 = vmax.f32 %v2868_v41, 0.0  ;;  %v2886_v54 = vsel %vm2884_vm8, %v10433_v51, %v2864_v4  ;;  %v2876_v36 = vmin.f32 %v2874_v33, 0.0  ;;  %v10439_v4 = vld [vmem:[#allocation187_spill] sm:$0xff] }
 0x484   : > { %v2867_v1 = vmin.f32 %v2865_v22, %v10435_v31  ;;  %v2883_v47 = vmax.f32 %v2869_v62, 0.0  ;;  %v2887_v5 = vsel %vm2885_vm9, %v10435_v31, %v2865_v22  ;;  %vm2880_vm11 = vcmp.ge.f32.partialorder %v5407_v29, %v10438_v43  ;;  %v10443_v29 = vld [vmem:[#allocation209_spill] sm:$0xff] }
 0x485   : > { %v2870_v49 = vmax.f32 %v2866_v14, %v2868_v41  ;;  %v2877_v40 = vmin.f32 %v2875_v20, 0.0  ;;  %v2888_v16 = vsel %vm2880_vm11, %v2882_v10, %v2886_v54  ;;  %vm2881_vm13 = vcmp.ge.f32.partialorder %v5408_v8, %v10439_v4  ;;  %v10440_v10 = vld [vmem:[#allocation169_spill] sm:$0xff]  ;;  %v10442_v8 = vld [vmem:[#allocation174_spill] sm:$0xff]  ;;  %v10445_v20 = vld [vmem:[#allocation215_spill] sm:$0xff] }
 0x486   : > { %v2871_v37 = vmax.f32 %v2867_v1, %v2869_v62  ;;  %v2889_v6 = vsel %vm2881_vm13, %v2883_v47, %v2887_v5  ;;  %v10444_v62 = vld [vmem:[#allocation212_spill] sm:$0xff]  ;;  %v10446_v47 = vld [vmem:[#allocation218_spill] sm:$0xff] }
 0x487   : > { %v2878_v56 = vsel %vm2860_vm10, %v2870_v49, %v2876_v36  ;;  %v10447_v36 = vld [vmem:[#allocation230_spill] sm:$0xff] }
 0x488   : > { %v2879_v45 = vsel %vm2861_vm12, %v2871_v37, %v2877_v40  ;;  %v2890_v14 = vsel %vm1572_vm6, %v2878_v56, %v2888_v16  ;;  %v10441_v37 = vld [vmem:[#allocation175_spill] sm:$0xff]  ;;  %v10448_v40 = vld [vmem:[#allocation234_spill] sm:$0xff] }
 0x489   : > { %v2891_v33 = vsel %vm1573_vm7, %v2879_v45, %v2889_v6  ;;  %v8489_v41 = vand.u32 4294901760, %v2890_v14 }
 0x48a   : > { %v8491_v22 = vand.u32 4294901760, %v2891_v33 }
 0x48b   : > { %v8494_v1 = vsub.f32 %v2890_v14, %v8489_v41  ;;  %v10449_v14 = vld [vmem:[#allocation237_spill] sm:$0xff] }
 0x48c   : > { %v8497_v49 = vsub.f32 %v2891_v33, %v8491_v22  ;;  %v10450_v33 = vld [vmem:[#allocation241_spill] sm:$0xff] }
 0x48d   : > { %v3028_v54 = vand.u32 4294901760, %v8494_v1 }
 0x48e   : > { %v3022_v5 = vand.u32 4294901760, %v8497_v49 }
 0x48f   : > { %v3029_v16 = vsub.f32 %v8494_v1, %v3028_v54 }
 0x490   : > { %v3023_v6 = vsub.f32 %v8497_v49, %v3022_v5 }
 0x491   : > { %v3030_v45 = vand.u32 4294901760, %v3029_v16  ;;  %v10451_v16 = vld [vmem:[#allocation244_spill] sm:$0xff] }
 0x492   : > { %v3024_v56 = vand.u32 4294901760, %v3023_v6  ;;  %v10452_v6 = vld [vmem:[#allocation246_spill] sm:$0xff] }
 0x494   : > { %3025 = vmatprep.mubr.f32.mxu0 %v3024_v56  ;;  %v10453_v56 = vld [vmem:[#allocation247_spill] sm:$0xff] }
 0x495   : > { %3031 = vmatmul.mubr.f32.vlgmr.msra.gmra.mrb[2].mxu0 %v3030_v45  ;;  %v10454_v45 = vld [vmem:[#allocation248_spill] sm:$0xff] }
 0x496   : > { %5088 = vmatpush1.bf16.msra.mxu0 %v10440_v10  ;;  %3422 = vmatprep.mubr.f32.mxu0 %v8491_v22  ;;  %v10455_v10 = vld [vmem:[#allocation249_spill] sm:$0xff] }
 0x497   : > { %5090 = vmatprep.subr.bf16.mxu0 %v10441_v37  ;;  %v10456_v37 = vld [vmem:[#allocation250_spill] sm:$0xff] }
 0x49a   : > { %5092 = vmatpush1.bf16.msra.mxu0 %v10442_v8  ;;  %v10457_v8 = vld [vmem:[#allocation251_spill] sm:$0xff] }
 0x49b   : > { %5094 = vmatprep.subr.bf16.mxu0 %v10443_v29  ;;  %v10458_v29 = vld [vmem:[#allocation252_spill] sm:$0xff] }
 0x49e   : > { %5096 = vmatpush1.bf16.msra.mxu0 %v10444_v62  ;;  %v10459_v62 = vld [vmem:[#allocation253_spill] sm:$0xff] }
 0x49f   : > { %5098 = vmatprep.subr.bf16.mxu0 %v10445_v20  ;;  %v10460_v20 = vld [vmem:[#allocation254_spill] sm:$0xff] }
 0x4a2   : > { %5100 = vmatpush1.bf16.msra.mxu0 %v10446_v47  ;;  %v10461_v47 = vld [vmem:[#allocation255_spill] sm:$0xff] }
 0x4a3   : > { %5102 = vmatprep.subr.bf16.mxu0 %v10447_v36  ;;  %v10462_v36 = vld [vmem:[#allocation152_spill] sm:$0xff] }
 0x4a6   : > { %5104 = vmatpush1.bf16.msra.mxu0 %v10448_v40  ;;  %v10463_v40 = vld [vmem:[#allocation256_spill] sm:$0xff] }
 0x4a7   : > { %5106 = vmatprep.subr.bf16.mxu0 %v10449_v14  ;;  %v10464_v14 = vld [vmem:[#allocation257_spill] sm:$0xff] }
 0x4aa   : > { %5108 = vmatpush1.bf16.msra.mxu0 %v10450_v33  ;;  %v10465_v33 = vld [vmem:[#allocation258_spill] sm:$0xff] }
 0x4ab   : > { %5110 = vmatprep.subr.bf16.mxu0 %v10451_v16  ;;  %v10466_v16 = vld [vmem:[#allocation259_spill] sm:$0xff] }
 0x4ae   : > { %5112 = vmatpush1.bf16.msra.mxu0 %v10452_v6  ;;  %v10467_v6 = vld [vmem:[#allocation260_spill] sm:$0xff] }
 0x4af   : > { %5114 = vmatprep.subr.bf16.mxu0 %v10453_v56  ;;  %v10468_v56 = vld [vmem:[#allocation261_spill] sm:$0xff] }
 0x4b2   : > { %5116 = vmatpush1.bf16.msra.mxu0 %v10454_v45  ;;  %v10469_v45 = vld [vmem:[#allocation262_spill] sm:$0xff] }
 0x4b3   : > { %5118 = vmatprep.subr.bf16.mxu0 %v10455_v10  ;;  %v10470_v10 = vld [vmem:[#allocation263_spill] sm:$0xff] }
 0x4b6   : > { %5120 = vmatpush1.bf16.msra.mxu0 %v10456_v37  ;;  %v10471_v37 = vld [vmem:[#allocation157_spill] sm:$0xff] }
 0x4b7   : > { %5122 = vmatprep.subr.bf16.mxu0 %v10457_v8  ;;  %v10472_v8 = vld [vmem:[#allocation151_spill] sm:$0xff] }
 0x4ba   : > { %5124 = vmatpush1.bf16.msra.mxu0 %v10458_v29  ;;  %v10473_v29 = vld [vmem:[#allocation153_spill] sm:$0xff] }
 0x4bb   : > { %5126 = vmatprep.subr.bf16.mxu0 %v10459_v62  ;;  %v10474_v62 = vld [vmem:[#allocation231_spill] sm:$0xff] }
 0x4be   : > { %5128 = vmatpush1.bf16.msra.mxu0 %v10460_v20  ;;  %v10475_v20 = vld [vmem:[#allocation149_spill] sm:$0xff] }
 0x4bf   : > { %5130 = vmatprep.subr.bf16.mxu0 %v10461_v47  ;;  %v10476_v47 = vld [vmem:[#allocation154_spill] sm:$0xff] }
 0x4c2   : > { %5132 = vmatpush1.bf16.msra.mxu0 %v10462_v36  ;;  %v10477_v36 = vld [vmem:[#allocation155_spill] sm:$0xff] }
 0x4c3   : > { %5134 = vmatprep.subr.bf16.mxu0 %v10463_v40  ;;  %v10478_v40 = vld [vmem:[#allocation159_spill] sm:$0xff] }
 0x4c6   : > { %5136 = vmatpush1.bf16.msra.mxu0 %v10464_v14  ;;  %v10479_v14 = vld [vmem:[#allocation170_spill] sm:$0xff] }
 0x4c7   : > { %5138 = vmatprep.subr.bf16.mxu0 %v10465_v33  ;;  %v10480_v33 = vld [vmem:[#allocation168_spill] sm:$0xff] }
 0x4ca   : > { %5140 = vmatpush1.bf16.msra.mxu0 %v10466_v16  ;;  %v10481_v16 = vld [vmem:[#allocation171_spill] sm:$0xff] }
 0x4cb   : > { %5142 = vmatprep.subr.bf16.mxu0 %v10467_v6  ;;  %v10482_v6 = vld [vmem:[#allocation264_spill] sm:$0xff] }
 0x4ce   : > { %5144 = vmatpush1.bf16.msra.mxu0 %v10468_v56  ;;  %v10483_v56 = vld [vmem:[#allocation265_spill] sm:$0xff] }
 0x4cf   : > { %5146 = vmatprep.subr.bf16.mxu0 %v10469_v45  ;;  %v10484_v45 = vld [vmem:[#allocation266_spill] sm:$0xff] }
 0x4d2   : > { %5148 = vmatpush1.bf16.msra.mxu0 %v10470_v10  ;;  %v10485_v10 = vld [vmem:[#allocation222_spill] sm:$0xff] }
 0x4d3   : > { %5150 = vmatprep.subr.bf16.mxu0 %v10471_v37  ;;  %v10486_v37 = vld [vmem:[#allocation224_spill] sm:$0xff] }
 0x4d5   : > { %3424 = vmatmul.mubr.f32.vlgmr.msra.gmra.mrb[2].mxu0 %v8489_v41 }
 0x4d6   : > { %5152 = vmatpush1.bf16.msra.mxu0 %v10472_v8  ;;  %3624 = vmatprep.mubr.f32.mxu0 %v8497_v49  ;;  %v10487_v8 = vld [vmem:[#allocation227_spill] sm:$0xff]  ;;  %v10503_v49 = vld [vmem:[#allocation198_spill] sm:$0xff] }
 0x4d7   : > { %5154 = vmatprep.subr.bf16.mxu0 %v10473_v29  ;;  %v10488_v29 = vld [vmem:[#allocation232_spill] sm:$0xff] }
 0x4da   : > { %5156 = vmatpush1.bf16.msra.mxu0 %v10474_v62  ;;  %v10489_v62 = vld [vmem:[#allocation238_spill] sm:$0xff] }
 0x4db   : > { %5158 = vmatprep.subr.bf16.mxu0 %v10475_v20  ;;  %v10490_v20 = vld [vmem:[#allocation235_spill] sm:$0xff] }
 0x4de   : > { %5160 = vmatpush1.bf16.msra.mxu0 %v10476_v47  ;;  %v10491_v47 = vld [vmem:[#allocation240_spill] sm:$0xff] }
 0x4df   : > { %5162 = vmatprep.subr.bf16.mxu0 %v10477_v36  ;;  %v10492_v36 = vld [vmem:[#allocation242_spill] sm:$0xff] }
 0x4e2   : > { %5164 = vmatpush1.bf16.msra.mxu0 %v10478_v40  ;;  %v10493_v40 = vld [vmem:[#allocation243_spill] sm:$0xff] }
 0x4e3   : > { %5166 = vmatprep.subr.bf16.mxu0 %v10479_v14  ;;  %v10494_v14 = vld [vmem:[#allocation178_spill] sm:$0xff] }
 0x4e6   : > { %5168 = vmatpush1.bf16.msra.mxu0 %v10480_v33  ;;  %v10495_v33 = vld [vmem:[#allocation245_spill] sm:$0xff] }
 0x4e7   : > { %5170 = vmatprep.subr.bf16.mxu0 %v10481_v16  ;;  %v10496_v16 = vld [vmem:[#allocation182_spill] sm:$0xff] }
 0x4ea   : > { %5172 = vmatpush1.bf16.msra.mxu0 %v10482_v6  ;;  %v10497_v6 = vld [vmem:[#allocation267_spill] sm:$0xff] }
 0x4eb   : > { %5174 = vmatprep.subr.bf16.mxu0 %v10483_v56  ;;  %v10498_v56 = vld [vmem:[#allocation189_spill] sm:$0xff] }
 0x4ee   : > { %5176 = vmatpush1.bf16.msra.mxu0 %v10484_v45  ;;  %v10499_v45 = vld [vmem:[#allocation194_spill] sm:$0xff] }
 0x4ef   : > { %5178 = vmatprep.subr.bf16.mxu0 %v10485_v10  ;;  %v10500_v10 = vld [vmem:[#allocation197_spill] sm:$0xff] }
 0x4f2   : > { %5180 = vmatpush1.bf16.msra.mxu0 %v10486_v37  ;;  %v10501_v37 = vld [vmem:[#allocation207_spill] sm:$0xff] }
 0x4f3   : > { %5182 = vmatprep.subr.bf16.mxu0 %v10487_v8  ;;  %v10502_v8 = vld [vmem:[#allocation206_spill] sm:$0xff] }
 0x4f6   : > { %5184 = vmatpush1.bf16.msra.mxu0 %v10488_v29  ;;  %v10505_v29 = vld [vmem:[#allocation158_spill] sm:$0xff] }
 0x4f7   : > { %5186 = vmatprep.subr.bf16.mxu0 %v10489_v62  ;;  %v10510_v62 = vld [vmem:[#allocation271_spill] sm:$0xff] }
 0x4fa   : > { %5188 = vmatpush1.bf16.msra.mxu0 %v10490_v20  ;;  %v10514_v20 = vld [vmem:[#allocation275_spill] sm:$0xff] }
 0x4fb   : > { %5190 = vmatprep.subr.bf16.mxu0 %v10491_v47  ;;  %v10515_v47 = vld [vmem:[#allocation276_spill] sm:$0xff] }
 0x4fe   : > { %5192 = vmatpush1.bf16.msra.mxu0 %v10492_v36  ;;  %v10516_v36 = vld [vmem:[#allocation277_spill] sm:$0xff] }
 0x4ff   : > { %5194 = vmatprep.subr.bf16.mxu0 %v10493_v40  ;;  %v10517_v40 = vld [vmem:[#allocation278_spill] sm:$0xff] }
 0x502   : > { %5196 = vmatpush1.bf16.msra.mxu0 %v10494_v14  ;;  %v10518_v14 = vld [vmem:[#allocation279_spill] sm:$0xff] }
 0x503   : > { %5198 = vmatprep.subr.bf16.mxu0 %v10495_v33  ;;  %v10519_v33 = vld [vmem:[#allocation280_spill] sm:$0xff] }
 0x506   : > { %5200 = vmatpush1.bf16.msra.mxu0 %v10496_v16  ;;  %v10520_v16 = vld [vmem:[#allocation281_spill] sm:$0xff] }
 0x507   : > { %5202 = vmatprep.subr.bf16.mxu0 %v10497_v6  ;;  %v10521_v6 = vld [vmem:[#allocation160_spill] sm:$0xff] }
 0x50a   : > { %5204 = vmatpush1.bf16.msra.mxu0 %v10498_v56  ;;  %v10522_v56 = vld [vmem:[#allocation150_spill] sm:$0xff] }
 0x50b   : > { %5206 = vmatprep.subr.bf16.mxu0 %v10499_v45  ;;  %v10523_v45 = vld [vmem:[#allocation176_spill] sm:$0xff] }
 0x50e   : > { %5208 = vmatpush1.bf16.msra.mxu0 %v10500_v10  ;;  %v10524_v10 = vld [vmem:[#allocation180_spill] sm:$0xff] }
 0x50f   : > { %5210 = vmatprep.subr.bf16.mxu0 %v10501_v37  ;;  %v10525_v37 = vld [vmem:[#allocation282_spill] sm:$0xff] }
 0x512   : > { %5212 = vmatpush1.bf16.msra.mxu0 %v10502_v8  ;;  %v10526_v8 = vld [vmem:[#allocation185_spill] sm:$0xff] }
 0x513   : > { %5214 = vmatprep.subr.bf16.mxu0 %v10398_v34 }
 0x515   : > { %3627 = vmatmul.mubr.f32.vlgmr.msra.gmra.mrb[2].mxu0 %v8494_v1  ;;  %v10507_v1 = vld [vmem:[#allocation268_spill] sm:$0xff] }
 0x516   : > { %5216 = vmatpush1.bf16.msra.mxu0 %v10400_v26  ;;  %3764 = vmatprep.mubr.f32.mxu0 %v3022_v5  ;;  %v10504_v5 = vld [vmem:[#allocation216_spill] sm:$0xff] }
 0x517   : > { %5218 = vmatprep.subr.bf16.mxu0 %v10401_v44 }
 0x51a   : > { %5220 = vmatpush1.bf16.msra.mxu0 %v10402_v57 }
 0x51b   : > { %5222 = vmatprep.subr.bf16.mxu0 %v10403_v19 }
 0x51e   : > { %5224 = vmatpush1.bf16.msra.mxu0 %v10404_v21 }
 0x51f   : > { %5226 = vmatprep.subr.bf16.mxu0 %v10405_v23 }
 0x522   : > { %5228 = vmatpush1.bf16.msra.mxu0 %v10406_v18 }
 0x523   : > { %5230 = vmatprep.subr.bf16.mxu0 %v10407_v2 }
 0x526   : > { %5232 = vmatpush1.bf16.msra.mxu0 %v10408_v17 }
 0x527   : > { %5234 = vmatprep.subr.bf16.mxu0 %v10409_v58 }
 0x52a   : > { %5236 = vmatpush1.bf16.msra.mxu0 %v10410_v32 }
 0x52b   : > { %5238 = vmatprep.subr.bf16.mxu0 %v10411_v39 }
 0x52e   : > { %5240 = vmatpush1.bf16.msra.mxu0 %v10412_v35 }
 0x52f   : > { %5242 = vmatprep.subr.bf16.mxu0 %v10413_v24 }
 0x532   : > { %5244 = vmatpush1.bf16.msra.mxu0 %v10414_v38 }
 0x533   : > { %5246 = vmatprep.subr.bf16.mxu0 %v10415_v52 }
 0x536   : > { %5248 = vmatpush1.bf16.msra.mxu0 %v10416_v7 }
 0x537   : > { %5250 = vmatprep.subr.bf16.mxu0 %v10417_v53 }
 0x53a   : > { %5252 = vmatpush1.bf16.msra.mxu0 %v10418_v61 }
 0x53b   : > { %5254 = vmatprep.subr.bf16.mxu0 %v10419_v25 }
 0x53e   : > { %5256 = vmatpush1.bf16.msra.mxu0 %v10420_v50 }
 0x53f   : > { %5258 = vmatprep.subr.bf16.mxu0 %v10421_v28 }
 0x542   : > { %5260 = vmatpush1.bf16.msra.mxu0 %v10422_v30 }
 0x543   : > { %5262 = vmatprep.subr.bf16.mxu0 %v10423_v63 }
 0x546   : > { %5264 = vmatpush1.bf16.msra.mxu0 %v10424_v3 }
 0x547   : > { %5266 = vmatprep.subr.bf16.mxu0 %v10425_v55 }
 0x54a   : > { %5268 = vmatpush1.bf16.msra.mxu0 %v10288_v11 }
 0x54b   : > { %5270 = vmatprep.subr.bf16.mxu0 %v10426_v42 }
 0x54e   : > { %5272 = vmatpush1.bf16.msra.mxu0 %v10427_v46 }
 0x54f   : > { %5274 = vmatprep.subr.bf16.mxu0 %v10428_v27 }
 0x552   : > { %5276 = vmatpush1.bf16.msra.mxu0 %v10294_v48 }
 0x553   : > { %5278 = vmatprep.subr.bf16.mxu0 %v8198_v12  ;;  %v10506_v12 = vld [vmem:[#allocation191_spill] sm:$0xff] }
 0x555   : > { %3768 = vmatmul.mubr.f32.vlgmr.msra.gmra.mrb[2].mxu0 %v3028_v54  ;;  %v10508_v54 = vld [vmem:[#allocation269_spill] sm:$0xff] }
 0x556   : > { %5280 = vmatpush1.bf16.msra.mxu0 %v8205_v60  ;;  %4031 = vmatprep.mubr.f32.mxu0 %v8491_v22  ;;  %v10509_v60 = vld [vmem:[#allocation270_spill] sm:$0xff] }
 0x557   : > { %5282 = vmatprep.subr.bf16.mxu0 %v8212_v13  ;;  %v10511_v13 = vld [vmem:[#allocation272_spill] sm:$0xff] }
 0x55a   : > { %5284 = vmatpush1.bf16.msra.mxu0 %v8222_v15  ;;  %v10512_v15 = vld [vmem:[#allocation273_spill] sm:$0xff] }
 0x55b   : > { %5286 = vmatprep.subr.bf16.mxu0 %v8229_v59  ;;  %v10513_v59 = vld [vmem:[#allocation274_spill] sm:$0xff] }
 0x55e   : > { %5288 = vmatpush1.bf16.msra.mxu0 %v10503_v49  ;;  %v10527_v49 = vld [vmem:[#allocation190_spill] sm:$0xff] }
 0x55f   : > { %5290 = vmatprep.subr.bf16.mxu0 %v10504_v5  ;;  %v10528_v5 = vld [vmem:[#allocation193_spill] sm:$0xff] }
 0x562   : > { %5292 = vmatpush1.bf16.msra.mxu0 %v10505_v29  ;;  %v10529_v29 = vld [vmem:[#allocation192_spill] sm:$0xff] }
 0x563   : > { %5294 = vmatprep.subr.bf16.mxu0 %v10506_v12 }
 0x566   : > { %5296 = vmatpush1.bf16.msra.mxu0 %v10507_v1 }
 0x567   : > { %5298 = vmatprep.subr.bf16.mxu0 %v10508_v54 }
 0x56a   : > { %5300 = vmatpush1.bf16.msra.mxu0 %v10509_v60 }
 0x56b   : > { %5302 = vmatprep.subr.bf16.mxu0 %v10510_v62 }
 0x56e   : > { %5304 = vmatpush1.bf16.msra.mxu0 %v10511_v13 }
 0x56f   : > { %5306 = vmatprep.subr.bf16.mxu0 %v10512_v15 }
 0x572   : > { %5308 = vmatpush1.bf16.msra.mxu0 %v10513_v59 }
 0x573   : > { %5310 = vmatprep.subr.bf16.mxu0 %v10514_v20 }
 0x576   : > { %5312 = vmatpush1.bf16.msra.mxu0 %v10515_v47 }
 0x577   : > { %5314 = vmatprep.subr.bf16.mxu0 %v10516_v36 }
 0x57a   : > { %5316 = vmatpush1.bf16.msra.mxu0 %v10517_v40 }
 0x57b   : > { %5318 = vmatprep.subr.bf16.mxu0 %v10518_v14 }
 0x57e   : > { %5320 = vmatpush1.bf16.msra.mxu0 %v10519_v33 }
 0x57f   : > { %5322 = vmatprep.subr.bf16.mxu0 %v10520_v16 }
 0x582   : > { %5324 = vmatpush1.bf16.msra.mxu0 %v10521_v6 }
 0x583   : > { %5326 = vmatprep.subr.bf16.mxu0 %v10522_v56 }
 0x586   : > { %5328 = vmatpush1.bf16.msra.mxu0 %v10523_v45 }
 0x587   : > { %5330 = vmatprep.subr.bf16.mxu0 %v10524_v10 }
 0x58a   : > { %5332 = vmatpush1.bf16.msra.mxu0 %v10525_v37 }
 0x58b   : > { %5334 = vmatprep.subr.bf16.mxu0 %v10526_v8 }
 0x58e   : > { %5336 = vmatpush1.bf16.msra.mxu0 %v10527_v49 }
 0x58f   : > { %5338 = vmatprep.subr.bf16.mxu0 %v10528_v5 }
 0x592   : > { %5340 = vmatpush1.bf16.msra.mxu0 %v10529_v29 }
 0x593   : > { %5342 = vmatprep.subr.bf16.mxu0 %v10398_v34 }
 0x595   : > { %4033 = vmatmul.mubr.f32.vlgmr.msra.gmra.mrb[2].mxu0 %v8489_v41 }
 0x596   : > { %5344 = vmatpush1.bf16.msra.mxu0 %v10400_v26  ;;  %4168 = vmatprep.mubr.f32.mxu0 %v8491_v22  ;;  %v10530_v26 = vld [vmem:[#allocation201_spill] sm:$0xff] }
 0x597   : > { %5346 = vmatprep.subr.bf16.mxu0 %v10401_v44 }
 0x59a   : > { %5348 = vmatpush1.bf16.msra.mxu0 %v10402_v57 }
 0x59b   : > { %5350 = vmatprep.subr.bf16.mxu0 %v10403_v19  ;;  %v10531_v19 = vld [vmem:[#allocation200_spill] sm:$0xff] }
 0x59e   : > { %5352 = vmatpush1.bf16.msra.mxu0 %v10404_v21 }
 0x59f   : > { %5354 = vmatprep.subr.bf16.mxu0 %v10405_v23  ;;  %v10532_v23 = vld [vmem:[#allocation161_spill] sm:$0xff] }
 0x5a2   : > { %5356 = vmatpush1.bf16.msra.mxu0 %v10406_v18 }
 0x5a3   : > { %5358 = vmatprep.subr.bf16.mxu0 %v10407_v2 }
 0x5a6   : > { %5360 = vmatpush1.bf16.msra.mxu0 %v10408_v17 }
 0x5a7   : > { %5362 = vmatprep.subr.bf16.mxu0 %v10409_v58  ;;  %v10533_v58 = vld [vmem:[#allocation167_spill] sm:$0xff] }
 0x5aa   : > { %5364 = vmatpush1.bf16.msra.mxu0 %v10410_v32 }
 0x5ab   : > { %5366 = vmatprep.subr.bf16.mxu0 %v10411_v39 }
 0x5ae   : > { %5368 = vmatpush1.bf16.msra.mxu0 %v10412_v35 }
 0x5af   : > { %5370 = vmatprep.subr.bf16.mxu0 %v10413_v24 }
 0x5b2   : > { %5372 = vmatpush1.bf16.msra.mxu0 %v10414_v38 }
 0x5b3   : > { %5374 = vmatprep.subr.bf16.mxu0 %v10415_v52 }
 0x5b6   : > { %5376 = vmatpush1.bf16.msra.mxu0 %v10416_v7  ;;  %v10534_v7 = vld [vmem:[#allocation183_spill] sm:$0xff] }
 0x5b7   : > { %5378 = vmatprep.subr.bf16.mxu0 %v10417_v53 }
 0x5ba   : > { %5380 = vmatpush1.bf16.msra.mxu0 %v10418_v61 }
 0x5bb   : > { %5382 = vmatprep.subr.bf16.mxu0 %v10419_v25 }
 0x5be   : > { %5384 = vmatpush1.bf16.msra.mxu0 %v10420_v50 }
 0x5bf   : > { %5386 = vmatprep.subr.bf16.mxu0 %v10421_v28 }
 0x5c2   : > { %5388 = vmatpush1.bf16.msra.mxu0 %v10422_v30 }
 0x5c3   : > { %5390 = vmatprep.subr.bf16.mxu0 %v10423_v63 }
 0x5c6   : > { %5392 = vmatpush1.bf16.msra.mxu0 %v10424_v3 }
 0x5c7   : > { %5394 = vmatprep.subr.bf16.mxu0 %v10425_v55 }
 0x5ca   : > { %5396 = vmatpush1.bf16.msra.mxu0 %v10288_v11 }
 0x5cb   : > { %5398 = vmatprep.subr.bf16.mxu0 %v10426_v42 }
 0x5ce   : > { %5400 = vmatpush1.bf16.msra.mxu0 %v10427_v46 }
 0x5cf   : > { %5402 = vmatprep.subr.bf16.mxu0 %v10428_v27 }
 0x5d2   : > { %5404 = vmatpush1.bf16.msra.mxu0 %v10294_v48 }
 0x5d5   : > { %4170 = vmatmul.mubr.f32.vlgmr.msra.gmra.mrb[2].mxu0 %v8489_v41 }
 0x6a8   : > { %v4171_v34 = vpop.f32.mrb[2].mxu0 }
 0x6a9   : > { %v5409_v44 = vadd.f32 %v10530_v26, %v4171_v34  ;;  %v4173_v57 = vpop.f32.mrb[3].mxu0 }
 0x6aa   : > { %v5410_v21 = vadd.f32 %v10531_v19, %v4173_v57 }
 0x6ab   : > { %v4178_v18 = vsub.f32 %v5409_v44, %v10532_v23  ;;  %v4188_v11 = vadd.f32 %v5409_v44, %v10532_v23  ;;  %vm4200_vm14 = vcmp.ge.f32.partialorder %v5409_v44, %v10534_v7  ;;  %vm4176_vm0 = vcmp.ge.f32.partialorder %v5409_v44, %v10437_v9 }
 0x6ac   : > { %v4179_v2 = vsub.f32 %v5410_v21, %v10532_v23  ;;  %v4189_v17 = vadd.f32 %v5410_v21, %v10532_v23  ;;  %vm4201_vm15 = vcmp.ge.f32.partialorder %v5410_v21, %v10436_v0  ;;  %vm4196_vm1 = vcmp.ge.f32.partialorder %v5409_v44, %v10438_v43 }
 0x6ad   : > { %v4180_v27 = vadd.f32 %v4178_v18, %v10533_v58  ;;  %v4184_v48 = vsub.f32 %v4178_v18, %v10533_v58  ;;  %v4190_v32 = vadd.f32 %v4188_v11, %v10533_v58  ;;  %vm4177_vm2 = vcmp.ge.f32.partialorder %v5410_v21, %v10437_v9 }
 0x6ae   : > { %v4181_v39 = vadd.f32 %v4179_v2, %v10533_v58  ;;  %v4185_v35 = vsub.f32 %v4179_v2, %v10533_v58  ;;  %v4191_v24 = vadd.f32 %v4189_v17, %v10533_v58  ;;  %vm4197_vm3 = vcmp.ge.f32.partialorder %v5410_v21, %v10439_v4 }
 0x6af   : > { %v4182_v38 = vmin.f32 %v4180_v27, %v10433_v51  ;;  %v4198_v52 = vmax.f32 %v4184_v48, 0.0  ;;  %v4202_v53 = vsel %vm4200_vm14, %v10433_v51, %v4180_v27  ;;  %v4192_v28 = vmin.f32 %v4190_v32, 0.0 }
 0x6b0   : > { %v4183_v61 = vmin.f32 %v4181_v39, %v10435_v31  ;;  %v4199_v25 = vmax.f32 %v4185_v35, 0.0  ;;  %v4203_v30 = vsel %vm4201_vm15, %v10435_v31, %v4181_v39  ;;  %v4193_v3 = vmin.f32 %v4191_v24, 0.0  ;;  %237 = sbr.rel (!%p235_p1) target bundleno = 167 (0xa7), region = 77 }
 0x6b1   : > { %v4186_v50 = vmax.f32 %v4182_v38, %v4184_v48  ;;  %v4204_v42 = vsel %vm4196_vm1, %v4198_v52, %v4202_v53 }
 0x6b2   : > { %v4187_v63 = vmax.f32 %v4183_v61, %v4185_v35  ;;  %v4205_v46 = vsel %vm4197_vm3, %v4199_v25, %v4203_v30 }
 0x6b3   : > { %v4194_v55 = vsel %vm4176_vm0, %v4186_v50, %v4192_v28 }
 0x6b4   : > { %v4206_v12 = vsel %vm1572_vm6, %v4194_v55, %v4204_v42   ;;  %v4195_v0 = vsel %vm4177_vm2, %v4187_v63, %v4193_v3 }
 0x6b5   : > { %4210 = vst [vmem:[%s4209_s21] sm:$0xff] %v4206_v12  ;;  %v4207_v13 = vsel %vm1573_vm7, %v4195_v0, %v4205_v46  }
 0x6b6   : > { %4211 = vst [vmem:[%s4209_s21 + $0x8] sm:$0xff] %v4207_v13 }
 0x6b7   :  { %5605 = shalt.err (!%p5602_p6)
}
 0x6b8   :  { %s5606_s27 = scalar_lea.hbm %s8734_s6, 1536 }
 0x6b9   :  { %p5607_p7 = scmp.ne.s32.totalorder %s8734_s6, %s5606_s27  ;;  %p5610_p8 = scmp.lt.u32.totalorder %s5606_s27, %s8734_s6 }
 0x6bb   :  { %p5612_p9 = pnand %p5610_p8, %p5607_p7 }
 0x6bd   :  { %5615 = shalt.err (!%p5612_p9)
}
 0x6be   :  { %4223 = dma.vmem_to_hbm [thread:$0]  %s4218_s23, 1536, %s8734_s6, [#allocation4], %s5652_s2, %s5652_s2, %s5653_s19  }
 0x6bf   :  { %5636 = dma.done.wait [#allocation4], 1536  }
 0x6c0   :  { %5637 = vsyncadd [#allocation4], 4294965760 }
 0x6c1   :  { %4227 = vsyncpa [#allocation3], 1 }
 0x6c2   :  { %4228 = vsyncpa [#allocation8], 1 }
 0x6c3   :  { %4229 = vsyncpa [#allocation11], 1 }
 0x6c4   :  { %4230 = vsyncpa [#allocation4], 1 }
 0x6c5   :  { %4231 = vsyncpa [#allocation5], 1 }

</bundles_post_ra>
